<compile_context>
chip_gen: v7x
topology: tpu7x:2x2x1
jax: 0.10.0
libtpu: 0.0.40
codegen_flags: <defaults>
</compile_context>

<pallas_src>
import functools
import math

import jax
import jax.numpy as jnp
from jax.experimental import pallas as pl
from jax.experimental.pallas import tpu as pltpu

_BN_EPS = 1e-5
_LANE = 128


# ----------------------------------------------------------------------------
# helpers
# ----------------------------------------------------------------------------
def _round_up(x, m):
    return ((x + m - 1) // m) * m


def _cdiv(a, b):
    return (a + b - 1) // b


def _tpu_caps():
    """Per-generation tiling / VMEM defaults derived from the attached TPU."""
    vmem = 64 * 1024 * 1024                      # conservative default (v7x-class)
    try:
        vmem = int(getattr(pltpu.get_tpu_info(), "vmem_capacity_bytes", vmem))
    except Exception:
        pass
    small_vmem = vmem < (96 << 20)               # v7x: 64 MiB/TC, 2 TCs
    budget = min(max((vmem * 5) // 8, 32 << 20), 100 << 20)
    max_tm = 512 if small_vmem else 1024         # v5e/v6e: 128 MiB, 1 TC -> go big
    return budget, max_tm, small_vmem


_VMEM_BYTES, _MAX_TM, _SPLIT_EVEN = _tpu_caps()


def _pick_tm(M):
    """Row tile for the (M, 128k) matmul kernels.  v5e/v6e: largest tile that
    divides M (one TC, fewer grid steps, bigger DMA bursts).  v7x: aim for an
    even number of 'parallel' row tiles so both TensorCores get equal work."""
    if _SPLIT_EVEN:
        target = min(_MAX_TM, _round_up(_cdiv(M, 2), 8))
    else:
        target = min(_MAX_TM, _round_up(M, 8))
    for cand in range(target, 7, -8):
        if M % cand == 0:
            return cand
    return target


# ----------------------------------------------------------------------------
# Pallas kernel 1: fused  Y = act( X @ W + b )   (bf16 in, f32 acc, f32 epilogue)
# Used for the fused cv1|cv2 matmul (bf16 out) and for cv3 (f32 out).  W columns
# are pre-padded to a multiple of 128 so the store is lane-dense.
# ----------------------------------------------------------------------------
def _mm_bias_act_kernel(x_ref, w_ref, b_ref, o_ref, *, act):
    y = jnp.dot(x_ref[...], w_ref[...], preferred_element_type=jnp.float32)
    y = y + b_ref[...]
    if act == "silu":
        y = y * jax.nn.sigmoid(y)        # f32 epilogue (valid on v5e's EUP)
    o_ref[...] = y.astype(o_ref.dtype)


def matmul_bias_act(x_bf16, w_bf16, b_f32, *, act, out_dtype, tm):
    M, K = x_bf16.shape
    Np = w_bf16.shape[1]
    assert M % tm == 0 and Np % _LANE == 0
    return pl.pallas_call(
        functools.partial(_mm_bias_act_kernel, act=act),
        out_shape=jax.ShapeDtypeStruct((M, Np), out_dtype),
        grid=(M // tm,),
        in_specs=[
            pl.BlockSpec((tm, K), lambda i: (i, 0)),
            pl.BlockSpec((K, Np), lambda i: (0, 0)),
            pl.BlockSpec((1, Np), lambda i: (0, 0)),
        ],
        out_specs=pl.BlockSpec((tm, Np), lambda i: (i, 0)),
        compiler_params=pltpu.CompilerParams(
            dimension_semantics=("parallel",),
            vmem_limit_bytes=_VMEM_BYTES),
    )(x_bf16, w_bf16, b_f32.reshape(1, Np).astype(jnp.float32))


# ----------------------------------------------------------------------------
# Pallas kernel 2: fused  conv3x3(+BN folded)+SiLU -> [value | offset_mask]
# One grid step per batch image.  Input is the H-padded, row-flattened halo slab
# (R = (H+2)*W + 2 rows): tap (di, dj) is the flat window starting at row
# di*W + dj; the left/right kernel columns are masked at w==0 / w==W-1 (those
# flat positions wrap to the neighbouring image row).  The 9 tap matmuls are
# accumulated in-register, then the SiLU epilogue and ONE matmul with [Wv | Wom]
# emit the concatenated lane-dense [value | offset_mask] slab.
# ----------------------------------------------------------------------------
def _conv3_vom_kernel(qf_ref, wc_ref, bc_ref, wv_ref, bv_ref, o_ref, *, H, W):
    L = H * W
    col = jax.lax.broadcasted_iota(jnp.int32, (L, 1), 0) % W   # w coord per row
    acc = None
    for dj in range(3):                      # kernel column
        part = None
        for di in range(3):                  # kernel row
            t = di * 3 + dj
            s = di * W + dj
            x = qf_ref[0, s:s + L, :]                         # shifted flat window
            p = jnp.dot(x, wc_ref[t], preferred_element_type=jnp.float32)
            part = p if part is None else part + p
        if dj == 0:                          # left neighbour invalid at w == 0
            part = jnp.where(col >= 1, part, 0.0)
        elif dj == 2:                        # right neighbour invalid at w == W-1
            part = jnp.where(col <= W - 2, part, 0.0)
        acc = part if acc is None else acc + part
    pre = acc + bc_ref[...]
    pre = pre * jax.nn.sigmoid(pre)          # conv3x3 -> BN(folded) -> SiLU
    y = jnp.dot(pre.astype(jnp.bfloat16), wv_ref[...],
                preferred_element_type=jnp.float32) + bv_ref[...]
    o_ref[0] = y.astype(o_ref.dtype)


def conv3_value_om(qf_bf16, wc, bc, wvom, bvom, H, W):
    """qf: (N, (H+2)*W + 2, C) bf16 halo slab; wc: (9, C, C) bf16;
    wvom: (C, P) bf16 with P % 128 == 0  ->  (N, H*W, P) f32."""
    N, R, C = qf_bf16.shape
    P = wvom.shape[1]
    L = H * W
    assert P % _LANE == 0 and R == (H + 2) * W + 2
    return pl.pallas_call(
        functools.partial(_conv3_vom_kernel, H=H, W=W),
        out_shape=jax.ShapeDtypeStruct((N, L, P), jnp.float32),
        grid=(N,),
        in_specs=[
            pl.BlockSpec((1, R, C), lambda n: (n, 0, 0)),
            pl.BlockSpec((9, C, C), lambda n: (0, 0, 0)),
            pl.BlockSpec((1, C), lambda n: (0, 0)),
            pl.BlockSpec((C, P), lambda n: (0, 0)),
            pl.BlockSpec((1, P), lambda n: (0, 0)),
        ],
        out_specs=pl.BlockSpec((1, L, P), lambda n: (n, 0, 0)),
        compiler_params=pltpu.CompilerParams(
            dimension_semantics=("parallel",),
            vmem_limit_bytes=_VMEM_BYTES),
    )(qf_bf16, wc, bc.reshape(1, C).astype(jnp.float32),
      wvom, bvom.reshape(1, P).astype(jnp.float32))


# ----------------------------------------------------------------------------
# Pallas kernel 3: DCNv4 output projection fused with the bottleneck residual,
# writing the state slab IN PLACE:  slab <- slab + core @ Wout_pad + bout_pad
# (Wout/bout columns beyond c_ are zero, so branch_b is passed through).
# ----------------------------------------------------------------------------
def _proj_residual_kernel(x_ref, s_ref, w_ref, b_ref, o_ref):
    y = jnp.dot(x_ref[...], w_ref[...], preferred_element_type=jnp.float32)
    y = y + b_ref[...] + s_ref[...].astype(jnp.float32)
    o_ref[...] = y.astype(o_ref.dtype)


def proj_residual_inplace(core_bf16, slab_bf16, w_bf16, b_f32, *, tm):
    M, C = core_bf16.shape
    P = w_bf16.shape[1]
    assert M % tm == 0 and P % _LANE == 0 and slab_bf16.shape == (M, P)
    return pl.pallas_call(
        _proj_residual_kernel,
        out_shape=jax.ShapeDtypeStruct((M, P), slab_bf16.dtype),
        grid=(M // tm,),
        in_specs=[
            pl.BlockSpec((tm, C), lambda i: (i, 0)),
            pl.BlockSpec((tm, P), lambda i: (i, 0)),
            pl.BlockSpec((C, P), lambda i: (0, 0)),
            pl.BlockSpec((1, P), lambda i: (0, 0)),
        ],
        out_specs=pl.BlockSpec((tm, P), lambda i: (i, 0)),
        input_output_aliases={1: 0},                 # update the slab in place
        compiler_params=pltpu.CompilerParams(
            dimension_semantics=("parallel",),
            vmem_limit_bytes=_VMEM_BYTES),
    )(core_bf16, slab_bf16, w_bf16, b_f32.reshape(1, P).astype(jnp.float32))


# ----------------------------------------------------------------------------
# DCNv4 deformable bilinear aggregation (data-dependent gather; plain JAX).
# TODO(synk): replace take_along_axis with a Pallas one-hot-matmul / DMA gather.
# ----------------------------------------------------------------------------
def dcnv4_core(value, offset, mask, H, W, group, gc, ks=3, pad=1, dilation=1,
               stride=1, offset_scale=1.0):
    """value: (N, L, G, gc); offset: (N, L, G, K, 2) as (dx, dy); mask: (N, L, G, K)."""
    N, L = value.shape[:2]

    hh = jnp.arange(H, dtype=jnp.float32)
    ww = jnp.arange(W, dtype=jnp.float32)
    base_y = jnp.broadcast_to((hh[:, None] * stride - pad), (H, W))
    base_x = jnp.broadcast_to((ww[None, :] * stride - pad), (H, W))
    ki, kj = jnp.meshgrid(jnp.arange(ks), jnp.arange(ks), indexing="ij")
    ki = ki.reshape(-1).astype(jnp.float32) * dilation
    kj = kj.reshape(-1).astype(jnp.float32) * dilation

    K = ks * ks
    py = base_y.reshape(L, 1) + ki[None, :]
    px = base_x.reshape(L, 1) + kj[None, :]
    py = py[None, :, None, :] + offset[..., 1] * offset_scale   # (N, L, G, K)
    px = px[None, :, None, :] + offset[..., 0] * offset_scale

    y0 = jnp.floor(py)
    x0 = jnp.floor(px)
    ly = py - y0
    lx = px - x0

    v_t = value.transpose(0, 2, 1, 3)  # (N, G, L, gc)

    def gather(yi, xi):
        valid = ((yi >= 0) & (yi < H) & (xi >= 0) & (xi < W)).astype(value.dtype)
        yc = jnp.clip(yi, 0, H - 1).astype(jnp.int32)
        xc = jnp.clip(xi, 0, W - 1).astype(jnp.int32)
        idx = (yc * W + xc).transpose(0, 2, 1, 3).reshape(N, group, L * K)
        g = jnp.take_along_axis(v_t, idx[..., None], axis=2)     # (N, G, L*K, gc)
        g = g.reshape(N, group, L, K, gc)
        return g * valid.transpose(0, 2, 1, 3)[..., None]

    v00 = gather(y0, x0)
    v01 = gather(y0, x0 + 1)
    v10 = gather(y0 + 1, x0)
    v11 = gather(y0 + 1, x0 + 1)

    def wt(w):
        return w.transpose(0, 2, 1, 3)[..., None]  # (N, G, L, K, 1)

    sampled = (v00 * wt((1 - ly) * (1 - lx)) + v01 * wt((1 - ly) * lx)
               + v10 * wt(ly * (1 - lx)) + v11 * wt(ly * lx))
    out = (sampled * mask.transpose(0, 2, 1, 3)[..., None]).sum(axis=3)  # (N,G,L,gc)
    return out.transpose(0, 2, 1, 3).reshape(N, L, group * gc)


# ----------------------------------------------------------------------------
# One-time parameter preparation (BN folding, fusion, bf16 cast, lane padding)
# ----------------------------------------------------------------------------
def prepare_params(params, group=4, ks=3):
    c_ = int(params["cv1_w"].shape[0])
    c2 = int(params["cv3_w"].shape[0])

    def fold_conv(w, bn):
        # (Cout, Cin, kh, kw) -> (kh*kw, Cin, Cout) with BN scale folded; bias (Cout,)
        scale = bn["gamma"] / jnp.sqrt(bn["var"] + _BN_EPS)
        bias = bn["beta"] - bn["mean"] * scale
        cout, cin, kh, kw = w.shape
        wm = w.transpose(2, 3, 1, 0).reshape(kh * kw, cin, cout) * scale[None, None, :]
        return wm.astype(jnp.float32), bias.astype(jnp.float32)

    def pad_cols(w, b, n_to=None):
        n = w.shape[-1]
        n_to = _round_up(n, _LANE) if n_to is None else n_to
        if n_to != n:
            w = jnp.pad(w, ((0, 0), (0, n_to - n)))
            b = jnp.pad(b, ((0, n_to - n),))
        return w, b

    # cv1 + cv2 fused (both 1x1 on the same input): concatenate output columns.
    w1, b1 = fold_conv(params["cv1_w"], params["cv1_bn"])
    w2, b2 = fold_conv(params["cv2_w"], params["cv2_bn"])
    w12, b12 = pad_cols(jnp.concatenate([w1[0], w2[0]], axis=1),
                        jnp.concatenate([b1, b2]))
    P12 = w12.shape[1]

    # cv3 reads the whole lane-dense state slab: pad its input rows to P12 (zeros).
    w3, b3 = fold_conv(params["cv3_w"], params["cv3_bn"])
    w3 = jnp.pad(w3[0], ((0, P12 - w3[0].shape[0]), (0, 0)))
    w3, b3 = pad_cols(w3, b3)

    blocks = []
    for bp in params["m"]:
        wc, bc = fold_conv(bp["cv1_w"], bp["cv1_bn"])            # (9, c_, c_)
        d = bp["dcn"]
        # DCNv4 (no dw conv): value = x@Wv + bv ; offset_mask = x@Wom + bom (same x)
        wvom, bvom = pad_cols(jnp.concatenate([d["value_w"], d["om_w"]], axis=1),
                              jnp.concatenate([d["value_b"], d["om_b"]]))
        # output-projection columns padded to the full slab width so the in-place
        # residual update leaves branch_b untouched.
        wout, bout = pad_cols(d["out_w"], d["out_b"], n_to=P12)
        blocks.append(dict(
            wc=wc.astype(jnp.bfloat16), bc=bc,
            wvom=wvom.astype(jnp.bfloat16), bvom=bvom,
            wout=wout.astype(jnp.bfloat16), bout=bout,
        ))

    prep = dict(w12=w12.astype(jnp.bfloat16), b12=b12,
                w3=w3.astype(jnp.bfloat16), b3=b3, m=blocks)
    cfg = dict(c_=c_, c2=c2, group=group, ks=ks)
    return cfg, prep


# ----------------------------------------------------------------------------
# C3DCN forward (cfg is static python config; prep is the array pytree)
# ----------------------------------------------------------------------------
def c3dcn_forward(cfg, prep, x_nchw):
    c_, c2, group, ks = cfg["c_"], cfg["c2"], cfg["group"], cfg["ks"]
    K = ks * ks
    gc = c_ // group
    N, C1, H, W = x_nchw.shape
    L = H * W
    M = N * L
    tm = _pick_tm(M)
    M_pad = _round_up(M, tm)

    # single NCHW -> NHWC conversion + one-time row padding at the module boundary
    x = x_nchw.transpose(0, 2, 3, 1).reshape(M, C1).astype(jnp.bfloat16)
    if M_pad != M:
        x = jnp.pad(x, ((0, M_pad - M), (0, 0)))

    # fused cv1|cv2: bf16 lane-dense state slab.
    #   cols [0:c_]   -> m (running bottleneck state)
    #   cols [c_:2c_] -> branch_b (cv2 path), remaining cols are zero.
    slab = matmul_bias_act(x, prep["w12"], prep["b12"], act="silu",
                           out_dtype=jnp.bfloat16, tm=tm)

    for bp in prep["m"]:                 # Bottleneck(s): conv3x3 -> DCNv4, shortcut
        # halo slab: pad H by 1 row each side, flatten rows, one guard row per end.
        m_img = slab[:M, :c_].reshape(N, H, W, c_)
        q = jnp.pad(m_img, ((0, 0), (1, 1), (0, 0), (0, 0)))
        qf = jnp.pad(q.reshape(N, (H + 2) * W, c_), ((0, 0), (1, 1), (0, 0)))

        vom = conv3_value_om(qf, bp["wc"], bp["bc"], bp["wvom"], bp["bvom"], H, W)
        value = vom[..., :c_].reshape(N, L, group, gc)
        om = vom[..., c_:c_ + group * K * 3].reshape(N, L, group, K * 3)
        offset = om[..., :K * 2].reshape(N, L, group, K, 2)      # (dx, dy) pairs
        mask = om[..., K * 2:]                                   # DCNv4: no softmax

        # TODO(synk): data-dependent bilinear gather stays in plain JAX for now.
        core = dcnv4_core(value, offset, mask, H, W, group, gc, ks=ks)

        core = core.reshape(M, c_).astype(jnp.bfloat16)
        if M_pad != M:
            core = jnp.pad(core, ((0, M_pad - M), (0, 0)))
        slab = proj_residual_inplace(core, slab, bp["wout"], bp["bout"], tm=tm)

    # cv3 reads the lane-dense slab directly (weight rows beyond 2c_ are zero).
    y = matmul_bias_act(slab, prep["w3"], prep["b3"], act="silu",
                        out_dtype=jnp.float32, tm=tm)
    y = y[:M, :c2].reshape(N, H, W, c2)
    return y.transpose(0, 3, 1, 2)       # single NHWC -> NCHW at the boundary


# ----------------------------------------------------------------------------
# Deterministic synthetic parameters (mirror the module __init__ shapes)
# ----------------------------------------------------------------------------
def init_params(key, c1, c2, n=1, e=0.5, group=4, ks=3):
    c_ = int(c2 * e)
    keys = iter(jax.random.split(key, 128))

    def nxt():
        return next(keys)

    def conv_w(cout, cin, k):
        fan = cin * k * k
        return jax.random.normal(nxt(), (cout, cin, k, k), jnp.float32) / math.sqrt(fan)

    def bn(c):
        return dict(
            gamma=1.0 + 0.1 * jax.random.normal(nxt(), (c,), jnp.float32),
            beta=0.1 * jax.random.normal(nxt(), (c,), jnp.float32),
            mean=0.1 * jax.random.normal(nxt(), (c,), jnp.float32),
            var=jax.random.uniform(nxt(), (c,), jnp.float32, minval=0.5, maxval=1.5),
        )

    def linear(cin, cout, wscale=None):
        s = wscale if wscale is not None else 1.0 / math.sqrt(cin)
        return (jax.random.normal(nxt(), (cin, cout), jnp.float32) * s,
                0.1 * jax.random.normal(nxt(), (cout,), jnp.float32))

    K = ks * ks
    om_out = int(math.ceil((group * K * 3) / 8) * 8)

    bottlenecks = []
    for _ in range(n):
        vw, vb = linear(c_, c_)
        ow, ob = linear(c_, om_out, wscale=0.05)    # small offsets -> stable sampling
        pw, pb = linear(c_, c_)
        bottlenecks.append(dict(
            cv1_w=conv_w(c_, c_, 3), cv1_bn=bn(c_),
            dcn=dict(value_w=vw, value_b=vb, om_w=ow, om_b=0.05 * ob,
                     out_w=pw, out_b=pb),
        ))

    return dict(
        cv1_w=conv_w(c_, c1, 1), cv1_bn=bn(c_),
        cv2_w=conv_w(c_, c1, 1), cv2_bn=bn(c_),
        cv3_w=conv_w(c2, 2 * c_, 1), cv3_bn=bn(c2),
        m=bottlenecks,
    )


# ----------------------------------------------------------------------------
if __name__ == "__main__":
    key = jax.random.PRNGKey(0)
    k_param, k_x = jax.random.split(key)

    C1 = C2 = 32           # hidden c_ = 16, DCNv4 channels 16, group 4, gc 4
    N, H, W = 2, 16, 16
    x = jax.random.normal(k_x, (N, C1, H, W), jnp.float32)

    raw_params = init_params(k_param, c1=C1, c2=C2, n=1, e=0.5, group=4)
    cfg, prep = prepare_params(raw_params, group=4, ks=3)

    fwd = jax.jit(functools.partial(c3dcn_forward, cfg))
    y = jax.block_until_ready(fwd(prep, x))

    assert y.shape == (N, C2, H, W), y.shape
    assert bool(jnp.all(jnp.isfinite(y)))
    print("KERNEL_OK")
</pallas_src>

<mosaic_0001>
module attributes {stable_mosaic.version = 11 : i64} {
  func.func @_mm_bias_act_kernel(%arg0: i32, %arg1: memref<256x32xbf16, #tpu.memory_space<vmem>>, %arg2: memref<32x128xbf16, #tpu.memory_space<vmem>>, %arg3: memref<1x128xf32, #tpu.memory_space<vmem>>, %arg4: memref<256x128xbf16, #tpu.memory_space<vmem>>) attributes {dimension_semantics = [#tpu.dimension_semantics<parallel>], iteration_bounds = array<i64: 2>, scalar_prefetch = 0 : i64, scratch_operands = 0 : i64, tpu.core_type = #tpu.core_type<tc>, window_params = [{transform_indices = @transform_0, window_bounds = array<i64: 256, 32>}, {pipeline_mode = #tpu.pipeline_mode<synchronous>, transform_indices = @transform_1, window_bounds = array<i64: 32, 128>}, {pipeline_mode = #tpu.pipeline_mode<synchronous>, transform_indices = @transform_2, window_bounds = array<i64: 1, 128>}, {transform_indices = @transform_3, window_bounds = array<i64: 256, 128>}]} {
    %c0 = arith.constant 0 : index
    %c0_0 = arith.constant 0 : index
    %0 = vector.load %arg1[%c0, %c0_0] : memref<256x32xbf16, #tpu.memory_space<vmem>>, vector<256x32xbf16>
    %c0_1 = arith.constant 0 : index
    %c0_2 = arith.constant 0 : index
    %1 = vector.load %arg2[%c0_1, %c0_2] : memref<32x128xbf16, #tpu.memory_space<vmem>>, vector<32x128xbf16>
    %cst = arith.constant dense<0.000000e+00> : vector<256x128xf32>
    %2 = tpu.matmul %0, %1, %cst {dimension_numbers = #tpu.dot_dimension_numbers<[1], [0], [0], [1], [0, 0, 1, 1], [], []>} : vector<256x32xbf16>, vector<32x128xbf16>, vector<256x128xf32> -> vector<256x128xf32>
    %c0_3 = arith.constant 0 : index
    %c0_4 = arith.constant 0 : index
    %3 = vector.load %arg3[%c0_3, %c0_4] : memref<1x128xf32, #tpu.memory_space<vmem>>, vector<1x128xf32>
    %4 = vector.broadcast %3 : vector<1x128xf32> to vector<256x128xf32>
    %5 = arith.addf %2, %4 : vector<256x128xf32>
    %6 = arith.negf %5 : vector<256x128xf32>
    %7 = math.exp %6 : vector<256x128xf32>
    %cst_5 = arith.constant 1.000000e+00 : f32
    %8 = vector.broadcast %cst_5 : f32 to vector<256x128xf32>
    %9 = arith.addf %8, %7 : vector<256x128xf32>
    %10 = arith.divf %8, %9 : vector<256x128xf32>
    %11 = arith.mulf %5, %10 : vector<256x128xf32>
    %12 = arith.truncf %11 : vector<256x128xf32> to vector<256x128xbf16>
    %c0_6 = arith.constant 0 : index
    %c0_7 = arith.constant 0 : index
    %13 = vector.load %arg4[%c0_6, %c0_7] : memref<256x128xbf16, #tpu.memory_space<vmem>>, vector<256x128xbf16>
    tpu.vector_store %arg4[%c0_6, %c0_7], %12 {strides = array<i32>} : memref<256x128xbf16, #tpu.memory_space<vmem>>, vector<256x128xbf16>,
    return
  }
  func.func @transform_0(%arg0: i32) -> (i32, i32) {
    %c0_i32 = arith.constant 0 : i32
    %c0_i32_0 = arith.constant 0 : i32
    return %arg0, %c0_i32 : i32, i32
  }
  func.func @transform_1(%arg0: i32) -> (i32, i32) {
    %c0_i32 = arith.constant 0 : i32
    %c0_i32_0 = arith.constant 0 : i32
    %c0_i32_1 = arith.constant 0 : i32
    return %c0_i32, %c0_i32_0 : i32, i32
  }
  func.func @transform_2(%arg0: i32) -> (i32, i32) {
    %c0_i32 = arith.constant 0 : i32
    %c0_i32_0 = arith.constant 0 : i32
    %c0_i32_1 = arith.constant 0 : i32
    return %c0_i32, %c0_i32_0 : i32, i32
  }
  func.func @transform_3(%arg0: i32) -> (i32, i32) {
    %c0_i32 = arith.constant 0 : i32
    %c0_i32_0 = arith.constant 0 : i32
    return %arg0, %c0_i32 : i32, i32
  }
}

module attributes {stable_mosaic.version = 11 : i64} {
  func.func @_conv3_vom_kernel(%arg0: i32, %arg1: memref<1x290x16xbf16, #tpu.memory_space<vmem>>, %arg2: memref<9x16x16xbf16, #tpu.memory_space<vmem>>, %arg3: memref<1x16xf32, #tpu.memory_space<vmem>>, %arg4: memref<16x128xbf16, #tpu.memory_space<vmem>>, %arg5: memref<1x128xf32, #tpu.memory_space<vmem>>, %arg6: memref<1x256x128xf32, #tpu.memory_space<vmem>>) attributes {dimension_semantics = [#tpu.dimension_semantics<parallel>], iteration_bounds = array<i64: 2>, scalar_prefetch = 0 : i64, scratch_operands = 0 : i64, tpu.core_type = #tpu.core_type<tc>, window_params = [{transform_indices = @transform_0, window_bounds = array<i64: 1, 290, 16>}, {pipeline_mode = #tpu.pipeline_mode<synchronous>, transform_indices = @transform_1, window_bounds = array<i64: 9, 16, 16>}, {pipeline_mode = #tpu.pipeline_mode<synchronous>, transform_indices = @transform_2, window_bounds = array<i64: 1, 16>}, {pipeline_mode = #tpu.pipeline_mode<synchronous>, transform_indices = @transform_3, window_bounds = array<i64: 16, 128>}, {pipeline_mode = #tpu.pipeline_mode<synchronous>, transform_indices = @transform_4, window_bounds = array<i64: 1, 128>}, {transform_indices = @transform_5, window_bounds = array<i64: 1, 256, 128>}]} {
    %0 = tpu.iota {dimensions = array<i32: 0>} : vector<256x1xi32>
    %c16_i32 = arith.constant 16 : i32
    %c0_i32 = arith.constant 0 : i32
    %1 = arith.cmpi eq, %c16_i32, %c0_i32 : i32
    %c1_i32 = arith.constant 1 : i32
    %2 = arith.select %1, %c1_i32, %c16_i32 : i32
    %3 = vector.broadcast %2 : i32 to vector<256x1xi32>
    %4 = arith.remsi %0, %3 : vector<256x1xi32>
    %c0_i32_0 = arith.constant 0 : i32
    %5 = vector.broadcast %c0_i32_0 : i32 to vector<256x1xi32>
    %6 = arith.cmpi ne, %4, %5 : vector<256x1xi32>
    %c0_i32_1 = arith.constant 0 : i32
    %7 = vector.broadcast %c0_i32_1 : i32 to vector<256x1xi32>
    %8 = arith.cmpi slt, %4, %7 : vector<256x1xi32>
    %c0_i32_2 = arith.constant 0 : i32
    %9 = arith.cmpi slt, %2, %c0_i32_2 : i32
    %10 = vector.broadcast %9 : i1 to vector<256x1xi1>
    %11 = vector.broadcast %10 : vector<256x1xi1> to vector<256x1xi1>
    %12 = arith.xori %8, %11 : vector<256x1xi1>
    %13 = arith.andi %12, %6 : vector<256x1xi1>
    %14 = vector.broadcast %2 : i32 to vector<256x1xi32>
    %15 = arith.addi %4, %14 : vector<256x1xi32>
    %16 = arith.select %13, %15, %4 : vector<256x1xi1>, vector<256x1xi32>
    %c0 = arith.constant 0 : index
    %c0_3 = arith.constant 0 : index
    %c0_4 = arith.constant 0 : index
    %17 = vector.load %arg1[%c0, %c0_3, %c0_4] : memref<1x290x16xbf16, #tpu.memory_space<vmem>>, vector<1x256x16xbf16>
    %18 = vector.shape_cast %17 : vector<1x256x16xbf16> to vector<256x16xbf16>
    %c0_5 = arith.constant 0 : index
    %c0_6 = arith.constant 0 : index
    %c0_7 = arith.constant 0 : index
    %19 = vector.load %arg2[%c0_5, %c0_6, %c0_7] : memref<9x16x16xbf16, #tpu.memory_space<vmem>>, vector<1x16x16xbf16>
    %20 = vector.shape_cast %19 : vector<1x16x16xbf16> to vector<16x16xbf16>
    %cst = arith.constant dense<0.000000e+00> : vector<256x16xf32>
    %21 = tpu.matmul %18, %20, %cst {dimension_numbers = #tpu.dot_dimension_numbers<[1], [0], [0], [1], [0, 0, 1, 1], [], []>} : vector<256x16xbf16>, vector<16x16xbf16>, vector<256x16xf32> -> vector<256x16xf32>
    %c0_8 = arith.constant 0 : index
    %c16 = arith.constant 16 : index
    %c0_9 = arith.constant 0 : index
    %22 = vector.load %arg1[%c0_8, %c16, %c0_9] : memref<1x290x16xbf16, #tpu.memory_space<vmem>>, vector<1x256x16xbf16>
    %23 = vector.shape_cast %22 : vector<1x256x16xbf16> to vector<256x16xbf16>
    %c3 = arith.constant 3 : index
    %c0_10 = arith.constant 0 : index
    %c0_11 = arith.constant 0 : index
    %24 = vector.load %arg2[%c3, %c0_10, %c0_11] : memref<9x16x16xbf16, #tpu.memory_space<vmem>>, vector<1x16x16xbf16>
    %25 = vector.shape_cast %24 : vector<1x16x16xbf16> to vector<16x16xbf16>
    %cst_12 = arith.constant dense<0.000000e+00> : vector<256x16xf32>
    %26 = tpu.matmul %23, %25, %cst_12 {dimension_numbers = #tpu.dot_dimension_numbers<[1], [0], [0], [1], [0, 0, 1, 1], [], []>} : vector<256x16xbf16>, vector<16x16xbf16>, vector<256x16xf32> -> vector<256x16xf32>
    %27 = arith.addf %21, %26 : vector<256x16xf32>
    %c0_13 = arith.constant 0 : index
    %c32 = arith.constant 32 : index
    %c0_14 = arith.constant 0 : index
    %28 = vector.load %arg1[%c0_13, %c32, %c0_14] : memref<1x290x16xbf16, #tpu.memory_space<vmem>>, vector<1x256x16xbf16>
    %29 = vector.shape_cast %28 : vector<1x256x16xbf16> to vector<256x16xbf16>
    %c6 = arith.constant 6 : index
    %c0_15 = arith.constant 0 : index
    %c0_16 = arith.constant 0 : index
    %30 = vector.load %arg2[%c6, %c0_15, %c0_16] : memref<9x16x16xbf16, #tpu.memory_space<vmem>>, vector<1x16x16xbf16>
    %31 = vector.shape_cast %30 : vector<1x16x16xbf16> to vector<16x16xbf16>
    %cst_17 = arith.constant dense<0.000000e+00> : vector<256x16xf32>
    %32 = tpu.matmul %29, %31, %cst_17 {dimension_numbers = #tpu.dot_dimension_numbers<[1], [0], [0], [1], [0, 0, 1, 1], [], []>} : vector<256x16xbf16>, vector<16x16xbf16>, vector<256x16xf32> -> vector<256x16xf32>
    %33 = arith.addf %27, %32 : vector<256x16xf32>
    %c1_i32_18 = arith.constant 1 : i32
    %34 = vector.broadcast %c1_i32_18 : i32 to vector<256x1xi32>
    %35 = arith.cmpi sge, %16, %34 : vector<256x1xi32>
    %cst_19 = arith.constant 0.000000e+00 : f32
    %36 = vector.shape_cast %35 : vector<256x1xi1> to vector<256x1xi1>
    %37 = vector.broadcast %36 : vector<256x1xi1> to vector<256x16xi1>
    %38 = vector.broadcast %cst_19 : f32 to vector<256x16xf32>
    %39 = arith.select %37, %33, %38 : vector<256x16xi1>, vector<256x16xf32>
    %c0_20 = arith.constant 0 : index
    %c1 = arith.constant 1 : index
    %c0_21 = arith.constant 0 : index
    %40 = vector.load %arg1[%c0_20, %c1, %c0_21] : memref<1x290x16xbf16, #tpu.memory_space<vmem>>, vector<1x256x16xbf16>
    %41 = vector.shape_cast %40 : vector<1x256x16xbf16> to vector<256x16xbf16>
    %c1_22 = arith.constant 1 : index
    %c0_23 = arith.constant 0 : index
    %c0_24 = arith.constant 0 : index
    %42 = vector.load %arg2[%c1_22, %c0_23, %c0_24] : memref<9x16x16xbf16, #tpu.memory_space<vmem>>, vector<1x16x16xbf16>
    %43 = vector.shape_cast %42 : vector<1x16x16xbf16> to vector<16x16xbf16>
    %cst_25 = arith.constant dense<0.000000e+00> : vector<256x16xf32>
    %44 = tpu.matmul %41, %43, %cst_25 {dimension_numbers = #tpu.dot_dimension_numbers<[1], [0], [0], [1], [0, 0, 1, 1], [], []>} : vector<256x16xbf16>, vector<16x16xbf16>, vector<256x16xf32> -> vector<256x16xf32>
    %c0_26 = arith.constant 0 : index
    %c17 = arith.constant 17 : index
    %c0_27 = arith.constant 0 : index
    %45 = vector.load %arg1[%c0_26, %c17, %c0_27] : memref<1x290x16xbf16, #tpu.memory_space<vmem>>, vector<1x256x16xbf16>
    %46 = vector.shape_cast %45 : vector<1x256x16xbf16> to vector<256x16xbf16>
    %c4 = arith.constant 4 : index
    %c0_28 = arith.constant 0 : index
    %c0_29 = arith.constant 0 : index
    %47 = vector.load %arg2[%c4, %c0_28, %c0_29] : memref<9x16x16xbf16, #tpu.memory_space<vmem>>, vector<1x16x16xbf16>
    %48 = vector.shape_cast %47 : vector<1x16x16xbf16> to vector<16x16xbf16>
    %cst_30 = arith.constant dense<0.000000e+00> : vector<256x16xf32>
    %49 = tpu.matmul %46, %48, %cst_30 {dimension_numbers = #tpu.dot_dimension_numbers<[1], [0], [0], [1], [0, 0, 1, 1], [], []>} : vector<256x16xbf16>, vector<16x16xbf16>, vector<256x16xf32> -> vector<256x16xf32>
    %50 = arith.addf %44, %49 : vector<256x16xf32>
    %c0_31 = arith.constant 0 : index
    %c33 = arith.constant 33 : index
    %c0_32 = arith.constant 0 : index
    %51 = vector.load %arg1[%c0_31, %c33, %c0_32] : memref<1x290x16xbf16, #tpu.memory_space<vmem>>, vector<1x256x16xbf16>
    %52 = vector.shape_cast %51 : vector<1x256x16xbf16> to vector<256x16xbf16>
    %c7 = arith.constant 7 : index
    %c0_33 = arith.constant 0 : index
    %c0_34 = arith.constant 0 : index
    %53 = vector.load %arg2[%c7, %c0_33, %c0_34] : memref<9x16x16xbf16, #tpu.memory_space<vmem>>, vector<1x16x16xbf16>
    %54 = vector.shape_cast %53 : vector<1x16x16xbf16> to vector<16x16xbf16>
    %cst_35 = arith.constant dense<0.000000e+00> : vector<256x16xf32>
    %55 = tpu.matmul %52, %54, %cst_35 {dimension_numbers = #tpu.dot_dimension_numbers<[1], [0], [0], [1], [0, 0, 1, 1], [], []>} : vector<256x16xbf16>, vector<16x16xbf16>, vector<256x16xf32> -> vector<256x16xf32>
    %56 = arith.addf %50, %55 : vector<256x16xf32>
    %57 = arith.addf %39, %56 : vector<256x16xf32>
    %c0_36 = arith.constant 0 : index
    %c2 = arith.constant 2 : index
    %c0_37 = arith.constant 0 : index
    %58 = vector.load %arg1[%c0_36, %c2, %c0_37] : memref<1x290x16xbf16, #tpu.memory_space<vmem>>, vector<1x256x16xbf16>
    %59 = vector.shape_cast %58 : vector<1x256x16xbf16> to vector<256x16xbf16>
    %c2_38 = arith.constant 2 : index
    %c0_39 = arith.constant 0 : index
    %c0_40 = arith.constant 0 : index
    %60 = vector.load %arg2[%c2_38, %c0_39, %c0_40] : memref<9x16x16xbf16, #tpu.memory_space<vmem>>, vector<1x16x16xbf16>
    %61 = vector.shape_cast %60 : vector<1x16x16xbf16> to vector<16x16xbf16>
    %cst_41 = arith.constant dense<0.000000e+00> : vector<256x16xf32>
    %62 = tpu.matmul %59, %61, %cst_41 {dimension_numbers = #tpu.dot_dimension_numbers<[1], [0], [0], [1], [0, 0, 1, 1], [], []>} : vector<256x16xbf16>, vector<16x16xbf16>, vector<256x16xf32> -> vector<256x16xf32>
    %c0_42 = arith.constant 0 : index
    %c18 = arith.constant 18 : index
    %c0_43 = arith.constant 0 : index
    %63 = vector.load %arg1[%c0_42, %c18, %c0_43] : memref<1x290x16xbf16, #tpu.memory_space<vmem>>, vector<1x256x16xbf16>
    %64 = vector.shape_cast %63 : vector<1x256x16xbf16> to vector<256x16xbf16>
    %c5 = arith.constant 5 : index
    %c0_44 = arith.constant 0 : index
    %c0_45 = arith.constant 0 : index
    %65 = vector.load %arg2[%c5, %c0_44, %c0_45] : memref<9x16x16xbf16, #tpu.memory_space<vmem>>, vector<1x16x16xbf16>
    %66 = vector.shape_cast %65 : vector<1x16x16xbf16> to vector<16x16xbf16>
    %cst_46 = arith.constant dense<0.000000e+00> : vector<256x16xf32>
    %67 = tpu.matmul %64, %66, %cst_46 {dimension_numbers = #tpu.dot_dimension_numbers<[1], [0], [0], [1], [0, 0, 1, 1], [], []>} : vector<256x16xbf16>, vector<16x16xbf16>, vector<256x16xf32> -> vector<256x16xf32>
    %68 = arith.addf %62, %67 : vector<256x16xf32>
    %c0_47 = arith.constant 0 : index
    %c34 = arith.constant 34 : index
    %c0_48 = arith.constant 0 : index
    %69 = vector.load %arg1[%c0_47, %c34, %c0_48] : memref<1x290x16xbf16, #tpu.memory_space<vmem>>, vector<1x256x16xbf16>
    %70 = vector.shape_cast %69 : vector<1x256x16xbf16> to vector<256x16xbf16>
    %c8 = arith.constant 8 : index
    %c0_49 = arith.constant 0 : index
    %c0_50 = arith.constant 0 : index
    %71 = vector.load %arg2[%c8, %c0_49, %c0_50] : memref<9x16x16xbf16, #tpu.memory_space<vmem>>, vector<1x16x16xbf16>
    %72 = vector.shape_cast %71 : vector<1x16x16xbf16> to vector<16x16xbf16>
    %cst_51 = arith.constant dense<0.000000e+00> : vector<256x16xf32>
    %73 = tpu.matmul %70, %72, %cst_51 {dimension_numbers = #tpu.dot_dimension_numbers<[1], [0], [0], [1], [0, 0, 1, 1], [], []>} : vector<256x16xbf16>, vector<16x16xbf16>, vector<256x16xf32> -> vector<256x16xf32>
    %74 = arith.addf %68, %73 : vector<256x16xf32>
    %c14_i32 = arith.constant 14 : i32
    %75 = vector.broadcast %c14_i32 : i32 to vector<256x1xi32>
    %76 = arith.cmpi sle, %16, %75 : vector<256x1xi32>
    %cst_52 = arith.constant 0.000000e+00 : f32
    %77 = vector.shape_cast %76 : vector<256x1xi1> to vector<256x1xi1>
    %78 = vector.broadcast %77 : vector<256x1xi1> to vector<256x16xi1>
    %79 = vector.broadcast %cst_52 : f32 to vector<256x16xf32>
    %80 = arith.select %78, %74, %79 : vector<256x16xi1>, vector<256x16xf32>
    %81 = arith.addf %57, %80 : vector<256x16xf32>
    %c0_53 = arith.constant 0 : index
    %c0_54 = arith.constant 0 : index
    %82 = vector.load %arg3[%c0_53, %c0_54] : memref<1x16xf32, #tpu.memory_space<vmem>>, vector<1x16xf32>
    %83 = vector.broadcast %82 : vector<1x16xf32> to vector<256x16xf32>
    %84 = arith.addf %81, %83 : vector<256x16xf32>
    %85 = arith.negf %84 : vector<256x16xf32>
    %86 = math.exp %85 : vector<256x16xf32>
    %cst_55 = arith.constant 1.000000e+00 : f32
    %87 = vector.broadcast %cst_55 : f32 to vector<256x16xf32>
    %88 = arith.addf %87, %86 : vector<256x16xf32>
    %89 = arith.divf %87, %88 : vector<256x16xf32>
    %90 = arith.mulf %84, %89 : vector<256x16xf32>
    %91 = arith.truncf %90 : vector<256x16xf32> to vector<256x16xbf16>
    %c0_56 = arith.constant 0 : index
    %c0_57 = arith.constant 0 : index
    %92 = vector.load %arg4[%c0_56, %c0_57] : memref<16x128xbf16, #tpu.memory_space<vmem>>, vector<16x128xbf16>
    %cst_58 = arith.constant dense<0.000000e+00> : vector<256x128xf32>
    %93 = tpu.matmul %91, %92, %cst_58 {dimension_numbers = #tpu.dot_dimension_numbers<[1], [0], [0], [1], [0, 0, 1, 1], [], []>} : vector<256x16xbf16>, vector<16x128xbf16>, vector<256x128xf32> -> vector<256x128xf32>
    %c0_59 = arith.constant 0 : index
    %c0_60 = arith.constant 0 : index
    %94 = vector.load %arg5[%c0_59, %c0_60] : memref<1x128xf32, #tpu.memory_space<vmem>>, vector<1x128xf32>
    %95 = vector.broadcast %94 : vector<1x128xf32> to vector<256x128xf32>
    %96 = arith.addf %93, %95 : vector<256x128xf32>
    %c0_61 = arith.constant 0 : index
    %c0_62 = arith.constant 0 : index
    %c0_63 = arith.constant 0 : index
    %97 = vector.load %arg6[%c0_61, %c0_62, %c0_63] : memref<1x256x128xf32, #tpu.memory_space<vmem>>, vector<1x256x128xf32>
    %98 = vector.shape_cast %97 : vector<1x256x128xf32> to vector<256x128xf32>
    %99 = vector.shape_cast %96 : vector<256x128xf32> to vector<1x256x128xf32>
    tpu.vector_store %arg6[%c0_61, %c0_62, %c0_63], %99 {strides = array<i32>} : memref<1x256x128xf32, #tpu.memory_space<vmem>>, vector<1x256x128xf32>,
    return
  }
  func.func @transform_0(%arg0: i32) -> (i32, i32, i32) {
    %c0_i32 = arith.constant 0 : i32
    %c0_i32_0 = arith.constant 0 : i32
    %c0_i32_1 = arith.constant 0 : i32
    return %arg0, %c0_i32, %c0_i32_0 : i32, i32, i32
  }
  func.func @transform_1(%arg0: i32) -> (i32, i32, i32) {
    %c0_i32 = arith.constant 0 : i32
    %c0_i32_0 = arith.constant 0 : i32
    %c0_i32_1 = arith.constant 0 : i32
    %c0_i32_2 = arith.constant 0 : i32
    return %c0_i32, %c0_i32_0, %c0_i32_1 : i32, i32, i32
  }
  func.func @transform_2(%arg0: i32) -> (i32, i32) {
    %c0_i32 = arith.constant 0 : i32
    %c0_i32_0 = arith.constant 0 : i32
    %c0_i32_1 = arith.constant 0 : i32
    return %c0_i32, %c0_i32_0 : i32, i32
  }
  func.func @transform_3(%arg0: i32) -> (i32, i32) {
    %c0_i32 = arith.constant 0 : i32
    %c0_i32_0 = arith.constant 0 : i32
    %c0_i32_1 = arith.constant 0 : i32
    return %c0_i32, %c0_i32_0 : i32, i32
  }
  func.func @transform_4(%arg0: i32) -> (i32, i32) {
    %c0_i32 = arith.constant 0 : i32
    %c0_i32_0 = arith.constant 0 : i32
    %c0_i32_1 = arith.constant 0 : i32
    return %c0_i32, %c0_i32_0 : i32, i32
  }
  func.func @transform_5(%arg0: i32) -> (i32, i32, i32) {
    %c0_i32 = arith.constant 0 : i32
    %c0_i32_0 = arith.constant 0 : i32
    %c0_i32_1 = arith.constant 0 : i32
    return %arg0, %c0_i32, %c0_i32_0 : i32, i32, i32
  }
}

module attributes {stable_mosaic.version = 11 : i64} {
  func.func @_proj_residual_kernel(%arg0: i32, %arg1: memref<256x16xbf16, #tpu.memory_space<vmem>>, %arg2: memref<256x128xbf16, #tpu.memory_space<vmem>>, %arg3: memref<16x128xbf16, #tpu.memory_space<vmem>>, %arg4: memref<1x128xf32, #tpu.memory_space<vmem>>, %arg5: memref<256x128xbf16, #tpu.memory_space<vmem>>) attributes {dimension_semantics = [#tpu.dimension_semantics<parallel>], iteration_bounds = array<i64: 2>, scalar_prefetch = 0 : i64, scratch_operands = 0 : i64, tpu.core_type = #tpu.core_type<tc>, window_params = [{transform_indices = @transform_0, window_bounds = array<i64: 256, 16>}, {transform_indices = @transform_1, window_bounds = array<i64: 256, 128>}, {pipeline_mode = #tpu.pipeline_mode<synchronous>, transform_indices = @transform_2, window_bounds = array<i64: 16, 128>}, {pipeline_mode = #tpu.pipeline_mode<synchronous>, transform_indices = @transform_3, window_bounds = array<i64: 1, 128>}, {transform_indices = @transform_4, window_bounds = array<i64: 256, 128>}]} {
    %c0 = arith.constant 0 : index
    %c0_0 = arith.constant 0 : index
    %0 = vector.load %arg1[%c0, %c0_0] : memref<256x16xbf16, #tpu.memory_space<vmem>>, vector<256x16xbf16>
    %c0_1 = arith.constant 0 : index
    %c0_2 = arith.constant 0 : index
    %1 = vector.load %arg3[%c0_1, %c0_2] : memref<16x128xbf16, #tpu.memory_space<vmem>>, vector<16x128xbf16>
    %cst = arith.constant dense<0.000000e+00> : vector<256x128xf32>
    %2 = tpu.matmul %0, %1, %cst {dimension_numbers = #tpu.dot_dimension_numbers<[1], [0], [0], [1], [0, 0, 1, 1], [], []>} : vector<256x16xbf16>, vector<16x128xbf16>, vector<256x128xf32> -> vector<256x128xf32>
    %c0_3 = arith.constant 0 : index
    %c0_4 = arith.constant 0 : index
    %3 = vector.load %arg4[%c0_3, %c0_4] : memref<1x128xf32, #tpu.memory_space<vmem>>, vector<1x128xf32>
    %4 = vector.broadcast %3 : vector<1x128xf32> to vector<256x128xf32>
    %5 = arith.addf %2, %4 : vector<256x128xf32>
    %c0_5 = arith.constant 0 : index
    %c0_6 = arith.constant 0 : index
    %6 = vector.load %arg2[%c0_5, %c0_6] : memref<256x128xbf16, #tpu.memory_space<vmem>>, vector<256x128xbf16>
    %7 = arith.extf %6 : vector<256x128xbf16> to vector<256x128xf32>
    %8 = arith.addf %5, %7 : vector<256x128xf32>
    %9 = arith.truncf %8 : vector<256x128xf32> to vector<256x128xbf16>
    %c0_7 = arith.constant 0 : index
    %c0_8 = arith.constant 0 : index
    %10 = vector.load %arg5[%c0_7, %c0_8] : memref<256x128xbf16, #tpu.memory_space<vmem>>, vector<256x128xbf16>
    tpu.vector_store %arg5[%c0_7, %c0_8], %9 {strides = array<i32>} : memref<256x128xbf16, #tpu.memory_space<vmem>>, vector<256x128xbf16>,
    return
  }
  func.func @transform_0(%arg0: i32) -> (i32, i32) {
    %c0_i32 = arith.constant 0 : i32
    %c0_i32_0 = arith.constant 0 : i32
    return %arg0, %c0_i32 : i32, i32
  }
  func.func @transform_1(%arg0: i32) -> (i32, i32) {
    %c0_i32 = arith.constant 0 : i32
    %c0_i32_0 = arith.constant 0 : i32
    return %arg0, %c0_i32 : i32, i32
  }
  func.func @transform_2(%arg0: i32) -> (i32, i32) {
    %c0_i32 = arith.constant 0 : i32
    %c0_i32_0 = arith.constant 0 : i32
    %c0_i32_1 = arith.constant 0 : i32
    return %c0_i32, %c0_i32_0 : i32, i32
  }
  func.func @transform_3(%arg0: i32) -> (i32, i32) {
    %c0_i32 = arith.constant 0 : i32
    %c0_i32_0 = arith.constant 0 : i32
    %c0_i32_1 = arith.constant 0 : i32
    return %c0_i32, %c0_i32_0 : i32, i32
  }
  func.func @transform_4(%arg0: i32) -> (i32, i32) {
    %c0_i32 = arith.constant 0 : i32
    %c0_i32_0 = arith.constant 0 : i32
    return %arg0, %c0_i32 : i32, i32
  }
}

module attributes {stable_mosaic.version = 11 : i64} {
  func.func @_mm_bias_act_kernel(%arg0: i32, %arg1: memref<256x128xbf16, #tpu.memory_space<vmem>>, %arg2: memref<128x128xbf16, #tpu.memory_space<vmem>>, %arg3: memref<1x128xf32, #tpu.memory_space<vmem>>, %arg4: memref<256x128xf32, #tpu.memory_space<vmem>>) attributes {dimension_semantics = [#tpu.dimension_semantics<parallel>], iteration_bounds = array<i64: 2>, scalar_prefetch = 0 : i64, scratch_operands = 0 : i64, tpu.core_type = #tpu.core_type<tc>, window_params = [{transform_indices = @transform_0, window_bounds = array<i64: 256, 128>}, {pipeline_mode = #tpu.pipeline_mode<synchronous>, transform_indices = @transform_1, window_bounds = array<i64: 128, 128>}, {pipeline_mode = #tpu.pipeline_mode<synchronous>, transform_indices = @transform_2, window_bounds = array<i64: 1, 128>}, {transform_indices = @transform_3, window_bounds = array<i64: 256, 128>}]} {
    %c0 = arith.constant 0 : index
    %c0_0 = arith.constant 0 : index
    %0 = vector.load %arg1[%c0, %c0_0] : memref<256x128xbf16, #tpu.memory_space<vmem>>, vector<256x128xbf16>
    %c0_1 = arith.constant 0 : index
    %c0_2 = arith.constant 0 : index
    %1 = vector.load %arg2[%c0_1, %c0_2] : memref<128x128xbf16, #tpu.memory_space<vmem>>, vector<128x128xbf16>
    %cst = arith.constant dense<0.000000e+00> : vector<256x128xf32>
    %2 = tpu.matmul %0, %1, %cst {dimension_numbers = #tpu.dot_dimension_numbers<[1], [0], [0], [1], [0, 0, 1, 1], [], []>} : vector<256x128xbf16>, vector<128x128xbf16>, vector<256x128xf32> -> vector<256x128xf32>
    %c0_3 = arith.constant 0 : index
    %c0_4 = arith.constant 0 : index
    %3 = vector.load %arg3[%c0_3, %c0_4] : memref<1x128xf32, #tpu.memory_space<vmem>>, vector<1x128xf32>
    %4 = vector.broadcast %3 : vector<1x128xf32> to vector<256x128xf32>
    %5 = arith.addf %2, %4 : vector<256x128xf32>
    %6 = arith.negf %5 : vector<256x128xf32>
    %7 = math.exp %6 : vector<256x128xf32>
    %cst_5 = arith.constant 1.000000e+00 : f32
    %8 = vector.broadcast %cst_5 : f32 to vector<256x128xf32>
    %9 = arith.addf %8, %7 : vector<256x128xf32>
    %10 = arith.divf %8, %9 : vector<256x128xf32>
    %11 = arith.mulf %5, %10 : vector<256x128xf32>
    %c0_6 = arith.constant 0 : index
    %c0_7 = arith.constant 0 : index
    %12 = vector.load %arg4[%c0_6, %c0_7] : memref<256x128xf32, #tpu.memory_space<vmem>>, vector<256x128xf32>
    tpu.vector_store %arg4[%c0_6, %c0_7], %11 {strides = array<i32>} : memref<256x128xf32, #tpu.memory_space<vmem>>, vector<256x128xf32>,
    return
  }
  func.func @transform_0(%arg0: i32) -> (i32, i32) {
    %c0_i32 = arith.constant 0 : i32
    %c0_i32_0 = arith.constant 0 : i32
    return %arg0, %c0_i32 : i32, i32
  }
  func.func @transform_1(%arg0: i32) -> (i32, i32) {
    %c0_i32 = arith.constant 0 : i32
    %c0_i32_0 = arith.constant 0 : i32
    %c0_i32_1 = arith.constant 0 : i32
    return %c0_i32, %c0_i32_0 : i32, i32
  }
  func.func @transform_2(%arg0: i32) -> (i32, i32) {
    %c0_i32 = arith.constant 0 : i32
    %c0_i32_0 = arith.constant 0 : i32
    %c0_i32_1 = arith.constant 0 : i32
    return %c0_i32, %c0_i32_0 : i32, i32
  }
  func.func @transform_3(%arg0: i32) -> (i32, i32) {
    %c0_i32 = arith.constant 0 : i32
    %c0_i32_0 = arith.constant 0 : i32
    return %arg0, %c0_i32 : i32, i32
  }
}

</mosaic_0001>

<bundles_post_ra>
// kernel: c3dcn_forward.4
= control target key start
LH: loop header
LB: loop body
LE: loop exit
PB: predicated region body
PF: predicated region fallthrough
CT: control target
= control target key end

     0   :  { %8 = vsyncpa [#allocation3], 0  ;;  %s1927_s0 = inlined_call_operand.vmem [shape: bf16[512,32], index: 0, kind: input, shape index: {}]   ;;  %s1928_s1 = inlined_call_operand.hbm [shape: bf16[32,128], index: 1, kind: input, shape index: {}]   ;;  %s1929_s2 = inlined_call_operand.hbm [shape: f32[1,128], index: 2, kind: input, shape index: {}]   ;;  %s1930_s3 = inlined_call_operand.vmem [shape: bf16[512,128], index: 3, kind: output, shape index: {}]  }
   0x1   :  { %9 = vsyncpa [#allocation5], 0  ;;  %s1582_s12 = smov 0  }
   0x2 LB: > { %s1010_s13 = sadd.s32 4294967295, %s1556_s12   ;;  %p1012_p0 = scmp.ge.s32.totalorder %s1556_s12, 1  ;;  %s1556_s12 = sphi %s1582_s12, %s15_s12  }
   0x3   : > { %p114_p1 = scmp.lt.s32.totalorder %s1556_s12, 3  ;;  %s1558_s14 = smov [#allocation2]  }
   0x4   : > { %s126_s15 = sshll.u32 %s1558_s14, 4  ;;  %p1596_p3 = scmp.eq.s32.totalorder %s1010_s13, 0  ;;  %s127_s15 = int_to_ptr.vmem [resolvable:$true] %s126_s15 }
   0x5   : > { %p1590_p2 = pnand %p1012_p0, %p114_p1  ;;  %s1559_s18 = smov [#allocation4]  }
   0x6   : > { %s1935_s17 = scalar_select %p1596_p3, 1, 0 }
   0x7   : > { %s1934_s16 = scalar_select %p1590_p2, 1, 0 }
   0x8   : > { %p1317_p4 = pneg %p1590_p2  ;;  %s140_s19 = sshll.u32 %s1559_s18, 4  ;;  %s1608_s19 = int_to_ptr.vmem [resolvable:$true] %s140_s19 }
   0x9   : > { %s1486_s23 = scalar_lea.hbm %s1928_s1, 256 }
   0xa   : > { %p1604_p5 = pnand %p1596_p3, %p1317_p4  ;;  %p1487_p6 = scmp.ne.s32.totalorder %s1928_s1, %s1486_s23 }
   0xb   : > { %p1493_p10 = scmp.lt.u32.totalorder %s1486_s23, %s1928_s1 }
   0xc   : > { %p1488_p7 = pneg %p1604_p5 }
   0xe   : > { %p1489_p8 = pnand %p1488_p7, %p1487_p6 }
  0x10   : > { %p1490_p9 = pneg %p1489_p8 }
  0x12   : > { %p1495_p11 = pnand %p1493_p10, %p1490_p9 }
  0x14   : > { %1498 = shalt.err (!%p1495_p11)
}
  0x15   : > { %s1499_s28 = scalar_lea.vmem %s127_s15, 256  ;;  %p1507_p1 = scmp.lt.s32.totalorder %s127_s15, %s127_s15 }
  0x16   : > { %p1500_p12 = scmp.ne.s32.totalorder %s127_s15, %s1499_s28  ;;  %p1508_p4 = scmp.lt.s32.totalorder %s1499_s28, %s1499_s28 }
  0x18   : > { %p1502_p13 = pnand %p1500_p12, %p1488_p7  ;;  %p1509_p3 = por %p1508_p4, %p1507_p1 }
  0x1a   : > { %p1503_p0 = pneg %p1502_p13 }
  0x1c   : > { %p1510_p2 = pnand %p1509_p3, %p1503_p0 }
  0x1e   : > { %1513 = shalt.err (!%p1510_p2)
}
  0x1f   : > { %s1560_s29 = smov 64   ;;  %s1561_s30 = smov 4  }
  0x20   : > { %1320 = dma.hbm_to_vmem [thread:$0]  (!%p1604_p5), %s1928_s1, 256, %s127_s15, [#allocation3], %s1560_s29, %s1560_s29, %s1561_s30  }
  0x21   : > { %s1514_s8 = scalar_lea.hbm %s1929_s2, 16 }
  0x22   : > { %p1515_p6 = scmp.ne.s32.totalorder %s1929_s2, %s1514_s8  ;;  %p1521_p8 = scmp.lt.u32.totalorder %s1514_s8, %s1929_s2 }
  0x24   : > { %p1517_p2 = pnand %p1515_p6, %p1488_p7 }
  0x26   : > { %p1518_p3 = pneg %p1517_p2 }
  0x28   : > { %p1523_p9 = pnand %p1521_p8, %p1518_p3 }
  0x2a   : > { %1526 = shalt.err (!%p1523_p9)
}
  0x2b   : > { %s1527_s15 = scalar_lea.vmem %s1608_s19, 16  ;;  %s1534_s18 = scalar_lea.vmem %s1608_s19, 32 }
  0x2c   : > { %p1528_p10 = scmp.ne.s32.totalorder %s1608_s19, %s1527_s15  ;;  %p1535_p13 = scmp.lt.s32.totalorder %s1608_s19, %s1608_s19 }
  0x2d   : > { %p1536_p0 = scmp.lt.s32.totalorder %s1534_s18, %s1527_s15 }
  0x2e   : > { %p1530_p11 = pnand %p1528_p10, %p1488_p7 }
  0x2f   : > { %p1537_p1 = por %p1536_p0, %p1535_p13 }
  0x30   : > { %p1531_p12 = pneg %p1530_p11 }
  0x32   : > { %p1538_p4 = pnand %p1537_p1, %p1531_p12 }
  0x34   : > { %1541 = shalt.err (!%p1538_p4)
}
  0x35   : > { %1323 = dma.hbm_to_vmem [thread:$0]  (!%p1604_p5), %s1929_s2, 16, %s1608_s19, [#allocation5]  }
  0x36   : > { %p1937_p6 = scmp.ne.s32.totalorder %s1934_s16, 0 }
  0x37   : > { %p1938_p7 = scmp.ne.s32.totalorder (!%p1937_p6), %s1935_s17, 0 }
  0x38   : > { %162 = sbr.rel (%p1937_p6) target bundleno = 377 (0x179), region = 32 }
  0x3f   : > { %1547 = dma.done.wait (%p1938_p7), [#allocation3], 256  }
  0x40   : > { %1549 = vsyncadd (%p1938_p7), [#allocation3], 4294967040 }
  0x41   : > { %1551 = dma.done.wait (%p1938_p7), [#allocation5], 16  }
  0x42   : > { %1553 = vsyncadd (%p1938_p7), [#allocation5], 4294967280  ;;  %s1019_s20 = sshll.u32 %s1010_s13, 5  ;;  %v1340_v0 = vld [vmem:[#allocation2] sm:$0xff]   ;;  %v1341_v1 = vld [vmem:[#allocation2 + $0x8] sm:$0xff]   ;;  %vm338_vm0 = vcmask 261120  }
  0x43   : > { %p191_p2 = scmp.lt.s32.totalorder %s1019_s20, 63  ;;  %1269 = vmatprep.subr.bf16.mxu0 %v1340_v0  ;;  %1305 = vmatprep.subr.bf16.mxu1 %v1340_v0  ;;  %v1712_v18 = vld [vmem:[#allocation4] ss:$0 sm:$0xff] }
  0x44   : > { %1270 = vmatpush3.bf16.msra.mxu0 %v1340_v0  ;;  %1307 = vmatpush3.bf16.msra.mxu1 %v1340_v0 }
  0x45   : > { %s1940_s20 = smov (!%p191_p2, %s1019_s20), 63  ;;  %1271 = vmatprep.subr.bf16.mxu0 %v1341_v1  ;;  %1306 = vmatprep.subr.bf16.mxu1 %v1341_v1 }
  0x46   : > { %s1020_s16 = sshll.u32 %s1940_s20, 2 }
  0x47   : > { %s1678_s24 = scalar_lea.vmem %s1927_s0, %s1020_s16  ;;  %s1832_s25 = scalar_lea.vmem %s1930_s3, %s1020_s16 }
  0x48   : > { %v1342_v2 = vld [vmem:[%s1678_s24] sm:$0xff]   ;;  %v1344_v4 = vld [vmem:[%s1678_s24 + $0x8] sm:$0xff]   ;;  %v1346_v6 = vld [vmem:[%s1678_s24 + $0x10] sm:$0xff]   ;;  %1272 = vmatpush3.bf16.msra.mxu0 %v1341_v1  ;;  %1308 = vmatpush3.bf16.msra.mxu1 %v1341_v1 }
  0x49   : > { %v1343_v3 = vld [vmem:[%s1678_s24 + $0x40] sm:$0xff]   ;;  %1273 = vmatprep.mubr.msk.bf16.mxu0 %vm338_vm0, %v1342_v2  ;;  %v1345_v5 = vld [vmem:[%s1678_s24 + $0x48] sm:$0xff]   ;;  %v1347_v7 = vld [vmem:[%s1678_s24 + $0x50] sm:$0xff]  }
  0x4a   : > { %1289 = vmatprep.mubr.msk.bf16.mxu1 %vm338_vm0, %v1343_v3  ;;  %v1348_v8 = vld [vmem:[%s1678_s24 + $0x18] sm:$0xff]   ;;  %v1350_v10 = vld [vmem:[%s1678_s24 + $0x20] sm:$0xff]   ;;  %v1352_v12 = vld [vmem:[%s1678_s24 + $0x28] sm:$0xff]  }
  0x4b   : > { %1274 = vmatmul.mubr.msk.bf16.vlgmr.msra.gmra.mrb[0].mxu0 %vm338_vm0, %v1344_v4  ;;  %1290 = vmatmul.mubr.msk.bf16.vlgmr.msra.gmra.mrb[0].mxu1 %vm338_vm0, %v1345_v5  ;;  %v1349_v9 = vld [vmem:[%s1678_s24 + $0x58] sm:$0xff]   ;;  %v1351_v11 = vld [vmem:[%s1678_s24 + $0x60] sm:$0xff]   ;;  %v1353_v13 = vld [vmem:[%s1678_s24 + $0x68] sm:$0xff]  }
  0x4c   : > { %1277 = vmatprep.mubr.msk.bf16.mxu0 %vm338_vm0, %v1346_v6  ;;  %1293 = vmatprep.mubr.msk.bf16.mxu1 %vm338_vm0, %v1347_v7  ;;  %v1354_v14 = vld [vmem:[%s1678_s24 + $0x30] sm:$0xff]   ;;  %v1356_v16 = vld [vmem:[%s1678_s24 + $0x38] sm:$0xff]  }
  0x4d   : > { %v1355_v15 = vld [vmem:[%s1678_s24 + $0x70] sm:$0xff]   ;;  %v1357_v17 = vld [vmem:[%s1678_s24 + $0x78] sm:$0xff]  }
  0x53   : > { %1278 = vmatmul.mubr.msk.bf16.gmra.mrb[4].mxu0 %vm338_vm0, %v1348_v8  ;;  %1294 = vmatmul.mubr.msk.bf16.gmra.mrb[4].mxu1 %vm338_vm0, %v1349_v9 }
  0x54   : > { %1281 = vmatprep.mubr.msk.bf16.mxu0 %vm338_vm0, %v1350_v10  ;;  %1297 = vmatprep.mubr.msk.bf16.mxu1 %vm338_vm0, %v1351_v11 }
  0x5b   : > { %1282 = vmatmul.mubr.msk.bf16.gmra.mrb[8].mxu0 %vm338_vm0, %v1352_v12  ;;  %1298 = vmatmul.mubr.msk.bf16.gmra.mrb[8].mxu1 %vm338_vm0, %v1353_v13 }
  0x5c   : > { %1285 = vmatprep.mubr.msk.bf16.mxu0 %vm338_vm0, %v1354_v14  ;;  %1301 = vmatprep.mubr.msk.bf16.mxu1 %vm338_vm0, %v1355_v15 }
  0x63   : > { %1286 = vmatmul.mubr.msk.bf16.gmra.mrb[12].mxu0 %vm338_vm0, %v1356_v16  ;;  %1302 = vmatmul.mubr.msk.bf16.gmra.mrb[12].mxu1 %vm338_vm0, %v1357_v17 }
 0x11e   : > { %v1275_v19 = vpop.f32.mrb[0].mxu0  ;;  %v1291_v20 = vpop.f32.mrb[0].mxu1 }
 0x11f   : > { %v1715_v21 = vadd.f32 %v1275_v19, %v1712_v18  ;;  %v1718_v22 = vadd.f32 %v1291_v20, %v1712_v18  ;;  %v421_v23 = vpop.f32.mrb[1].mxu0  ;;  %v485_v24 = vpop.f32.mrb[1].mxu1 }
 0x120   : > { %v1721_v25 = vadd.f32 %v1712_v18, %v421_v23  ;;  %v1724_v26 = vadd.f32 %v1712_v18, %v485_v24  ;;  %v1276_v27 = vpop.f32.mrb[2].mxu0  ;;  %v1292_v28 = vpop.f32.mrb[2].mxu1 }
 0x121   : > { %v1060_v29 = vmul.f32 -1.442695, %v1715_v21  ;;  %v1076_v30 = vmul.f32 -1.442695, %v1718_v22  ;;  %v1729_v31 = vadd.f32 %v1276_v27, %v1712_v18  ;;  %v1732_v32 = vadd.f32 %v1292_v28, %v1712_v18  ;;  %v424_v33 = vpop.f32.mrb[3].mxu0  ;;  %v488_v34 = vpop.f32.mrb[3].mxu1 }
 0x122   : > { %v1058_v35 = vmul.f32 -1.442695, %v1721_v25  ;;  %v1074_v36 = vmul.f32 -1.442695, %v1724_v26  ;;  %v1737_v37 = vadd.f32 %v1712_v18, %v424_v33  ;;  %v1740_v38 = vadd.f32 %v1712_v18, %v488_v34 }
 0x123   : > { %1358 = vpow2.f32 %v1060_v29  ;;  %v1061_v39 = vmul.f32 -1.442695, %v1729_v31  ;;  %v1077_v40 = vmul.f32 -1.442695, %v1732_v32 }
 0x124   : > { %1360 = vpow2.f32 %v1076_v30  ;;  %v1059_v41 = vmul.f32 -1.442695, %v1737_v37  ;;  %v1075_v42 = vmul.f32 -1.442695, %v1740_v38 }
 0x125   : > { %1362 = vpow2.f32 %v1058_v35 }
 0x126   : > { %1364 = vpow2.f32 %v1074_v36  ;;  %v1279_v43 = vpop.f32.mrb[4].mxu0  ;;  %v1295_v44 = vpop.f32.mrb[4].mxu1 }
 0x127   : > { %1366 = vpow2.f32 %v1061_v39  ;;  %v1747_v45 = vadd.f32 %v1279_v43, %v1712_v18  ;;  %v1750_v46 = vadd.f32 %v1295_v44, %v1712_v18  ;;  %v437_v47 = vpop.f32.mrb[5].mxu0  ;;  %v501_v48 = vpop.f32.mrb[5].mxu1 }
 0x128   : > { %1368 = vpow2.f32 %v1077_v40  ;;  %v1753_v49 = vadd.f32 %v1712_v18, %v437_v47  ;;  %v1756_v50 = vadd.f32 %v1712_v18, %v501_v48  ;;  %v1280_v51 = vpop.f32.mrb[6].mxu0  ;;  %v1296_v52 = vpop.f32.mrb[6].mxu1 }
 0x129   : > { %1370 = vpow2.f32 %v1059_v41  ;;  %v1064_v53 = vmul.f32 -1.442695, %v1747_v45  ;;  %v1080_v54 = vmul.f32 -1.442695, %v1750_v46  ;;  %v1761_v55 = vadd.f32 %v1280_v51, %v1712_v18  ;;  %v440_v56 = vpop.f32.mrb[7].mxu0  ;;  %v504_v57 = vpop.f32.mrb[7].mxu1 }
 0x12a   : > { %1372 = vpow2.f32 %v1075_v42  ;;  %v1062_v58 = vmul.f32 -1.442695, %v1753_v49  ;;  %v1078_v59 = vmul.f32 -1.442695, %v1756_v50  ;;  %v1767_v15 = vadd.f32 %v1296_v52, %v1712_v18 }
 0x12b   : > { %1374 = vpow2.f32 %v1064_v53  ;;  %v1065_v60 = vmul.f32 -1.442695, %v1761_v55  ;;  %v1770_v20 = vadd.f32 %v1712_v18, %v440_v56  ;;  %v1774_v34 = vadd.f32 %v1712_v18, %v504_v57 }
 0x12c   : > { %1376 = vpow2.f32 %v1080_v54  ;;  %v1081_v33 = vmul.f32 -1.442695, %v1767_v15 }
 0x12d   : > { %v1359_v61 = vpop.eup %1358  ;;  %1378 = vpow2.f32 %v1062_v58  ;;  %v1063_v40 = vmul.f32 -1.442695, %v1770_v20 }
 0x12e   : > { %v1361_v62 = vpop.eup %1360  ;;  %v646_v63 = vadd.f32 1.0, %v1359_v61  ;;  %1380 = vpow2.f32 %v1078_v59  ;;  %v1283_v0 = vpop.f32.mrb[8].mxu0 }
 0x12f   : > { %v1299_v1 = vpop.f32.mrb[8].mxu1  ;;  %v1363_v2 = vpop.eup %1362  ;;  %v662_v3 = vadd.f32 1.0, %v1361_v62  ;;  %1382 = vpow2.f32 %v1065_v60  ;;  %v1778_v41 = vadd.f32 %v1283_v0, %v1712_v18 }
 0x130   : > { %v453_v4 = vpop.f32.mrb[9].mxu0  ;;  %v517_v5 = vpop.f32.mrb[9].mxu1  ;;  %1384 = vrcp.f32 %v646_v63  ;;  %v644_v7 = vadd.f32 1.0, %v1363_v2  ;;  %v1783_v48 = vadd.f32 %v1299_v1, %v1712_v18 }
 0x131   : > { %v1365_v6 = vpop.eup %1364  ;;  %v1284_v8 = vpop.f32.mrb[10].mxu0  ;;  %1386 = vrcp.f32 %v662_v3  ;;  %v1786_v51 = vadd.f32 %v1712_v18, %v453_v4  ;;  %v1793_v57 = vadd.f32 %v1712_v18, %v517_v5  ;;  %v1079_v3 = vmul.f32 -1.442695, %v1774_v34 }
 0x132   : > { %v1300_v9 = vpop.f32.mrb[10].mxu1  ;;  %v1367_v10 = vpop.eup %1366  ;;  %v660_v11 = vadd.f32 1.0, %v1365_v6  ;;  %1388 = vrcp.f32 %v644_v7  ;;  %v1796_v58 = vadd.f32 %v1284_v8, %v1712_v18  ;;  %v1068_v5 = vmul.f32 -1.442695, %v1778_v41 }
 0x133   : > { %v456_v12 = vpop.f32.mrb[11].mxu0  ;;  %v1369_v13 = vpop.eup %1368  ;;  %v647_v14 = vadd.f32 1.0, %v1367_v10  ;;  %v1803_v63 = vadd.f32 %v1300_v9, %v1712_v18  ;;  %v1084_v6 = vmul.f32 -1.442695, %v1783_v48  ;;  %v1066_v8 = vmul.f32 -1.442695, %v1786_v51 }
 0x134   : > { %v520_v16 = vpop.f32.mrb[11].mxu1  ;;  %v1371_v17 = vpop.eup %1370  ;;  %1390 = vrcp.f32 %v660_v11  ;;  %v663_v19 = vadd.f32 1.0, %v1369_v13  ;;  %v1806_v0 = vadd.f32 %v1712_v18, %v456_v12  ;;  %v1082_v9 = vmul.f32 -1.442695, %v1793_v57 }
 0x135   : > { %v1373_v23 = vpop.eup %1372  ;;  %1392 = vrcp.f32 %v647_v14  ;;  %v645_v24 = vadd.f32 1.0, %v1371_v17  ;;  %v1816_v10 = vadd.f32 %v1712_v18, %v520_v16  ;;  %v1069_v12 = vmul.f32 -1.442695, %v1796_v58 }
 0x136   : > { %v1375_v27 = vpop.eup %1374  ;;  %1394 = vrcp.f32 %v663_v19  ;;  %v661_v28 = vadd.f32 1.0, %v1373_v23  ;;  %v1287_v35 = vpop.f32.mrb[12].mxu0  ;;  %v1085_v13 = vmul.f32 -1.442695, %v1803_v63  ;;  %v1067_v14 = vmul.f32 -1.442695, %v1806_v0 }
 0x137   : > { %v1377_v29 = vpop.eup %1376  ;;  %1396 = vrcp.f32 %v645_v24  ;;  %v650_v30 = vadd.f32 1.0, %v1375_v27  ;;  %v1303_v42 = vpop.f32.mrb[12].mxu1  ;;  %v1824_v24 = vadd.f32 %v1287_v35, %v1712_v18 }
 0x138   : > { %v1379_v36 = vpop.eup %1378  ;;  %1398 = vrcp.f32 %v661_v28  ;;  %v666_v39 = vadd.f32 1.0, %v1377_v29  ;;  %v1780_v43 = vpop.f32.mrb[13].mxu0 }
 0x139   : > { %v1381_v44 = vpop.eup %1380  ;;  %1400 = vrcp.f32 %v650_v30  ;;  %v648_v47 = vadd.f32 1.0, %v1379_v36  ;;  %v1788_v52 = vpop.f32.mrb[13].mxu1 }
 0x13a   : > { %v1790_v53 = vpop.f32.mrb[14].mxu0  ;;  %v1383_v54 = vpop.eup %1382  ;;  %1402 = vrcp.f32 %v666_v39  ;;  %v664_v56 = vadd.f32 1.0, %v1381_v44  ;;  %v1072_v44 = vmul.f32 -1.442695, %v1824_v24 }
 0x13b   : > { %v1798_v59 = vpop.f32.mrb[14].mxu1  ;;  %v1800_v60 = vpop.f32.mrb[15].mxu0  ;;  %1404 = vrcp.f32 %v648_v47  ;;  %v651_v62 = vadd.f32 1.0, %v1383_v54 }
 0x13c   : > { %v1385_v61 = vpop.eup %1384  ;;  %v1808_v1 = vpop.f32.mrb[15].mxu1  ;;  %1406 = vrcp.f32 %v664_v56 }
 0x13d   : > { %v1387_v2 = vpop.eup %1386  ;;  %1408 = vrcp.f32 %v651_v62  ;;  %v742_v19 = vmul.f32 %v1385_v61, %v1715_v21  ;;  %v1836_v21 = vadd.f32 %v1303_v42, %v1712_v18 }
 0x13e   : > { %v1389_v4 = vpop.eup %1388  ;;  %1410 = vpow2.f32 %v1081_v33  ;;  %v758_v16 = vmul.f32 %v1387_v2, %v1718_v22 }
 0x13f   : > { %v1391_v7 = vpop.eup %1390  ;;  %1412 = vpow2.f32 %v1063_v40  ;;  %v740_v29 = vmul.f32 %v1389_v4, %v1721_v25  ;;  %v1083_v25 = vmul.f32 -1.442695, %v1816_v10 }
 0x140   : > { %v1393_v11 = vpop.eup %1392  ;;  %1414 = vpow2.f32 %v1079_v3  ;;  %v756_v35 = vmul.f32 %v1391_v7, %v1724_v26 }
 0x141   : > { %v1395_v17 = vpop.eup %1394  ;;  %v743_v23 = vmul.f32 %v1393_v11, %v1729_v31  ;;  %1416 = vpow2.f32 %v1068_v5 }
 0x142   : > { %v1397_v27 = vpop.eup %1396  ;;  %v759_v28 = vmul.f32 %v1395_v17, %v1732_v32  ;;  %1418 = vpow2.f32 %v1084_v6 }
 0x143   : > { %v1399_v31 = vpop.eup %1398  ;;  %v1164_v30 = vpack.c.bf16 %v743_v23, %v742_v19  ;;  %v741_v22 = vmul.f32 %v1397_v27, %v1737_v37  ;;  %1420 = vpow2.f32 %v1066_v8  ;;  %v1860_v23 = vadd.f32 %v1712_v18, %v1780_v43 }
 0x144   : > { %v1401_v33 = vpop.eup %1400  ;;  %v1204_v36 = vpack.c.bf16 %v759_v28, %v758_v16  ;;  %v757_v39 = vmul.f32 %v1399_v31, %v1740_v38  ;;  %1422 = vpow2.f32 %v1082_v9  ;;  %v1088_v38 = vmul.f32 -1.442695, %v1836_v21 }
 0x145   : > { %v1842_v32 = vpop.eup %1402  ;;  %1236 = vst [vmem:[%s1832_s25 + $0x8] sm:$0xff] %v1164_v30   ;;  %v1159_v40 = vpack.c.bf16 %v741_v22, %v740_v29  ;;  %1424 = vpow2.f32 %v1069_v12  ;;  %v746_v56 = vmul.f32 %v1401_v33, %v1747_v45  ;;  %v1864_v28 = vadd.f32 %v1712_v18, %v1788_v52 }
 0x146   : > { %v1846_v42 = vpop.eup %1404  ;;  %1244 = vst [vmem:[%s1832_s25 + $0x48] sm:$0xff] %v1204_v36   ;;  %v1199_v37 = vpack.c.bf16 %v757_v39, %v756_v35  ;;  %1426 = vpow2.f32 %v1085_v13  ;;  %v1868_v30 = vadd.f32 %v1790_v53, %v1712_v18  ;;  %v1872_v43 = vadd.f32 %v1798_v59, %v1712_v18 }
 0x147   : > { %v1850_v26 = vpop.eup %1406  ;;  %1160 = vst [vmem:[%s1832_s25] sm:$0xff] %v1159_v40   ;;  %1428 = vpow2.f32 %v1067_v14  ;;  %v1876_v35 = vadd.f32 %v1712_v18, %v1800_v60  ;;  %v1070_v36 = vmul.f32 -1.442695, %v1860_v23  ;;  %v1086_v53 = vmul.f32 -1.442695, %v1864_v28 }
 0x148   : > { %v1409_v47 = vpop.eup %1408  ;;  %1243 = vst [vmem:[%s1832_s25 + $0x40] sm:$0xff] %v1199_v37   ;;  %1430 = vpow2.f32 %v1083_v25  ;;  %v1882_v40 = vadd.f32 %v1712_v18, %v1808_v1  ;;  %v762_v59 = vmul.f32 %v1842_v32, %v1750_v46  ;;  %v1073_v60 = vmul.f32 -1.442695, %v1868_v30 }
 0x149   : > { %v1411_v54 = vpop.eup %1410  ;;  %v747_v61 = vmul.f32 %v1409_v47, %v1761_v55  ;;  %1432 = vpow2.f32 %v1072_v44  ;;  %v1071_v18 = vmul.f32 -1.442695, %v1876_v35  ;;  %v760_v46 = vmul.f32 %v1850_v26, %v1756_v50 }
 0x14a   : > { %v1413_v62 = vpop.eup %1412  ;;  %v667_v2 = vadd.f32 1.0, %v1411_v54  ;;  %1434 = vpow2.f32 %v1088_v38  ;;  %v744_v38 = vmul.f32 %v1846_v42, %v1753_v49  ;;  %v1089_v54 = vmul.f32 -1.442695, %v1872_v43 }
 0x14b   : > { %v1415_v3 = vpop.eup %1414  ;;  %v1174_v4 = vpack.c.bf16 %v747_v61, %v746_v56  ;;  %v649_v5 = vadd.f32 1.0, %v1413_v62  ;;  %v1087_v49 = vmul.f32 -1.442695, %v1882_v40 }
 0x14c   : > { %v1417_v6 = vpop.eup %1416  ;;  %1436 = vrcp.f32 %v667_v2  ;;  %v665_v7 = vadd.f32 1.0, %v1415_v3 }
 0x14d   : > { %v1419_v8 = vpop.eup %1418  ;;  %1238 = vst [vmem:[%s1832_s25 + $0x18] sm:$0xff] %v1174_v4   ;;  %1438 = vrcp.f32 %v649_v5  ;;  %v654_v9 = vadd.f32 1.0, %v1417_v6 }
 0x14e   : > { %v1421_v11 = vpop.eup %1420  ;;  %1440 = vrcp.f32 %v665_v7  ;;  %v670_v45 = vadd.f32 1.0, %v1419_v8 }
 0x14f   : > { %v1423_v12 = vpop.eup %1422  ;;  %1442 = vrcp.f32 %v654_v9  ;;  %v652_v55 = vadd.f32 1.0, %v1421_v11 }
 0x150   : > { %v1425_v13 = vpop.eup %1424  ;;  %1444 = vrcp.f32 %v670_v45  ;;  %v668_v14 = vadd.f32 1.0, %v1423_v12 }
 0x151   : > { %v1427_v17 = vpop.eup %1426  ;;  %1446 = vrcp.f32 %v652_v55  ;;  %v655_v19 = vadd.f32 1.0, %v1425_v13 }
 0x152   : > { %v1429_v27 = vpop.eup %1428  ;;  %1448 = vrcp.f32 %v668_v14  ;;  %v671_v16 = vadd.f32 1.0, %v1427_v17 }
 0x153   : > { %v1431_v31 = vpop.eup %1430  ;;  %1450 = vrcp.f32 %v655_v19  ;;  %v653_v29 = vadd.f32 1.0, %v1429_v27 }
 0x154   : > { %v1433_v22 = vpop.eup %1432  ;;  %1452 = vrcp.f32 %v671_v16  ;;  %v669_v33 = vadd.f32 1.0, %v1431_v31 }
 0x155   : > { %v1435_v52 = vpop.eup %1434  ;;  %1454 = vrcp.f32 %v653_v29  ;;  %v658_v11 = vadd.f32 1.0, %v1433_v22 }
 0x156   : > { %v1437_v39 = vpop.eup %1436  ;;  %1456 = vrcp.f32 %v669_v33  ;;  %v674_v12 = vadd.f32 1.0, %v1435_v52 }
 0x157   : > { %v1439_v25 = vpop.eup %1438  ;;  %v763_v37 = vmul.f32 %v1437_v39, %v1767_v15  ;;  %1458 = vpow2.f32 %v1070_v36 }
 0x158   : > { %v1441_v44 = vpop.eup %1440  ;;  %v745_v47 = vmul.f32 %v1439_v25, %v1770_v20  ;;  %1460 = vpow2.f32 %v1086_v53 }
 0x159   : > { %v1443_v1 = vpop.eup %1442  ;;  %v1214_v15 = vpack.c.bf16 %v763_v37, %v762_v59  ;;  %v761_v32 = vmul.f32 %v1441_v44, %v1774_v34  ;;  %1462 = vpow2.f32 %v1073_v60 }
 0x15a   : > { %v1445_v56 = vpop.eup %1444  ;;  %v1169_v61 = vpack.c.bf16 %v745_v47, %v744_v38  ;;  %1464 = vpow2.f32 %v1089_v54  ;;  %v750_v34 = vmul.f32 %v1443_v1, %v1778_v41 }
 0x15b   : > { %v1447_v20 = vpop.eup %1446  ;;  %1246 = vst [vmem:[%s1832_s25 + $0x58] sm:$0xff] %v1214_v15   ;;  %v1209_v42 = vpack.c.bf16 %v761_v32, %v760_v46  ;;  %1466 = vpow2.f32 %v1071_v18  ;;  %v766_v4 = vmul.f32 %v1445_v56, %v1783_v48 }
 0x15c   : > { %v1449_v62 = vpop.eup %1448  ;;  %1237 = vst [vmem:[%s1832_s25 + $0x10] sm:$0xff] %v1169_v61   ;;  %1468 = vpow2.f32 %v1087_v49  ;;  %v748_v7 = vmul.f32 %v1447_v20, %v1786_v51 }
 0x15d   : > { %v1451_v2 = vpop.eup %1450  ;;  %1245 = vst [vmem:[%s1832_s25 + $0x50] sm:$0xff] %v1209_v42   ;;  %v764_v41 = vmul.f32 %v1449_v62, %v1793_v57  ;;  %1470 = vrcp.f32 %v658_v11 }
 0x15e   : > { %v1453_v50 = vpop.eup %1452  ;;  %v751_v26 = vmul.f32 %v1451_v2, %v1796_v58  ;;  %1472 = vrcp.f32 %v674_v12 }
 0x15f   : > { %v1455_v3 = vpop.eup %1454  ;;  %v767_v5 = vmul.f32 %v1453_v50, %v1803_v63 }
 0x160   : > { %v1457_v6 = vpop.eup %1456  ;;  %v1184_v8 = vpack.c.bf16 %v751_v26, %v750_v34  ;;  %v749_v9 = vmul.f32 %v1455_v3, %v1806_v0 }
 0x161   : > { %v1224_v45 = vpack.c.bf16 %v767_v5, %v766_v4  ;;  %v765_v58 = vmul.f32 %v1457_v6, %v1816_v10  ;;  %v1459_v48 = vpop.eup %1458 }
 0x162   : > { %1240 = vst [vmem:[%s1832_s25 + $0x28] sm:$0xff] %v1184_v8   ;;  %v1179_v55 = vpack.c.bf16 %v749_v9, %v748_v7  ;;  %v1461_v13 = vpop.eup %1460  ;;  %v656_v51 = vadd.f32 1.0, %v1459_v48 }
 0x163   : > { %1248 = vst [vmem:[%s1832_s25 + $0x68] sm:$0xff] %v1224_v45   ;;  %v1219_v63 = vpack.c.bf16 %v765_v58, %v764_v41  ;;  %v1463_v14 = vpop.eup %1462  ;;  %v672_v0 = vadd.f32 1.0, %v1461_v13 }
 0x164   : > { %1239 = vst [vmem:[%s1832_s25 + $0x20] sm:$0xff] %v1179_v55   ;;  %v1465_v17 = vpop.eup %1464  ;;  %1474 = vrcp.f32 %v656_v51  ;;  %v659_v57 = vadd.f32 1.0, %v1463_v14 }
 0x165   : > { %1247 = vst [vmem:[%s1832_s25 + $0x60] sm:$0xff] %v1219_v63   ;;  %v1467_v19 = vpop.eup %1466  ;;  %1476 = vrcp.f32 %v672_v0  ;;  %v675_v10 = vadd.f32 1.0, %v1465_v17 }
 0x166   : > { %v1469_v27 = vpop.eup %1468  ;;  %1478 = vrcp.f32 %v659_v57  ;;  %v657_v16 = vadd.f32 1.0, %v1467_v19 }
 0x167   : > { %1480 = vrcp.f32 %v675_v10  ;;  %v673_v31 = vadd.f32 1.0, %v1469_v27  ;;  %v1471_v29 = vpop.eup %1470 }
 0x168   : > { %1482 = vrcp.f32 %v657_v16  ;;  %v1473_v22 = vpop.eup %1472  ;;  %v754_v53 = vmul.f32 %v1471_v29, %v1824_v24 }
 0x169   : > { %1484 = vrcp.f32 %v673_v31  ;;  %v770_v37 = vmul.f32 %v1473_v22, %v1836_v21 }
 0x16e   : > { %v1475_v33 = vpop.eup %1474 }
 0x16f   : > { %v1477_v52 = vpop.eup %1476  ;;  %v752_v38 = vmul.f32 %v1475_v33, %v1860_v23 }
 0x170   : > { %v1479_v36 = vpop.eup %1478  ;;  %v768_v18 = vmul.f32 %v1477_v52, %v1864_v28 }
 0x171   : > { %v1481_v39 = vpop.eup %1480  ;;  %v755_v25 = vmul.f32 %v1479_v36, %v1868_v30 }
 0x172   : > { %v1483_v59 = vpop.eup %1482  ;;  %v771_v60 = vmul.f32 %v1481_v39, %v1872_v43 }
 0x173   : > { %v1485_v44 = vpop.eup %1484  ;;  %v1194_v47 = vpack.c.bf16 %v755_v25, %v754_v53  ;;  %v753_v54 = vmul.f32 %v1483_v59, %v1876_v35 }
 0x174   : > { %v1234_v1 = vpack.c.bf16 %v771_v60, %v770_v37  ;;  %v769_v24 = vmul.f32 %v1485_v44, %v1882_v40 }
 0x175   : > { %1242 = vst [vmem:[%s1832_s25 + $0x38] sm:$0xff] %v1194_v47   ;;  %v1189_v46 = vpack.c.bf16 %v753_v54, %v752_v38 }
 0x176   : > { %1250 = vst [vmem:[%s1832_s25 + $0x78] sm:$0xff] %v1234_v1   ;;  %v1229_v30 = vpack.c.bf16 %v769_v24, %v768_v18 }
 0x177   : > { %1241 = vst [vmem:[%s1832_s25 + $0x30] sm:$0xff] %v1189_v46  }
 0x178   : > { %1249 = vst [vmem:[%s1832_s25 + $0x70] sm:$0xff] %v1229_v30  }
 0x179 PF: > { %s15_s12 = sadd.s32 1, %s1556_s12  }
 0x17a   : > { %p12_p5 = scmp.ge.s32.totalorder %s15_s12, 4  }
 0x17c   :  { %14 = sbr.rel (!%p12_p5) target bundleno = 2 (0x2), region = 71 }
 0x183   :  { %954 = vsyncpa [#allocation3], 1 }
 0x184   :  { %956 = vsyncpa [#allocation3 + $0x1], 1 }
 0x185   :  { %957 = vsyncpa [#allocation5], 1 }

// kernel: c3dcn_forward.5
= control target key start
LH: loop header
LB: loop body
LE: loop exit
PB: predicated region body
PF: predicated region fallthrough
CT: control target
= control target key end

     0   :  { %10 = vsyncpa [#allocation3], 0  ;;  %s7323_s0 = inlined_call_operand.vmem [shape: bf16[2,290,16], index: 0, kind: input, shape index: {}]   ;;  %s7324_s1 = inlined_call_operand.hbm [shape: bf16[9,16,16], index: 1, kind: input, shape index: {}]   ;;  %s7325_s2 = inlined_call_operand.hbm [shape: f32[1,16], index: 2, kind: input, shape index: {}]   ;;  %s7326_s3 = inlined_call_operand.hbm [shape: bf16[16,128], index: 3, kind: input, shape index: {}]   ;;  %s7327_s4 = inlined_call_operand.hbm [shape: f32[1,128], index: 4, kind: input, shape index: {}]   ;;  %s7328_s5 = inlined_call_operand.vmem [shape: f32[2,256,128], index: 5, kind: output, shape index: {}]  }
   0x1   :  { %11 = vsyncpa [#allocation5], 0 }
   0x2   :  { %12 = vsyncpa [#allocation8], 0  ;;  %s5845_s18 = smov 0  }
   0x3 LB: > { %s5809_s19 = smov [#allocation4]   ;;  %s5851_s21 = sadd.s32 4294967295, %s5807_s18   ;;  %s5807_s18 = sphi %s5845_s18, %s18_s18  }
   0x4   : > { %s185_s20 = sshll.u32 %s5809_s19, 4  ;;  %p4420_p0 = scmp.ge.s32.totalorder %s5807_s18, 1  ;;  %s5856_s20 = int_to_ptr.vmem [resolvable:$true] %s185_s20 }
   0x5   : > { %p159_p1 = scmp.lt.s32.totalorder %s5807_s18, 3  ;;  %p7329_p2 = scmp.eq.s32.totalorder %s5851_s21, 0 }
   0x6   : > { %s5810_s23 = smov [#allocation2]   ;;  %s5811_s26 = smov [#allocation6]  }
   0x7   : > { %p5858_p3 = pnand %p4420_p0, %p159_p1  ;;  %s171_s24 = sshll.u32 %s5810_s23, 4  ;;  %s5864_s24 = int_to_ptr.vmem [resolvable:$true] %s171_s24 }
   0x8   : > { %s195_s27 = sshll.u32 %s5811_s26, 4  ;;  %s5812_s28 = smov [#allocation7]   ;;  %s5872_s27 = int_to_ptr.vmem [resolvable:$true] %s195_s27 }
   0x9   : > { %s7331_s22 = scalar_select %p5858_p3, 1, 0 }
   0xa   : > { %p5432_p4 = pneg %p5858_p3  ;;  %s5874_s29 = sshll.u32 %s5812_s28, 4  ;;  %s210_s29 = int_to_ptr.vmem [resolvable:$true] %s5874_s29 }
   0xb   : > { %s5677_s7 = scalar_lea.hbm %s7325_s2, 16 }
   0xc   : > { %p5868_p5 = pnand %p7329_p2, %p5432_p4  ;;  %p5678_p6 = scmp.ne.s32.totalorder %s7325_s2, %s5677_s7 }
   0xd   : > { %p5684_p10 = scmp.lt.u32.totalorder %s5677_s7, %s7325_s2 }
   0xe   : > { %p5884_p7 = pneg %p5868_p5 }
  0x10   : > { %p5680_p8 = pnand %p5884_p7, %p5678_p6 }
  0x12   : > { %p5681_p9 = pneg %p5680_p8 }
  0x14   : > { %p5686_p11 = pnand %p5684_p10, %p5681_p9 }
  0x16   : > { %5689 = shalt.err (!%p5686_p11)
}
  0x17   : > { %s5690_s13 = scalar_lea.vmem %s5856_s20, 16  ;;  %s5697_s14 = scalar_lea.vmem %s5856_s20, 32 }
  0x18   : > { %p5691_p12 = scmp.ne.s32.totalorder %s5856_s20, %s5690_s13  ;;  %p5698_p1 = scmp.lt.s32.totalorder %s5856_s20, %s5856_s20 }
  0x19   : > { %p5699_p4 = scmp.lt.s32.totalorder %s5697_s14, %s5690_s13 }
  0x1a   : > { %p5693_p13 = pnand %p5691_p12, %p5884_p7 }
  0x1b   : > { %p5700_p6 = por %p5699_p4, %p5698_p1 }
  0x1c   : > { %p5694_p0 = pneg %p5693_p13 }
  0x1e   : > { %p5701_p8 = pnand %p5700_p6, %p5694_p0 }
  0x20   : > { %5704 = shalt.err (!%p5701_p8)
}
  0x21   : > { %5438 = dma.hbm_to_vmem [thread:$0]  (!%p5868_p5), %s7325_s2, 16, %s5856_s20, [#allocation5]  }
  0x22   : > { %s5705_s23 = scalar_lea.hbm %s7324_s1, 1152 }
  0x23   : > { %p5706_p9 = scmp.ne.s32.totalorder %s7324_s1, %s5705_s23  ;;  %p5712_p12 = scmp.lt.u32.totalorder %s5705_s23, %s7324_s1 }
  0x25   : > { %p5708_p10 = pnand %p5706_p9, %p5884_p7 }
  0x27   : > { %p5709_p11 = pneg %p5708_p10 }
  0x29   : > { %p5714_p13 = pnand %p5712_p12, %p5709_p11 }
  0x2b   : > { %5717 = shalt.err (!%p5714_p13)
}
  0x2c   : > { %s5718_s20 = scalar_lea.vmem %s5864_s24, 1152  ;;  %p5726_p6 = scmp.lt.s32.totalorder %s5864_s24, %s5864_s24 }
  0x2d   : > { %p5719_p0 = scmp.ne.s32.totalorder %s5864_s24, %s5718_s20  ;;  %p5727_p8 = scmp.lt.s32.totalorder %s5718_s20, %s5718_s20 }
  0x2f   : > { %p5721_p1 = pnand %p5719_p0, %p5884_p7  ;;  %p5728_p9 = por %p5727_p8, %p5726_p6 }
  0x31   : > { %p5722_p4 = pneg %p5721_p1 }
  0x33   : > { %p5729_p10 = pnand %p5728_p9, %p5722_p4 }
  0x35   : > { %5732 = shalt.err (!%p5729_p10)
}
  0x36   : > { %s5813_s7 = smov 64   ;;  %s5814_s8 = smov 4  }
  0x37   : > { %5435 = dma.hbm_to_vmem [thread:$0]  (!%p5868_p5), %s7324_s1, 1152, %s5864_s24, [#allocation3], %s5813_s7, %s5813_s7, %s5814_s8  }
  0x38   : > { %s5733_s14 = scalar_lea.hbm %s7326_s3, 128 }
  0x39   : > { %p5734_p11 = scmp.ne.s32.totalorder %s7326_s3, %s5733_s14  ;;  %p5740_p0 = scmp.lt.u32.totalorder %s5733_s14, %s7326_s3 }
  0x3b   : > { %p5736_p12 = pnand %p5734_p11, %p5884_p7 }
  0x3d   : > { %p5737_p13 = pneg %p5736_p12 }
  0x3f   : > { %p5742_p1 = pnand %p5740_p0, %p5737_p13 }
  0x41   : > { %5745 = shalt.err (!%p5742_p1)
}
  0x42   : > { %s5746_s24 = scalar_lea.vmem %s5872_s27, 128  ;;  %p5754_p9 = scmp.lt.s32.totalorder %s5872_s27, %s5872_s27 }
  0x43   : > { %p5747_p4 = scmp.ne.s32.totalorder %s5872_s27, %s5746_s24  ;;  %p5755_p10 = scmp.lt.s32.totalorder %s5746_s24, %s5746_s24 }
  0x45   : > { %p5749_p6 = pnand %p5747_p4, %p5884_p7  ;;  %p5756_p11 = por %p5755_p10, %p5754_p9 }
  0x47   : > { %p5750_p8 = pneg %p5749_p6 }
  0x49   : > { %p5757_p12 = pnand %p5756_p11, %p5750_p8 }
  0x4b   : > { %5760 = shalt.err (!%p5757_p12)
}
  0x4c   : > { %5441 = dma.hbm_to_vmem [thread:$0]  (!%p5868_p5), %s7326_s3, 128, %s5872_s27, [#allocation5], %s5813_s7, %s5813_s7, %s5814_s8  }
  0x4d   : > { %s5761_s6 = scalar_lea.hbm %s7327_s4, 16 }
  0x4e   : > { %p5762_p13 = scmp.ne.s32.totalorder %s7327_s4, %s5761_s6  ;;  %p5768_p4 = scmp.lt.u32.totalorder %s5761_s6, %s7327_s4 }
  0x50   : > { %p5764_p0 = pnand %p5762_p13, %p5884_p7 }
  0x52   : > { %p5765_p1 = pneg %p5764_p0 }
  0x54   : > { %p5770_p6 = pnand %p5768_p4, %p5765_p1 }
  0x56   : > { %5773 = shalt.err (!%p5770_p6)
}
  0x57   : > { %s5774_s13 = scalar_lea.vmem %s210_s29, 16  ;;  %s5781_s27 = scalar_lea.vmem %s210_s29, 32 }
  0x58   : > { %p5775_p8 = scmp.ne.s32.totalorder %s210_s29, %s5774_s13  ;;  %p5782_p11 = scmp.lt.s32.totalorder %s210_s29, %s210_s29 }
  0x59   : > { %p5783_p12 = scmp.lt.s32.totalorder %s5781_s27, %s5774_s13 }
  0x5a   : > { %p5777_p9 = pnand %p5775_p8, %p5884_p7 }
  0x5b   : > { %p5784_p2 = por %p5783_p12, %p5782_p11 }
  0x5c   : > { %p5778_p10 = pneg %p5777_p9 }
  0x5e   : > { %p5785_p3 = pnand %p5784_p2, %p5778_p10 }
  0x60   : > { %5788 = shalt.err (!%p5785_p3)
}
  0x61   : > { %5444 = dma.hbm_to_vmem [thread:$0]  (!%p5868_p5), %s7327_s4, 16, %s210_s29, [#allocation8]  }
  0x62   : > { %p7334_p13 = scmp.ne.s32.totalorder %s7331_s22, 0 }
  0x63   : > { %p7335_p0 = scmp.eq.s32.totalorder (!%p7334_p13), %s5851_s21, 0 }
  0x64   : > { %230 = sbr.rel (%p7334_p13) target bundleno = 907 (0x38b), region = 40 }
  0x6b   : > { %5794 = dma.done.wait (%p7335_p0), [#allocation3], 1152   ;;  %p7336_p7 = pmov %p7335_p0 }
  0x6c   : > { %p7337_p1 = pmov %p7335_p0 }
  0x6d   : > { %5796 = vsyncadd (%p7336_p7), [#allocation3], 4294966144 }
  0x6e   : > { %5798 = dma.done.wait (%p7337_p1), [#allocation5], 144   ;;  %p7338_p2 = pmov %p7335_p0 }
  0x6f   : > { %p7339_p3 = pmov %p7335_p0 }
  0x70   : > { %5800 = vsyncadd (%p7338_p2), [#allocation5], 4294967152 }
  0x71   : > { %5802 = dma.done.wait (%p7339_p3), [#allocation8], 16   ;;  %p7340_p5 = pmov %p7335_p0 }
  0x72   : > { %p270_p4 = scmp.lt.s32.totalorder %s5851_s21, 1  ;;  %v5467_v0 = vld [vmem:[#allocation2 + $0x18] sm:$0xff]   ;;  %v5468_v1 = vld [vmem:[#allocation2] sm:$0xff]   ;;  %vm823_vm0 = vcmask 130048   ;;  %v5472_v5 = vld [vmem:[#allocation2 + $0x30] sm:$0xff]   ;;  %vm2906_vm1 = vcmask 1046528  }
  0x73   : > { %5804 = vsyncadd (%p7340_p5), [#allocation8], 4294967280  ;;  %4883 = vmatprep.subr.bf16.mxu1 %v5467_v0  ;;  %4917 = vmatprep.subr.bf16.mxu0 %v5468_v1  ;;  %v5487_v11 = vld [vmem:[#allocation2 + $0x20] sm:$0xff]   ;;  %v6019_v14 = vld [vmem:[#allocation2 + $0x28] sm:$0xff]   ;;  %vm1823_vm2 = vsmask.f32 7424 }
  0x74   : > { %s7370_s21 = smov (!%p270_p4, %s5851_s21), 1  ;;  %4884 = vmatpush3.bf16.msra.mxu1 %v5467_v0  ;;  %4918 = vmatpush3.bf16.msra.mxu0 %v5468_v1  ;;  %v6076_v42 = vld [vmem:[#allocation2 + $0x8] sm:$0xff]  }
  0x75   : > { %s5415_s22 = smul.u32 148, %s7370_s21  ;;  %4951 = vmatprep.subr.bf16.mxu0 %v5472_v5  ;;  %4985 = vmatprep.subr.bf16.mxu1 %v5487_v11  ;;  %s4712_s14 = sshll.u32 %s7370_s21, 8 }
  0x76   : > { %s7254_s17 = scalar_lea.vmem %s7328_s5, %s4712_s14 }
  0x77   : > { %s5993_s10 = scalar_lea.vmem %s7323_s0, %s5415_s22 }
  0x78   : > { %v5469_v2 = vld [vmem:[%s5993_s10 + $0x8] sm:$0xff]   ;;  %v5470_v3 = vld [vmem:[%s5993_s10] sm:$0xff]   ;;  %v5471_v4 = vld [vmem:[%s5993_s10 + $0x10] sm:$0xff]  }
  0x79   : > { %4885 = vmatprep.mubr.msk.bf16.mxu1 %vm823_vm0, %v5469_v2  ;;  %4919 = vmatprep.mubr.msk.bf16.mxu0 %vm823_vm0, %v5470_v3  ;;  %v5473_v6 = vld [vmem:[%s5993_s10 + $0x18] sm:$0xff]   ;;  %v5474_v7 = vld [vmem:[%s5993_s10 + $0x20] sm:$0xff]   ;;  %v5475_v8 = vld [vmem:[%s5993_s10 + $0x28] sm:$0xff]  }
  0x7a   : > { %4886 = vmatmul.mubr.msk.bf16.vlgmr.msra.gmra.mrb[0].mxu1 %vm823_vm0, %v5471_v4  ;;  %4920 = vmatmul.mubr.msk.bf16.vlgmr.msra.gmra.mrb[0].mxu0 %vm823_vm0, %v5469_v2  ;;  %v5476_v9 = vld [vmem:[%s5993_s10 + $0x30] sm:$0xff]   ;;  %v5477_v10 = vld [vmem:[%s5993_s10 + $0x38] sm:$0xff]   ;;  %v5478_v12 = vld [vmem:[%s5993_s10 + $0x40] sm:$0xff]  }
  0x7b   : > { %4952 = vmatpush3.bf16.msra.mxu0 %v5472_v5  ;;  %4889 = vmatprep.mubr.msk.bf16.mxu1 %vm823_vm0, %v5473_v6  ;;  %v5479_v13 = vld [vmem:[%s5993_s10 + $0x48] sm:$0xff]   ;;  %v5490_v15 = vld [vmem:[%s5993_s10 + $0x10] sm:$0xff]   ;;  %v6029_v17 = vld [vmem:[%s5993_s10 + $0x18] sm:$0xff]  }
  0x7c   : > { %4923 = vmatprep.mubr.msk.bf16.mxu0 %vm823_vm0, %v5471_v4  ;;  %4986 = vmatpush3.bf16.msra.mxu1 %v5487_v11  ;;  %v5480_v16 = vld [vmem:[%s5993_s10 + $0x50] sm:$0xff]   ;;  %v6031_v18 = vrot.slane %v5490_v15, 1  ;;  %v5481_v19 = vld [vmem:[%s5993_s10 + $0x58] sm:$0xff]   ;;  %v2910_v20 = vrot.slane %v6029_v17, 1  ;;  %v1700_v22 = vld [vmem:[%s5993_s10 + $0x8] sm:$0xf] }
  0x7d   : > { %5087 = vmatprep.subr.bf16.mxu0 %v6019_v14  ;;  %v1701_v23 = vld [vmem:[%s5993_s10 + $0xc] sm:$0xf]  ;;  %v6046_v24 = vld [vmem:[%s5993_s10 + $0x20] sm:$0xff]   ;;  %v5484_v31 = vld [vmem:[%s5993_s10 + $0x70] sm:$0xff]   ;;  %v1832_v35 = vshll.u32 %v5490_v15, 16  ;;  %v1836_v38 = vshrl.u32 %v5490_v15, 16  ;;  %5019 = vmatprep.subr.bf16.mxu1 %v6076_v42 }
  0x7e   : > { %v6038_v21 = vsel %vm2906_vm1, %v6031_v18, %v2910_v20  ;;  %v5482_v25 = vld [vmem:[%s5993_s10 + $0x60] sm:$0xff]   ;;  %v5483_v26 = vld [vmem:[%s5993_s10 + $0x68] sm:$0xff]   ;;  %v6050_v27 = vcombine.low %v1700_v22, %v1701_v23  ;;  %v2912_v28 = vrot.slane %v6046_v24, 1  ;;  %v5485_v32 = vld [vmem:[%s5993_s10 + $0x78] sm:$0xff]   ;;  %v1840_v39 = vshll.u32 %v6029_v17, 16 }
  0x7f   : > { %v6067_v36 = vld [vmem:[%s5993_s10 + $0x28] sm:$0xff]   ;;  %v1834_v41 = vrot.slane %v1832_v35, 1  ;;  %v5486_v44 = vld [vmem:[%s5993_s10 + $0x80] sm:$0xff]   ;;  %v1848_v45 = vshll.u32 %v6046_v24, 16  ;;  %v6084_v46 = vld [vmem:[%s5993_s10 + $0x30] sm:$0xff]   ;;  %v1844_v49 = vshrl.u32 %v6029_v17, 16 }
  0x80   : > { %v6054_v29 = vsel %vm2906_vm1, %v2910_v20, %v2912_v28  ;;  %v1827_v30 = vshll.u32 %v6050_v27, 16  ;;  %v1825_v33 = vshrl.u32 %v6050_v27, 16  ;;  %v2914_v37 = vrot.slane %v6067_v36, 1  ;;  %v5488_v47 = vld [vmem:[%s5993_s10 + $0x10] sm:$0xff]   ;;  %v6091_v51 = vld [vmem:[%s5993_s10 + $0x38] sm:$0xff]   ;;  %v6097_v54 = vld [vmem:[%s5993_s10 + $0x40] sm:$0xff]  }
  0x81   : > { %v1842_v48 = vrot.slane %v1840_v39, 1  ;;  %v1852_v50 = vshrl.u32 %v6046_v24, 16  ;;  %v1838_v53 = vor.u32 %v1836_v38, %v1834_v41  ;;  %v2899_v55 = vld [vmem:[%s5993_s10 + $0x8] sm:$0xe]  ;;  %v2916_v56 = vrot.slane %v6084_v46, 1  ;;  %v6109_v63 = vld [vmem:[%s5993_s10 + $0x50] sm:$0xff]  }
  0x82   : > { %4890 = vmatmul.mubr.msk.bf16.gmra.mrb[4].mxu1 %vm823_vm0, %v5474_v7  ;;  %4924 = vmatmul.mubr.msk.bf16.gmra.mrb[4].mxu0 %vm823_vm0, %v5473_v6  ;;  %v6064_v34 = vrot.slane %v1827_v30, 1  ;;  %v6079_v43 = vsel %vm2906_vm1, %v2912_v28, %v2914_v37  ;;  %v6102_v57 = vld [vmem:[%s5993_s10 + $0x48] sm:$0xff]   ;;  %v4605_v58 = vcombine.low %v2899_v55, %v1701_v23  ;;  %v2918_v59 = vrot.slane %v6091_v51, 1  ;;  %v6112_v0 = vld [vmem:[%s5993_s10 + $0x58] sm:$0xff]   ;;  %v6121_v2 = vld [vmem:[%s5993_s10 + $0x60] sm:$0xff]  }
  0x83   : > { %4893 = vmatprep.mubr.msk.bf16.mxu1 %vm823_vm0, %v5475_v8  ;;  %4927 = vmatprep.mubr.msk.bf16.mxu0 %vm823_vm0, %v5474_v7  ;;  %v1850_v60 = vrot.slane %v1848_v45, 1  ;;  %v1856_v61 = vshll.u32 %v6067_v36, 16  ;;  %v1860_v62 = vshrl.u32 %v6067_v36, 16  ;;  %v6115_v1 = vsel %vm2906_vm1, %v2914_v37, %v2916_v56  ;;  %v6142_v15 = vld [vmem:[%s5993_s10 + $0x78] sm:$0xff]   ;;  %v2895_v37 = vld [vmem:[%s5993_s10] sm:$0xe] }
  0x84   : > { %v1830_v40 = vor.u32 %v6064_v34, %v1825_v33  ;;  %v2907_v3 = vrot.slane %v4605_v58, 1  ;;  %v6124_v4 = vsel %vm2906_vm1, %v2916_v56, %v2918_v59  ;;  %v2920_v5 = vrot.slane %v6097_v54, 1  ;;  %v6148_v17 = vld [vmem:[%s5993_s10 + $0x88] ss:$0 sps:$4 sm:$0x11]   ;;  %v6182_v39 = vld [vmem:[#allocation2 + $0x10] sm:$0xff]  }
  0x85   : > { %v2922_v6 = vrot.slane %v6102_v57, 1  ;;  %v6130_v7 = vsel %vm1823_vm2, %v1838_v53, %v1842_v48  ;;  %v2924_v11 = vrot.slane %v6109_v63, 1  ;;  %v2928_v23 = vrot.slane %v6121_v2, 1  ;;  %v6207_v55 = vld [vmem:[#allocation2 + $0x38] sm:$0xff]  }
  0x86   : > { %v6094_v52 = vsel %vm1823_vm2, %v1830_v40, %v1834_v41  ;;  %v6155_v20 = vsel %vm2906_vm1, %v2918_v59, %v2920_v5  ;;  %v6175_v35 = vrot.slane %v6142_v15, 1  ;;  %v2938_v41 = vrot.slane %v6148_v17, 1 }
  0x87   : > { %v6158_v22 = vsel %vm2906_vm1, %v2920_v5, %v2922_v6  ;;  %v1854_v56 = vor.u32 %v1852_v50, %v1850_v60  ;;  %v3159_v59 = vrot.slane %v6050_v27, 1  ;;  %v5496_v50 = vld [vmem:[%s5993_s10 + $0x28] sm:$0xff]   ;;  %v5498_v27 = vld [vmem:[%s5993_s10 + $0x30] sm:$0xff]  }
  0x89   : > { %v6222_v24 = vsel %vm2906_vm1, %v3159_v59, %v6031_v18 }
  0x8a   : > { %4894 = vmatmul.mubr.msk.bf16.gmra.mrb[8].mxu1 %vm823_vm0, %v5476_v9  ;;  %4928 = vmatmul.mubr.msk.bf16.gmra.mrb[8].mxu0 %vm823_vm0, %v5475_v8  ;;  %v1846_v8 = vor.u32 %v1844_v49, %v1842_v48  ;;  %v1858_v48 = vrot.slane %v1856_v61, 1  ;;  %v6202_v49 = vld [vmem:[%s5993_s10 + $0x4] sm:$0xf] }
  0x8b   : > { %4897 = vmatprep.mubr.msk.bf16.mxu1 %vm823_vm0, %v5477_v10  ;;  %4931 = vmatprep.mubr.msk.bf16.mxu0 %vm823_vm0, %v5476_v9  ;;  %v6133_v9 = vld [vmem:[%s5993_s10 + $0x68] sm:$0xff]   ;;  %v4623_v58 = vcombine.low %v2895_v37, %v6202_v49  ;;  %v1896_v37 = vshll.u32 %v6109_v63, 16 }
  0x8c   : > { %v2930_v30 = vrot.slane %v6133_v9, 1  ;;  %v6180_v38 = vsel %vm1823_vm2, %v1846_v8, %v1850_v60  ;;  %v1862_v61 = vor.u32 %v1860_v62, %v1858_v48  ;;  %v1872_v60 = vshll.u32 %v6091_v51, 16 }
  0x8d   : > { %v3158_v5 = vrot.slane %v4623_v58, 1  ;;  %v1880_v8 = vshll.u32 %v6097_v54, 16  ;;  %v1904_v58 = vshll.u32 %v6112_v0, 16 }
  0x8e   : > { %v6185_v40 = vsel %vm2906_vm1, %v2928_v23, %v2930_v30 }
  0x8f   : > { %v6233_v62 = vsel %vm2906_vm1, %v3158_v5, %v3159_v59  ;;  %v5504_v59 = vld [vmem:[%s5993_s10 + $0x48] sm:$0xff]  }
  0x92   : > { %4898 = vmatmul.mubr.msk.bf16.gmra.mrb[12].mxu1 %vm823_vm0, %v5478_v12  ;;  %4932 = vmatmul.mubr.msk.bf16.gmra.mrb[12].mxu0 %vm823_vm0, %v5477_v10  ;;  %v6136_v10 = vld [vmem:[%s5993_s10 + $0x70] sm:$0xff]  }
  0x93   : > { %4901 = vmatprep.mubr.msk.bf16.mxu1 %vm823_vm0, %v5479_v13  ;;  %4935 = vmatprep.mubr.msk.bf16.mxu0 %vm823_vm0, %v5478_v12  ;;  %v2926_v12 = vrot.slane %v6112_v0, 1  ;;  %v2932_v33 = vrot.slane %v6136_v10, 1 }
  0x95   : > { %v6166_v28 = vsel %vm2906_vm1, %v2924_v11, %v2926_v12  ;;  %v6193_v45 = vsel %vm2906_vm1, %v2932_v33, %v6175_v35 }
  0x9a   : > { %4902 = vmatmul.mubr.msk.bf16.gmra.mrb[16].mxu1 %vm823_vm0, %v5480_v16  ;;  %4936 = vmatmul.mubr.msk.bf16.gmra.mrb[16].mxu0 %vm823_vm0, %v5479_v13  ;;  %v5491_v13 = vld [vmem:[%s5993_s10 + $0x18] sm:$0xff]  }
  0x9b   : > { %4905 = vmatprep.mubr.msk.bf16.mxu1 %vm823_vm0, %v5481_v19  ;;  %4939 = vmatprep.mubr.msk.bf16.mxu0 %vm823_vm0, %v5480_v16  ;;  %v6145_v16 = vld [vmem:[%s5993_s10 + $0x80] sm:$0xff]  }
  0x9c   : > { %v2936_v36 = vrot.slane %v6145_v16, 1 }
  0x9e   : > { %v6205_v53 = vsel %vm2906_vm1, %v2936_v36, %v2938_v41 }
  0xa2   : > { %4906 = vmatmul.mubr.msk.bf16.gmra.mrb[20].mxu1 %vm823_vm0, %v5482_v25  ;;  %4940 = vmatmul.mubr.msk.bf16.gmra.mrb[20].mxu0 %vm823_vm0, %v5481_v19  ;;  %v6152_v19 = vsel %vm2906_vm1, %v2907_v3, %v6031_v18  ;;  %v1876_v18 = vshrl.u32 %v6091_v51, 16  ;;  %v1884_v51 = vshrl.u32 %v6097_v54, 16 }
  0xa3   : > { %4909 = vmatprep.mubr.msk.bf16.mxu1 %vm823_vm0, %v5483_v26  ;;  %4943 = vmatprep.mubr.msk.bf16.mxu0 %vm823_vm0, %v5482_v25  ;;  %v1864_v25 = vshll.u32 %v6084_v46, 16 }
  0xa5   : > { %v1866_v3 = vrot.slane %v1864_v25, 1  ;;  %v5502_v25 = vld [vmem:[%s5993_s10 + $0x40] sm:$0xff]  }
  0xaa   : > { %4910 = vmatmul.mubr.msk.bf16.gmra.mrb[24].mxu1 %vm823_vm0, %v5484_v31  ;;  %4944 = vmatmul.mubr.msk.bf16.gmra.mrb[24].mxu0 %vm823_vm0, %v5483_v26  ;;  %v6163_v26 = vsel %vm2906_vm1, %v2922_v6, %v2924_v11  ;;  %v6236_v6 = vsel %vm1823_vm2, %v1862_v61, %v1866_v3  ;;  %v1874_v11 = vrot.slane %v1872_v60, 1  ;;  %v1900_v61 = vshrl.u32 %v6109_v63, 16 }
  0xab   : > { %4913 = vmatprep.mubr.msk.bf16.mxu1 %vm823_vm0, %v5485_v32  ;;  %4947 = vmatprep.mubr.msk.bf16.mxu0 %vm823_vm0, %v5484_v31  ;;  %v5494_v31 = vld [vmem:[%s5993_s10 + $0x20] sm:$0xff]   ;;  %v1912_v60 = vshll.u32 %v6121_v2, 16 }
  0xb2   : > { %4914 = vmatmul.mubr.msk.bf16.gmra.mrb[28].mxu1 %vm823_vm0, %v5486_v44  ;;  %4948 = vmatmul.mubr.msk.bf16.gmra.mrb[28].mxu0 %vm823_vm0, %v5485_v32  ;;  %v6171_v32 = vsel %vm2906_vm1, %v2926_v12, %v2928_v23  ;;  %v6189_v44 = vsel %vm2906_vm1, %v2930_v30, %v2932_v33  ;;  %v1878_v12 = vor.u32 %v1876_v18, %v1874_v11  ;;  %v5500_v23 = vld [vmem:[%s5993_s10 + $0x38] sm:$0xff]   ;;  %v1888_v30 = vshll.u32 %v6102_v57, 16 }
  0xb3   : > { %4987 = vmatprep.mubr.msk.bf16.mxu1 %vm823_vm0, %v6094_v52  ;;  %4953 = vmatprep.mubr.msk.bf16.mxu0 %vm823_vm0, %v5488_v47  ;;  %v6197_v47 = vsel %vm2906_vm1, %v6175_v35, %v2936_v36  ;;  %v1892_v36 = vshrl.u32 %v6102_v57, 16  ;;  %v1914_v18 = vrot.slane %v1912_v60, 1 }
  0xb4   : > { %v1890_v41 = vrot.slane %v1888_v30, 1 }
  0xba   : > { %4988 = vmatmul.mubr.msk.bf16.vlgmr.msra.gmra.mrb[32].mxu1 %vm823_vm0, %v6130_v7  ;;  %4954 = vmatmul.mubr.msk.bf16.vlgmr.msra.gmra.mrb[0].mxu0 %vm823_vm0, %v5491_v13  ;;  %v1882_v13 = vrot.slane %v1880_v8, 1  ;;  %v1920_v8 = vshll.u32 %v6133_v9, 16 }
  0xbb   : > { %4991 = vmatprep.mubr.msk.bf16.mxu1 %vm823_vm0, %v6180_v38  ;;  %5088 = vmatpush3.bf16.msra.mxu0 %v6019_v14  ;;  %v6228_v14 = vsel %vm1823_vm2, %v1854_v56, %v1858_v48  ;;  %v1894_v48 = vor.u32 %v1892_v36, %v1890_v41  ;;  %v1898_v56 = vrot.slane %v1896_v37, 1  ;;  %v1698_v37 = vld [vmem:[%s5993_s10] sm:$0xf] }
  0xbc   : > { %4957 = vmatprep.mubr.msk.bf16.mxu0 %vm823_vm0, %v5494_v31  ;;  %5020 = vmatpush3.bf16.msra.mxu1 %v6076_v42  ;;  %v1868_v42 = vshrl.u32 %v6084_v46, 16  ;;  %v6254_v33 = vsel %vm1823_vm2, %v1878_v12, %v1882_v13  ;;  %v1886_v54 = vor.u32 %v1884_v51, %v1882_v13  ;;  %v5510_v12 = vld [vmem:[%s5993_s10 + $0x60] sm:$0xff]   ;;  %v1922_v51 = vrot.slane %v1920_v8, 1 }
  0xbd   : > { %5121 = vmatprep.subr.bf16.mxu0 %v6182_v39  ;;  %5053 = vmatprep.subr.bf16.mxu1 %v6207_v55  ;;  %v6272_v5 = vsel %vm1823_vm2, %v1894_v48, %v1898_v56  ;;  %v1932_v48 = vshrl.u32 %v6136_v10, 16  ;;  %v5518_v8 = vld [vmem:[%s5993_s10 + $0x80] sm:$0xff]  }
  0xbe   : > { %v1870_v46 = vor.u32 %v1868_v42, %v1866_v3  ;;  %v6267_v57 = vsel %vm1823_vm2, %v1886_v54, %v1890_v41  ;;  %v5506_v3 = vld [vmem:[%s5993_s10 + $0x50] sm:$0xff]   ;;  %v1902_v42 = vor.u32 %v1900_v61, %v1898_v56  ;;  %v1936_v41 = vshll.u32 %v6142_v15, 16 }
  0xbf   : > { %v5514_v56 = vld [vmem:[%s5993_s10 + $0x70] sm:$0xff]   ;;  %v1944_v61 = vshll.u32 %v6145_v16, 16 }
  0xc0   : > { %v6251_v31 = vsel %vm1823_vm2, %v1870_v46, %v1874_v11  ;;  %v1916_v46 = vshrl.u32 %v6121_v2, 16 }
  0xc2   : > { %4992 = vmatmul.mubr.msk.bf16.gmra.mrb[36].mxu1 %vm823_vm0, %v6228_v14  ;;  %4958 = vmatmul.mubr.msk.bf16.gmra.mrb[4].mxu0 %vm823_vm0, %v5496_v50  ;;  %v1908_v50 = vshrl.u32 %v6112_v0, 16  ;;  %v5508_v0 = vld [vmem:[%s5993_s10 + $0x58] sm:$0xff]   ;;  %v1918_v30 = vor.u32 %v1916_v46, %v1914_v18 }
  0xc3   : > { %4995 = vmatprep.mubr.msk.bf16.mxu1 %vm823_vm0, %v6236_v6  ;;  %4961 = vmatprep.mubr.msk.bf16.mxu0 %vm823_vm0, %v5498_v27  ;;  %v1906_v27 = vrot.slane %v1904_v58, 1 }
  0xc4   : > { %v6304_v54 = vsel %vm1823_vm2, %v1918_v30, %v1922_v51 }
  0xc5   : > { %v1910_v63 = vor.u32 %v1908_v50, %v1906_v27  ;;  %v6285_v11 = vsel %vm1823_vm2, %v1902_v42, %v1906_v27  ;;  %v1938_v50 = vrot.slane %v1936_v41, 1  ;;  %v5516_v42 = vld [vmem:[%s5993_s10 + $0x78] sm:$0xff]   ;;  %v6349_v41 = vld [vmem:[%s5993_s10 + $0x20] sm:$0xff]  }
  0xc7   : > { %v6290_v13 = vsel %vm1823_vm2, %v1910_v63, %v1914_v18  ;;  %v1948_v63 = vshrl.u32 %v6145_v16, 16  ;;  %v1952_v18 = vshll.u32 %v6148_v17, 16 }
  0xc9   : > { %v1954_v16 = vrot.slane %v1952_v18, 1 }
  0xca   : > { %4996 = vmatmul.mubr.msk.bf16.gmra.mrb[40].mxu1 %vm823_vm0, %v6251_v31  ;;  %4962 = vmatmul.mubr.msk.bf16.gmra.mrb[8].mxu0 %vm823_vm0, %v5500_v23  ;;  %v1924_v23 = vshrl.u32 %v6133_v9, 16  ;;  %v5512_v9 = vld [vmem:[%s5993_s10 + $0x68] sm:$0xff]  }
  0xcb   : > { %4999 = vmatprep.mubr.msk.bf16.mxu1 %vm823_vm0, %v6254_v33  ;;  %4965 = vmatprep.mubr.msk.bf16.mxu0 %vm823_vm0, %v5502_v25  ;;  %v1928_v25 = vshll.u32 %v6136_v10, 16 }
  0xcc   : > { %v1926_v2 = vor.u32 %v1924_v23, %v1922_v51  ;;  %v5520_v51 = vld [vmem:[%s5993_s10 + $0x88] sm:$0xff]  }
  0xcd   : > { %v1930_v36 = vrot.slane %v1928_v25, 1  ;;  %v6337_v25 = vld [vmem:[%s5993_s10 + $0x80] ss:$0 sps:$4 sm:$0x11]  }
  0xcf   : > { %v6309_v58 = vsel %vm1823_vm2, %v1926_v2, %v1930_v36  ;;  %v1934_v10 = vor.u32 %v1932_v48, %v1930_v36  ;;  %v3162_v36 = vrot.slane %v6337_v25, 1  ;;  %v2366_v48 = vld [vmem:[%s5993_s10 + $0x14] sm:$0xf] }
  0xd2   : > { %5000 = vmatmul.mubr.msk.bf16.gmra.mrb[44].mxu1 %vm823_vm0, %v6267_v57  ;;  %4966 = vmatmul.mubr.msk.bf16.gmra.mrb[12].mxu0 %vm823_vm0, %v5504_v59  ;;  %v1940_v59 = vshrl.u32 %v6142_v15, 16  ;;  %v1946_v15 = vrot.slane %v1944_v61, 1  ;;  %v3350_v61 = vrot.slane %v6349_v41, 1 }
  0xd3   : > { %5003 = vmatprep.mubr.msk.bf16.mxu1 %vm823_vm0, %v6272_v5  ;;  %4969 = vmatprep.mubr.msk.bf16.mxu0 %vm823_vm0, %v5506_v3  ;;  %v4552_v3 = vcombine.low %v1698_v37, %v6202_v49  ;;  %v6324_v49 = vsel %vm1823_vm2, %v1934_v10, %v1938_v50  ;;  %v6345_v37 = vld [vmem:[%s5993_s10 + $0x18] sm:$0xff]   ;;  %v6369_v10 = vld [vmem:[#allocation2 + $0x40] sm:$0xff]  }
  0xd4   : > { %v6320_v60 = vor.u32 %v1940_v59, %v1938_v50  ;;  %v1950_v23 = vor.u32 %v1948_v63, %v1946_v15 }
  0xd5   : > { %v2182_v27 = vshll.u32 %v4552_v3, 16  ;;  %v2180_v46 = vshrl.u32 %v4552_v3, 16 }
  0xd6   : > { %v1955_v30 = vsel %vm1823_vm2, %v1950_v23, %v1954_v16  ;;  %v2496_v23 = vshrl.u32 %v6345_v37, 16  ;;  %v2504_v16 = vshrl.u32 %v6349_v41, 16 }
  0xda   : > { %5004 = vmatmul.mubr.msk.bf16.gmra.mrb[48].mxu1 %vm823_vm0, %v6285_v11  ;;  %4970 = vmatmul.mubr.msk.bf16.gmra.mrb[16].mxu0 %vm823_vm0, %v5508_v0  ;;  %v1947_v0 = vsel %vm1823_vm2, %v6320_v60, %v1946_v15  ;;  %v6372_v15 = vld [vmem:[%s5993_s10 + $0x28] sm:$0xff]  }
  0xdb   : > { %5007 = vmatprep.mubr.msk.bf16.mxu1 %vm823_vm0, %v6290_v13  ;;  %4973 = vmatprep.mubr.msk.bf16.mxu0 %vm823_vm0, %v5510_v12  ;;  %v2184_v12 = vrot.slane %v2182_v27, 1  ;;  %v3352_v27 = vrot.slane %v6372_v15, 1 }
  0xdd   : > { %v2185_v17 = vor.u32 %v2184_v12, %v2180_v46  ;;  %v2500_v46 = vshll.u32 %v6349_v41, 16 }
  0xdf   : > { %v2186_v2 = vsel %vm1823_vm2, %v2185_v17, %v6064_v34  ;;  %v3340_v34 = vld [vmem:[%s5993_s10 + $0x10] sm:$0xe]  ;;  %v2508_v17 = vshll.u32 %v6372_v15, 16 }
  0xe0   : > { %v4641_v59 = vcombine.low %v3340_v34, %v2366_v48 }
  0xe2   : > { %5008 = vmatmul.mubr.msk.bf16.gmra.mrb[52].mxu1 %vm823_vm0, %v6304_v54  ;;  %4974 = vmatmul.mubr.msk.bf16.gmra.mrb[20].mxu0 %vm823_vm0, %v5512_v9  ;;  %v6353_v9 = vsel %vm2906_vm1, %v6175_v35, %v3162_v36  ;;  %v3347_v3 = vrot.slane %v4641_v59, 1 }
  0xe3   : > { %5011 = vmatprep.mubr.msk.bf16.mxu1 %vm823_vm0, %v6309_v58  ;;  %4977 = vmatprep.mubr.msk.bf16.mxu0 %vm823_vm0, %v5514_v56  ;;  %v3348_v56 = vrot.slane %v6345_v37, 1 }
  0xe5   : > { %v6364_v50 = vsel %vm2906_vm1, %v3348_v56, %v3350_v61  ;;  %v6367_v35 = vsel %vm2906_vm1, %v3347_v3, %v3348_v56  ;;  %v6490_v56 = vld [vmem:[%s5993_s10 + $0x48] sm:$0xff]  }
  0xea   : > { %5012 = vmatmul.mubr.msk.bf16.gmra.mrb[56].mxu1 %vm823_vm0, %v6324_v49  ;;  %4978 = vmatmul.mubr.msk.bf16.gmra.mrb[24].mxu0 %vm823_vm0, %v5516_v42 }
  0xeb   : > { %5015 = vmatprep.mubr.msk.bf16.mxu1 %vm823_vm0, %v1947_v0  ;;  %4981 = vmatprep.mubr.msk.bf16.mxu0 %vm823_vm0, %v5518_v8 }
  0xf2   : > { %5016 = vmatmul.mubr.msk.bf16.gmra.mrb[60].mxu1 %vm823_vm0, %v1955_v30  ;;  %4982 = vmatmul.mubr.msk.bf16.gmra.mrb[28].mxu0 %vm823_vm0, %v5520_v51 }
  0xf3   : > { %5021 = vmatprep.mubr.msk.bf16.mxu1 %vm823_vm0, %v2186_v2  ;;  %5089 = vmatprep.mubr.msk.bf16.mxu0 %vm823_vm0, %v6152_v19  ;;  %v6377_v19 = vld [vmem:[%s5993_s10 + $0x30] sm:$0xff]   ;;  %v2512_v2 = vshrl.u32 %v6372_v15, 16 }
  0xf4   : > { %v3354_v42 = vrot.slane %v6377_v19, 1  ;;  %v2516_v51 = vshll.u32 %v6377_v19, 16 }
  0xf6   : > { %v6394_v63 = vsel %vm2906_vm1, %v3352_v27, %v3354_v42  ;;  %v2518_v41 = vrot.slane %v2516_v51, 1 }
  0xfa   : > { %5022 = vmatmul.mubr.msk.bf16.vlgmr.msra.gmra.mrb[32].mxu1 %vm823_vm0, %v6094_v52  ;;  %5090 = vmatmul.mubr.msk.bf16.vlgmr.msra.gmra.mrb[32].mxu0 %vm823_vm0, %v6038_v21  ;;  %v6391_v52 = vsel %vm2906_vm1, %v3350_v61, %v3352_v27 }
  0xfb   : > { %5025 = vmatprep.mubr.msk.bf16.mxu1 %vm823_vm0, %v6130_v7  ;;  %5122 = vmatpush3.bf16.msra.mxu0 %v6182_v39  ;;  %v6397_v7 = vld [vmem:[%s5993_s10 + $0x38] sm:$0xff]   ;;  %v6402_v39 = vld [vmem:[%s5993_s10 + $0x40] sm:$0xff]  }
  0xfc   : > { %5093 = vmatprep.mubr.msk.bf16.mxu0 %vm823_vm0, %v6054_v29  ;;  %5054 = vmatpush3.bf16.msra.mxu1 %v6207_v55  ;;  %v3356_v55 = vrot.slane %v6397_v7, 1  ;;  %v3358_v18 = vrot.slane %v6402_v39, 1  ;;  %v2532_v59 = vshll.u32 %v6402_v39, 16  ;;  %v2536_v15 = vshrl.u32 %v6402_v39, 16 }
  0xfd   : > { %5155 = vmatprep.subr.bf16.mxu0 %v6369_v10 }
  0xfe   : > { %v6413_v8 = vsel %vm2906_vm1, %v3354_v42, %v3356_v55 }
 0x102   : > { %5026 = vmatmul.mubr.msk.bf16.gmra.mrb[36].mxu1 %vm823_vm0, %v6180_v38  ;;  %5094 = vmatmul.mubr.msk.bf16.gmra.mrb[36].mxu0 %vm823_vm0, %v6079_v43  ;;  %v6418_v38 = vsel %vm2906_vm1, %v3356_v55, %v3358_v18  ;;  %v6508_v55 = vld [vmem:[%s5993_s10 + $0x58] sm:$0xff]  }
 0x103   : > { %5029 = vmatprep.mubr.msk.bf16.mxu1 %vm823_vm0, %v6228_v14  ;;  %5097 = vmatprep.mubr.msk.bf16.mxu0 %vm823_vm0, %v6115_v1  ;;  %v2365_v14 = vld [vmem:[%s5993_s10 + $0x10] sm:$0xf] }
 0x10a   : > { %5030 = vmatmul.mubr.msk.bf16.gmra.mrb[40].mxu1 %vm823_vm0, %v6236_v6  ;;  %5098 = vmatmul.mubr.msk.bf16.gmra.mrb[40].mxu0 %vm823_vm0, %v6124_v4  ;;  %v4571_v6 = vcombine.low %v2365_v14, %v2366_v48 }
 0x10b   : > { %5033 = vmatprep.mubr.msk.bf16.mxu1 %vm823_vm0, %v6251_v31  ;;  %5101 = vmatprep.mubr.msk.bf16.mxu0 %vm823_vm0, %v6155_v20 }
 0x10c   : > { %v2487_v31 = vshll.u32 %v4571_v6, 16 }
 0x112   : > { %5034 = vmatmul.mubr.msk.bf16.gmra.mrb[44].mxu1 %vm823_vm0, %v6254_v33  ;;  %5102 = vmatmul.mubr.msk.bf16.gmra.mrb[44].mxu0 %vm823_vm0, %v6158_v22  ;;  %v2188_v33 = vshll.u32 %v6337_v25, 16  ;;  %v2510_v25 = vrot.slane %v2508_v17, 1 }
 0x113   : > { %5037 = vmatprep.mubr.msk.bf16.mxu1 %vm823_vm0, %v6267_v57  ;;  %5105 = vmatprep.mubr.msk.bf16.mxu0 %vm823_vm0, %v6163_v26  ;;  %v2485_v57 = vshrl.u32 %v4571_v6, 16 }
 0x11a   : > { %5038 = vmatmul.mubr.msk.bf16.gmra.mrb[48].mxu1 %vm823_vm0, %v6272_v5  ;;  %5106 = vmatmul.mubr.msk.bf16.gmra.mrb[48].mxu0 %vm823_vm0, %v6166_v28  ;;  %v2489_v5 = vrot.slane %v2487_v31, 1  ;;  %v2544_v31 = vshrl.u32 %v6490_v56, 16 }
 0x11b   : > { %5041 = vmatprep.mubr.msk.bf16.mxu1 %vm823_vm0, %v6285_v11  ;;  %5109 = vmatprep.mubr.msk.bf16.mxu0 %vm823_vm0, %v6171_v32  ;;  %v2492_v11 = vshll.u32 %v6345_v37, 16  ;;  %v2520_v37 = vshrl.u32 %v6377_v19, 16  ;;  %v6500_v19 = vld [vmem:[%s5993_s10 + $0x50] sm:$0xff]  }
 0x11c   : > { %v2548_v14 = vshll.u32 %v6500_v19, 16 }
 0x11d   : > { %v2494_v0 = vrot.slane %v2492_v11, 1  ;;  %v2522_v48 = vor.u32 %v2520_v37, %v2518_v41 }
 0x122   : > { %5042 = vmatmul.mubr.msk.bf16.gmra.mrb[52].mxu1 %vm823_vm0, %v6290_v13  ;;  %5110 = vmatmul.mubr.msk.bf16.gmra.mrb[52].mxu0 %vm823_vm0, %v6185_v40  ;;  %v2190_v13 = vrot.slane %v2188_v33, 1 }
 0x123   : > { %5045 = vmatprep.mubr.msk.bf16.mxu1 %vm823_vm0, %v6304_v54  ;;  %5113 = vmatprep.mubr.msk.bf16.mxu0 %vm823_vm0, %v6189_v44  ;;  %v2490_v54 = vor.u32 %v2489_v5, %v2485_v57  ;;  %v2556_v57 = vshll.u32 %v6508_v55, 16  ;;  %v6518_v5 = vld [vmem:[%s5993_s10 + $0x60] sm:$0xff]  }
 0x124   : > { %v2191_v12 = vsel %vm1823_vm2, %v6320_v60, %v2190_v13  ;;  %v2568_v17 = vshrl.u32 %v6518_v5, 16 }
 0x12a   : > { %5046 = vmatmul.mubr.msk.bf16.gmra.mrb[56].mxu1 %vm823_vm0, %v6309_v58  ;;  %5114 = vmatmul.mubr.msk.bf16.gmra.mrb[56].mxu0 %vm823_vm0, %v6193_v45  ;;  %v2495_v58 = vsel %vm1823_vm2, %v2490_v54, %v2494_v0  ;;  %v2558_v54 = vrot.slane %v2556_v57, 1 }
 0x12b   : > { %5049 = vmatprep.mubr.msk.bf16.mxu1 %vm823_vm0, %v6324_v49  ;;  %5117 = vmatprep.mubr.msk.bf16.mxu0 %vm823_vm0, %v6197_v47  ;;  %v2502_v49 = vrot.slane %v2500_v46, 1  ;;  %v2498_v47 = vor.u32 %v2496_v23, %v2494_v0  ;;  %v6526_v0 = vld [vmem:[%s5993_s10 + $0x68] sm:$0xff]  }
 0x12d   : > { %v2506_v60 = vor.u32 %v2504_v16, %v2502_v49  ;;  %v2503_v30 = vsel %vm1823_vm2, %v2498_v47, %v2502_v49  ;;  %v2572_v49 = vshll.u32 %v6526_v0, 16 }
 0x12f   : > { %v2511_v36 = vsel %vm1823_vm2, %v2506_v60, %v2510_v25 }
 0x132   : > { %5050 = vmatmul.mubr.msk.bf16.gmra.mrb[60].mxu1 %vm823_vm0, %v2191_v12  ;;  %5118 = vmatmul.mubr.msk.bf16.gmra.mrb[60].mxu0 %vm823_vm0, %v6205_v53  ;;  %v2524_v53 = vshll.u32 %v6397_v7, 16  ;;  %v2564_v12 = vshll.u32 %v6518_v5, 16 }
 0x133   : > { %5055 = vmatprep.mubr.msk.bf16.mxu1 %vm823_vm0, %v2495_v58  ;;  %5123 = vmatprep.mubr.msk.bf16.mxu0 %vm823_vm0, %v6233_v62  ;;  %v2514_v62 = vor.u32 %v2512_v2, %v2510_v25  ;;  %v6544_v25 = vld [vmem:[%s5993_s10 + $0x70] sm:$0xff]   ;;  %v2574_v2 = vrot.slane %v2572_v49, 1 }
 0x134   : > { %v2526_v34 = vrot.slane %v2524_v53, 1  ;;  %v2566_v60 = vrot.slane %v2564_v12, 1  ;;  %v2580_v53 = vshll.u32 %v6544_v25, 16 }
 0x135   : > { %v2519_v61 = vsel %vm1823_vm2, %v2514_v62, %v2518_v41 }
 0x136   : > { %v2527_v3 = vsel %vm1823_vm2, %v2522_v48, %v2526_v34 }
 0x13a   : > { %5056 = vmatmul.mubr.msk.bf16.vlgmr.msra.gmra.mrb[32].mxu1 %vm823_vm0, %v2503_v30  ;;  %5124 = vmatmul.mubr.msk.bf16.vlgmr.msra.gmra.mrb[32].mxu0 %vm823_vm0, %v6222_v24  ;;  %v2528_v24 = vshrl.u32 %v6397_v7, 16  ;;  %v2570_v30 = vor.u32 %v2568_v17, %v2566_v60 }
 0x13b   : > { %5059 = vmatprep.mubr.msk.bf16.mxu1 %vm823_vm0, %v2511_v36  ;;  %5156 = vmatpush3.bf16.msra.mxu0 %v6369_v10  ;;  %v2540_v10 = vshll.u32 %v6490_v56, 16  ;;  %v6552_v36 = vld [vmem:[%s5993_s10 + $0x78] sm:$0xff]  }
 0x13c   : > { %5127 = vmatprep.mubr.msk.bf16.mxu0 %vm823_vm0, %v6038_v21  ;;  %v2534_v21 = vrot.slane %v2532_v59, 1  ;;  %v2530_v27 = vor.u32 %v2528_v24, %v2526_v34  ;;  %v2584_v34 = vshrl.u32 %v6544_v25, 16  ;;  %v2588_v59 = vshll.u32 %v6552_v36, 16 }
 0x13d   : > { %v2542_v7 = vrot.slane %v2540_v10, 1  ;;  %v2582_v24 = vrot.slane %v2580_v53, 1 }
 0x13e   : > { %v2538_v42 = vor.u32 %v2536_v15, %v2534_v21  ;;  %v2535_v6 = vsel %vm1823_vm2, %v2530_v27, %v2534_v21  ;;  %v2590_v21 = vrot.slane %v2588_v59, 1  ;;  %v6578_v27 = vld [vmem:[%s5993_s10 + $0x88] sm:$0xff]  }
 0x13f   : > { %v2546_v11 = vor.u32 %v2544_v31, %v2542_v7  ;;  %v2586_v10 = vor.u32 %v2584_v34, %v2582_v24  ;;  %v2608_v17 = vshrl.u32 %v6578_v27, 16 }
 0x140   : > { %v2543_v33 = vsel %vm1823_vm2, %v2538_v42, %v2542_v7 }
 0x142   : > { %5060 = vmatmul.mubr.msk.bf16.gmra.mrb[36].mxu1 %vm823_vm0, %v2519_v61  ;;  %5128 = vmatmul.mubr.msk.bf16.gmra.mrb[36].mxu0 %vm823_vm0, %v6054_v29  ;;  %v2552_v29 = vshrl.u32 %v6500_v19, 16 }
 0x143   : > { %5063 = vmatprep.mubr.msk.bf16.mxu1 %vm823_vm0, %v2527_v3  ;;  %5131 = vmatprep.mubr.msk.bf16.mxu0 %vm823_vm0, %v6079_v43  ;;  %v2550_v43 = vrot.slane %v2548_v14, 1  ;;  %v6570_v3 = vld [vmem:[%s5993_s10 + $0x80] sm:$0xff]  }
 0x144   : > { %v2596_v7 = vshll.u32 %v6570_v3, 16 }
 0x145   : > { %v2554_v13 = vor.u32 %v2552_v29, %v2550_v43  ;;  %v2551_v58 = vsel %vm1823_vm2, %v2546_v11, %v2550_v43  ;;  %v2604_v29 = vshll.u32 %v6578_v27, 16 }
 0x146   : > { %v2598_v43 = vrot.slane %v2596_v7, 1 }
 0x147   : > { %v2606_v12 = vrot.slane %v2604_v29, 1 }
 0x14a   : > { %5064 = vmatmul.mubr.msk.bf16.gmra.mrb[40].mxu1 %vm823_vm0, %v2535_v6  ;;  %5132 = vmatmul.mubr.msk.bf16.gmra.mrb[40].mxu0 %vm823_vm0, %v6115_v1  ;;  %v2560_v1 = vshrl.u32 %v6508_v55, 16 }
 0x14b   : > { %5067 = vmatprep.mubr.msk.bf16.mxu1 %vm823_vm0, %v2543_v33  ;;  %5135 = vmatprep.mubr.msk.bf16.mxu0 %vm823_vm0, %v6124_v4  ;;  %v2559_v4 = vsel %vm1823_vm2, %v2554_v13, %v2558_v54  ;;  %v2591_v33 = vsel %vm1823_vm2, %v2586_v10, %v2590_v21  ;;  %v6599_v13 = vld [vmem:[%s5993_s10 + $0x90] ss:$0 sps:$4 sm:$0x11]   ;;  %v3360_v10 = vrot.slane %v6490_v56, 1 }
 0x14c   : > { %v2562_v51 = vor.u32 %v2560_v1, %v2558_v54 }
 0x14d   : > { %v6528_v46 = vpop.f32.mrb[0].mxu1 }
 0x14e   : > { %v6531_v23 = vpop.f32.mrb[1].mxu1  ;;  %v2567_v62 = vsel %vm1823_vm2, %v2562_v51, %v2566_v60 }
 0x14f   : > { %v6535_v16 = vpop.f32.mrb[2].mxu1 }
 0x150   : > { %v6540_v47 = vpop.f32.mrb[3].mxu1 }
 0x152   : > { %5068 = vmatmul.mubr.msk.bf16.gmra.mrb[44].mxu1 %vm823_vm0, %v2551_v58  ;;  %5136 = vmatmul.mubr.msk.bf16.gmra.mrb[44].mxu0 %vm823_vm0, %v6155_v20  ;;  %v2576_v20 = vshrl.u32 %v6526_v0, 16 }
 0x153   : > { %5071 = vmatprep.mubr.msk.bf16.mxu1 %vm823_vm0, %v2559_v4  ;;  %5139 = vmatprep.mubr.msk.bf16.mxu0 %vm823_vm0, %v6158_v22  ;;  %v2575_v22 = vsel %vm1823_vm2, %v2570_v30, %v2574_v2 }
 0x154   : > { %v2578_v15 = vor.u32 %v2576_v20, %v2574_v2 }
 0x155   : > { %v6554_v37 = vpop.f32.mrb[4].mxu1 }
 0x156   : > { %v6557_v41 = vpop.f32.mrb[5].mxu1  ;;  %v2583_v6 = vsel %vm1823_vm2, %v2578_v15, %v2582_v24 }
 0x157   : > { %v6561_v48 = vpop.f32.mrb[6].mxu1 }
 0x158   : > { %v6566_v61 = vpop.f32.mrb[7].mxu1 }
 0x15a   : > { %5072 = vmatmul.mubr.msk.bf16.gmra.mrb[48].mxu1 %vm823_vm0, %v2567_v62  ;;  %5140 = vmatmul.mubr.msk.bf16.gmra.mrb[48].mxu0 %vm823_vm0, %v6163_v26  ;;  %v2592_v26 = vshrl.u32 %v6552_v36, 16 }
 0x15b   : > { %5075 = vmatprep.mubr.msk.bf16.mxu1 %vm823_vm0, %v2575_v22  ;;  %5143 = vmatprep.mubr.msk.bf16.mxu0 %vm823_vm0, %v6166_v28  ;;  %v2600_v28 = vshrl.u32 %v6570_v3, 16 }
 0x15c   : > { %v2594_v11 = vor.u32 %v2592_v26, %v2590_v21 }
 0x15d   : > { %v6580_v42 = vpop.f32.mrb[8].mxu1  ;;  %v2602_v54 = vor.u32 %v2600_v28, %v2598_v43 }
 0x15e   : > { %v6583_v14 = vpop.f32.mrb[9].mxu1  ;;  %v2599_v4 = vsel %vm1823_vm2, %v2594_v11, %v2598_v43 }
 0x15f   : > { %v6587_v31 = vpop.f32.mrb[10].mxu1  ;;  %v2607_v60 = vsel %vm1823_vm2, %v2602_v54, %v2606_v12 }
 0x160   : > { %v6592_v57 = vpop.f32.mrb[11].mxu1 }
 0x162   : > { %5076 = vmatmul.mubr.msk.bf16.gmra.mrb[52].mxu1 %vm823_vm0, %v2583_v6  ;;  %5144 = vmatmul.mubr.msk.bf16.gmra.mrb[52].mxu0 %vm823_vm0, %v6171_v32  ;;  %v2612_v32 = vshll.u32 %v6599_v13, 16  ;;  %v3361_v6 = vsel %vm2906_vm1, %v3358_v18, %v3360_v10 }
 0x163   : > { %5079 = vmatprep.mubr.msk.bf16.mxu1 %vm823_vm0, %v2591_v33  ;;  %5147 = vmatprep.mubr.msk.bf16.mxu0 %vm823_vm0, %v6185_v40  ;;  %v2610_v40 = vor.u32 %v2608_v17, %v2606_v12 }
 0x164   : > { %v2614_v30 = vrot.slane %v2612_v32, 1 }
 0x165   : > { %v6603_v58 = vpop.f32.mrb[12].mxu1 }
 0x166   : > { %v6605_v1 = vpop.f32.mrb[13].mxu1  ;;  %v2615_v62 = vsel %vm1823_vm2, %v2610_v40, %v2614_v30 }
 0x167   : > { %v6610_v49 = vpop.f32.mrb[14].mxu1 }
 0x168   : > { %v6613_v51 = vpop.f32.mrb[15].mxu1 }
 0x16a   : > { %5080 = vmatmul.mubr.msk.bf16.gmra.mrb[56].mxu1 %vm823_vm0, %v2599_v4  ;;  %5148 = vmatmul.mubr.msk.bf16.gmra.mrb[56].mxu0 %vm823_vm0, %v6189_v44 }
 0x16b   : > { %5083 = vmatprep.mubr.msk.bf16.mxu1 %vm823_vm0, %v2607_v60  ;;  %5151 = vmatprep.mubr.msk.bf16.mxu0 %vm823_vm0, %v6193_v45 }
 0x16d   : > { %v6621_v2 = vpop.f32.mrb[16].mxu1 }
 0x16e   : > { %v6623_v53 = vpop.f32.mrb[17].mxu1 }
 0x16f   : > { %v6626_v20 = vpop.f32.mrb[18].mxu1 }
 0x170   : > { %v6628_v22 = vpop.f32.mrb[19].mxu1 }
 0x172   : > { %5084 = vmatmul.mubr.msk.bf16.gmra.mrb[60].mxu1 %vm823_vm0, %v2615_v62  ;;  %5152 = vmatmul.mubr.msk.bf16.gmra.mrb[60].mxu0 %vm823_vm0, %v6353_v9 }
 0x173   : > { %5157 = vmatprep.mubr.msk.bf16.mxu0 %vm823_vm0, %v6367_v35 }
 0x175   : > { %v6635_v44 = vpop.f32.mrb[20].mxu1 }
 0x176   : > { %v6637_v45 = vpop.f32.mrb[21].mxu1 }
 0x177   : > { %v6639_v34 = vpop.f32.mrb[22].mxu1 }
 0x178   : > { %v6641_v59 = vpop.f32.mrb[23].mxu1 }
 0x17a   : > { %5158 = vmatmul.mubr.msk.bf16.vlgmr.msra.gmra.mrb[32].mxu0 %vm823_vm0, %v6364_v50 }
 0x17b   : > { %5161 = vmatprep.mubr.msk.bf16.mxu0 %vm823_vm0, %v6391_v52 }
 0x17d   : > { %v6647_v24 = vpop.f32.mrb[24].mxu1 }
 0x17e   : > { %v6649_v9 = vpop.f32.mrb[25].mxu1 }
 0x17f   : > { %v6651_v15 = vpop.f32.mrb[26].mxu1 }
 0x180   : > { %v6653_v35 = vpop.f32.mrb[27].mxu1 }
 0x182   : > { %5162 = vmatmul.mubr.msk.bf16.gmra.mrb[36].mxu0 %vm823_vm0, %v6394_v63  ;;  %v3362_v63 = vrot.slane %v6500_v19, 1 }
 0x183   : > { %5165 = vmatprep.mubr.msk.bf16.mxu0 %vm823_vm0, %v6413_v8  ;;  %v3364_v8 = vrot.slane %v6508_v55, 1  ;;  %v3366_v55 = vrot.slane %v6518_v5, 1 }
 0x184   : > { %v3363_v18 = vsel %vm2906_vm1, %v3360_v10, %v3362_v63 }
 0x185   : > { %v6660_v50 = vpop.f32.mrb[28].mxu1  ;;  %v3365_v43 = vsel %vm2906_vm1, %v3362_v63, %v3364_v8 }
 0x186   : > { %v6662_v21 = vpop.f32.mrb[29].mxu1 }
 0x187   : > { %v6664_v52 = vpop.f32.mrb[30].mxu1 }
 0x188   : > { %v6666_v7 = vpop.f32.mrb[31].mxu1 }
 0x18a   : > { %5166 = vmatmul.mubr.msk.bf16.gmra.mrb[40].mxu0 %vm823_vm0, %v6418_v38 }
 0x18b   : > { %5169 = vmatprep.mubr.msk.bf16.mxu0 %vm823_vm0, %v3361_v6 }
 0x18d   : > { %v4955_v56 = vpop.f32.mrb[0].mxu0 }
 0x18e   : > { %v6677_v26 = vadd.f32 %v4955_v56, %v6528_v46  ;;  %v1411_v33 = vpop.f32.mrb[1].mxu0  ;;  %v3368_v46 = vrot.slane %v6526_v0, 1  ;;  %v3370_v0 = vrot.slane %v6544_v25, 1 }
 0x18f   : > { %v6680_v28 = vadd.f32 %v1411_v33, %v6531_v23  ;;  %v4956_v39 = vpop.f32.mrb[2].mxu0 }
 0x190   : > { %v6684_v29 = vadd.f32 %v4956_v39, %v6535_v16  ;;  %v1414_v38 = vpop.f32.mrb[3].mxu0  ;;  %v3369_v32 = vsel %vm2906_vm1, %v3366_v55, %v3368_v46 }
 0x191   : > { %v6688_v19 = vadd.f32 %v1414_v38, %v6540_v47  ;;  %v3367_v47 = vsel %vm2906_vm1, %v3364_v8, %v3366_v55 }
 0x192   : > { %5170 = vmatmul.mubr.msk.bf16.gmra.mrb[44].mxu0 %vm823_vm0, %v3363_v18 }
 0x193   : > { %5173 = vmatprep.mubr.msk.bf16.mxu0 %vm823_vm0, %v3365_v43 }
 0x195   : > { %v4959_v23 = vpop.f32.mrb[4].mxu0 }
 0x196   : > { %v6695_v11 = vadd.f32 %v4959_v23, %v6554_v37  ;;  %v1427_v16 = vpop.f32.mrb[5].mxu0  ;;  %v3372_v37 = vrot.slane %v6552_v36, 1  ;;  %v3374_v36 = vrot.slane %v6570_v3, 1 }
 0x197   : > { %v6698_v54 = vadd.f32 %v1427_v16, %v6557_v41  ;;  %v4960_v12 = vpop.f32.mrb[6].mxu0  ;;  %v5548_v16 = vld [vmem:[#allocation6] sm:$0xff]  }
 0x198   : > { %v6702_v4 = vadd.f32 %v4960_v12, %v6561_v48  ;;  %v1430_v17 = vpop.f32.mrb[7].mxu0  ;;  %v3373_v6 = vsel %vm2906_vm1, %v3370_v0, %v3372_v37  ;;  %5189 = vmatprep.subr.bf16.mxu1 %v5548_v16 }
 0x199   : > { %v6706_v5 = vadd.f32 %v1430_v17, %v6566_v61  ;;  %v3371_v61 = vsel %vm2906_vm1, %v3368_v46, %v3370_v0  ;;  %5190 = vmatpush3.bf16.msra.mxu1 %v5548_v16 }
 0x19a   : > { %5174 = vmatmul.mubr.msk.bf16.gmra.mrb[48].mxu0 %vm823_vm0, %v3367_v47 }
 0x19b   : > { %5177 = vmatprep.mubr.msk.bf16.mxu0 %vm823_vm0, %v3369_v32 }
 0x19d   : > { %v4963_v41 = vpop.f32.mrb[8].mxu0 }
 0x19e   : > { %v6713_v60 = vadd.f32 %v4963_v41, %v6580_v42  ;;  %v1443_v48 = vpop.f32.mrb[9].mxu0  ;;  %v3376_v42 = vrot.slane %v6578_v27, 1  ;;  %v3378_v27 = vrot.slane %v6599_v13, 1 }
 0x19f   : > { %v6716_v40 = vadd.f32 %v1443_v48, %v6583_v14  ;;  %v4964_v30 = vpop.f32.mrb[10].mxu0 }
 0x1a0   : > { %v6720_v62 = vadd.f32 %v4964_v30, %v6587_v31  ;;  %v1446_v10 = vpop.f32.mrb[11].mxu0  ;;  %v3377_v18 = vsel %vm2906_vm1, %v3374_v36, %v3376_v42  ;;  %v3379_v55 = vsel %vm2906_vm1, %v3376_v42, %v3378_v27 }
 0x1a1   : > { %v6724_v25 = vadd.f32 %v1446_v10, %v6592_v57  ;;  %v3375_v57 = vsel %vm2906_vm1, %v3372_v37, %v3374_v36  ;;  %v281_v36 = vlaneseq }
 0x1a2   : > { %5178 = vmatmul.mubr.msk.bf16.gmra.mrb[52].mxu0 %vm823_vm0, %v3371_v61 }
 0x1a3   : > { %5181 = vmatprep.mubr.msk.bf16.mxu0 %vm823_vm0, %v3373_v6  ;;  %v6797_v42 = vshrl.u32 %v281_v36, 7 }
 0x1a5   : > { %v4967_v14 = vpop.f32.mrb[12].mxu0 }
 0x1a6   : > { %v6731_v63 = vadd.f32 %v4967_v14, %v6603_v58  ;;  %v1459_v31 = vpop.f32.mrb[13].mxu0 }
 0x1a7   : > { %v6734_v8 = vadd.f32 %v1459_v31, %v6605_v1  ;;  %v4968_v56 = vpop.f32.mrb[14].mxu0  ;;  %v286_v31 = vadd.s32 32, %v6797_v42 }
 0x1a8   : > { %v6738_v33 = vadd.f32 %v4968_v56, %v6610_v49  ;;  %v1462_v39 = vpop.f32.mrb[15].mxu0 }
 0x1a9   : > { %v6742_v3 = vadd.f32 %v1462_v39, %v6613_v51 }
 0x1aa   : > { %5182 = vmatmul.mubr.msk.bf16.gmra.mrb[56].mxu0 %vm823_vm0, %v3375_v57 }
 0x1ab   : > { %5185 = vmatprep.mubr.msk.bf16.mxu0 %vm823_vm0, %v3377_v18 }
 0x1ad   : > { %v4971_v58 = vpop.f32.mrb[16].mxu0 }
 0x1ae   : > { %v6748_v1 = vadd.f32 %v4971_v58, %v6621_v2  ;;  %v1475_v38 = vpop.f32.mrb[17].mxu0 }
 0x1af   : > { %v6751_v49 = vadd.f32 %v1475_v38, %v6623_v53  ;;  %v4972_v43 = vpop.f32.mrb[18].mxu0  ;;  %v346_v38 = vand.u32 15, %v286_v31 }
 0x1b0   : > { %v6755_v51 = vadd.f32 %v4972_v43, %v6626_v20  ;;  %v1478_v46 = vpop.f32.mrb[19].mxu0 }
 0x1b1   : > { %v6758_v23 = vadd.f32 %v1478_v46, %v6628_v22  ;;  %vm1574_vm6 = vcmp.ge.s32.totalorder %v346_v38, 1 }
 0x1b2   : > { %5186 = vmatmul.mubr.msk.bf16.gmra.mrb[60].mxu0 %vm823_vm0, %v3379_v55 }
 0x1b5   : > { %v4975_v13 = vpop.f32.mrb[20].mxu0 }
 0x1b6   : > { %v6762_v2 = vadd.f32 %v4975_v13, %v6635_v44  ;;  %v1491_v12 = vpop.f32.mrb[21].mxu0  ;;  %v290_v13 = vadd.s32 64, %v6797_v42 }
 0x1b7   : > { %v6765_v53 = vadd.f32 %v1491_v12, %v6637_v45  ;;  %v4976_v47 = vpop.f32.mrb[22].mxu0 }
 0x1b8   : > { %v6768_v20 = vadd.f32 %v4976_v47, %v6639_v34  ;;  %v1494_v17 = vpop.f32.mrb[23].mxu0  ;;  %v1670_v47 = vsel %vm1574_vm6, %v6698_v54, 0.0 }
 0x1b9   : > { %v6771_v22 = vadd.f32 %v1494_v17, %v6641_v59 }
 0x1bd   : > { %v4979_v32 = vpop.f32.mrb[24].mxu0 }
 0x1be   : > { %v6774_v0 = vadd.f32 %v4979_v32, %v6647_v24  ;;  %v1507_v44 = vpop.f32.mrb[25].mxu0 }
 0x1bf   : > { %v6777_v37 = vadd.f32 %v1507_v44, %v6649_v9  ;;  %v4980_v45 = vpop.f32.mrb[26].mxu0 }
 0x1c0   : > { %v6780_v41 = vadd.f32 %v4980_v45, %v6651_v15  ;;  %v1510_v48 = vpop.f32.mrb[27].mxu0 }
 0x1c1   : > { %v6783_v34 = vadd.f32 %v1510_v48, %v6653_v35  ;;  %v284_v35 = vadd.s32 16, %v6797_v42 }
 0x1c3   : > { %v332_v14 = vand.u32 15, %v284_v35 }
 0x1c5   : > { %v4983_v30 = vpop.f32.mrb[28].mxu0  ;;  %vm1572_vm3 = vcmp.ge.s32.totalorder %v332_v14, 1 }
 0x1c6   : > { %v6786_v59 = vadd.f32 %v4983_v30, %v6660_v50  ;;  %v1523_v61 = vpop.f32.mrb[29].mxu0  ;;  %v318_v50 = vand.u32 15, %v6797_v42 }
 0x1c7   : > { %v6789_v24 = vadd.f32 %v1523_v61, %v6662_v21  ;;  %v4984_v10 = vpop.f32.mrb[30].mxu0  ;;  %v288_v21 = vadd.s32 48, %v6797_v42  ;;  %v294_v61 = vadd.s32 96, %v6797_v42 }
 0x1c8   : > { %v6792_v9 = vadd.f32 %v4984_v10, %v6664_v52  ;;  %v1526_v6 = vpop.f32.mrb[31].mxu0  ;;  %vm1570_vm4 = vcmp.ge.s32.totalorder %v318_v50, 1  ;;  %v1668_v52 = vsel %vm1572_vm3, %v6677_v26, 0.0  ;;  %v292_v26 = vadd.s32 80, %v6797_v42 }
 0x1c9   : > { %v6795_v15 = vadd.f32 %v1526_v6, %v6666_v7  ;;  %v1666_v7 = vsel %vm1570_vm4, %v6680_v28, 0.0  ;;  %v360_v18 = vand.u32 15, %v288_v21 }
 0x1cb   : > { %vm1576_vm5 = vcmp.ge.s32.totalorder %v360_v18, 1 }
 0x1cc   : > { %v1672_v28 = vsel %vm1576_vm5, %v6695_v11, 0.0  ;;  %v296_v11 = vadd.s32 112, %v6797_v42 }
 0x20d   : > { %v5057_v56 = vpop.f32.mrb[32].mxu1 }
 0x20e   : > { %v6804_v57 = vadd.f32 %v5057_v56, %v1668_v52  ;;  %v2704_v39 = vpop.f32.mrb[33].mxu1  ;;  %v298_v56 = vadd.s32 128, %v6797_v42 }
 0x20f   : > { %v6807_v27 = vadd.f32 %v2704_v39, %v1666_v7  ;;  %v5058_v58 = vpop.f32.mrb[34].mxu1 }
 0x210   : > { %v6810_v43 = vadd.f32 %v6684_v29, %v5058_v58  ;;  %v2707_v55 = vpop.f32.mrb[35].mxu1  ;;  %v388_v29 = vand.u32 15, %v292_v26 }
 0x211   : > { %v6813_v46 = vadd.f32 %v6688_v19, %v2707_v55  ;;  %v374_v19 = vand.u32 15, %v290_v13 }
 0x212   : > { %vm1580_vm7 = vcmp.ge.s32.totalorder %v388_v29, 1 }
 0x213   : > { %vm1578_vm8 = vcmp.ge.s32.totalorder %v374_v19, 1  ;;  %v1676_v54 = vsel %vm1580_vm7, %v6713_v60, 0.0  ;;  %v300_v60 = vadd.s32 144, %v6797_v42 }
 0x214   : > { %v1674_v36 = vsel %vm1578_vm8, %v6716_v40, 0.0 }
 0x215   : > { %v5061_v16 = vpop.f32.mrb[36].mxu1 }
 0x216   : > { %v6818_v12 = vadd.f32 %v5061_v16, %v1672_v28  ;;  %v2720_v17 = vpop.f32.mrb[37].mxu1  ;;  %v302_v16 = vadd.s32 160, %v6797_v42 }
 0x217   : > { %v6821_v32 = vadd.f32 %v2720_v17, %v1670_v47  ;;  %v5062_v44 = vpop.f32.mrb[38].mxu1 }
 0x218   : > { %v6824_v45 = vadd.f32 %v6702_v4, %v5062_v44  ;;  %v2723_v48 = vpop.f32.mrb[39].mxu1  ;;  %v416_v4 = vand.u32 15, %v296_v11 }
 0x219   : > { %v6827_v30 = vadd.f32 %v6706_v5, %v2723_v48  ;;  %v402_v5 = vand.u32 15, %v294_v61 }
 0x21a   : > { %vm1584_vm9 = vcmp.ge.s32.totalorder %v416_v4, 1 }
 0x21b   : > { %vm1582_vm10 = vcmp.ge.s32.totalorder %v402_v5, 1  ;;  %v1680_v40 = vsel %vm1584_vm9, %v6731_v63, 0.0  ;;  %v304_v63 = vadd.s32 176, %v6797_v42 }
 0x21c   : > { %v1678_v18 = vsel %vm1582_vm10, %v6734_v8, 0.0 }
 0x21d   : > { %v5065_v10 = vpop.f32.mrb[40].mxu1 }
 0x21e   : > { %v6832_v6 = vadd.f32 %v5065_v10, %v1676_v54  ;;  %v2736_v35 = vpop.f32.mrb[41].mxu1  ;;  %v306_v10 = vadd.s32 192, %v6797_v42 }
 0x21f   : > { %v6835_v14 = vadd.f32 %v2736_v35, %v1674_v36  ;;  %v5066_v50 = vpop.f32.mrb[42].mxu1 }
 0x220   : > { %v6838_v21 = vadd.f32 %v6720_v62, %v5066_v50  ;;  %v2739_v31 = vpop.f32.mrb[43].mxu1  ;;  %v444_v62 = vand.u32 15, %v300_v60 }
 0x221   : > { %v6841_v52 = vadd.f32 %v6724_v25, %v2739_v31  ;;  %v430_v25 = vand.u32 15, %v298_v56 }
 0x222   : > { %vm1588_vm11 = vcmp.ge.s32.totalorder %v444_v62, 1 }
 0x223   : > { %vm1586_vm12 = vcmp.ge.s32.totalorder %v430_v25, 1  ;;  %v1684_v8 = vsel %vm1588_vm11, %v6748_v1, 0.0  ;;  %v308_v1 = vadd.s32 208, %v6797_v42 }
 0x224   : > { %v1682_v29 = vsel %vm1586_vm12, %v6751_v49, 0.0 }
 0x225   : > { %v5069_v7 = vpop.f32.mrb[44].mxu1 }
 0x226   : > { %v6846_v39 = vadd.f32 %v5069_v7, %v1680_v40  ;;  %v2752_v58 = vpop.f32.mrb[45].mxu1  ;;  %v310_v7 = vadd.s32 224, %v6797_v42 }
 0x227   : > { %v6849_v38 = vadd.f32 %v2752_v58, %v1678_v18  ;;  %v5070_v55 = vpop.f32.mrb[46].mxu1 }
 0x228   : > { %v6852_v26 = vadd.f32 %v6738_v33, %v5070_v55  ;;  %v2755_v13 = vpop.f32.mrb[47].mxu1  ;;  %v472_v33 = vand.u32 15, %v304_v63 }
 0x229   : > { %v6855_v28 = vadd.f32 %v6742_v3, %v2755_v13  ;;  %v458_v3 = vand.u32 15, %v302_v16 }
 0x22a   : > { %vm1592_vm13 = vcmp.ge.s32.totalorder %v472_v33, 1  ;;  %v285_v33 = vadd.s32 24, %v6797_v42 }
 0x22b   : > { %vm1590_vm14 = vcmp.ge.s32.totalorder %v458_v3, 1  ;;  %v1688_v49 = vsel %vm1592_vm13, %v6762_v2, 0.0  ;;  %v312_v2 = vadd.s32 240, %v6797_v42  ;;  %v283_v3 = vadd.s32 8, %v6797_v42 }
 0x22c   : > { %v1686_v4 = vsel %vm1590_vm14, %v6765_v53, 0.0 }
 0x22d   : > { %v5073_v47 = vpop.f32.mrb[48].mxu1 }
 0x22e   : > { %v6860_v17 = vadd.f32 %v5073_v47, %v1684_v8  ;;  %v2768_v44 = vpop.f32.mrb[49].mxu1 }
 0x22f   : > { %v6863_v19 = vadd.f32 %v2768_v44, %v1682_v29  ;;  %v5074_v48 = vpop.f32.mrb[50].mxu1 }
 0x230   : > { %v6866_v11 = vadd.f32 %v6755_v51, %v5074_v48  ;;  %v2771_v61 = vpop.f32.mrb[51].mxu1  ;;  %v500_v51 = vand.u32 15, %v308_v1 }
 0x231   : > { %v6869_v54 = vadd.f32 %v6758_v23, %v2771_v61  ;;  %v486_v23 = vand.u32 15, %v306_v10  ;;  %v325_v10 = vand.u32 15, %v283_v3 }
 0x232   : > { %vm1596_vm15 = vcmp.ge.s32.totalorder %v500_v51, 1  ;;  %v287_v51 = vadd.s32 40, %v6797_v42 }
 0x233   : > { %vm1594_vm1 = vcmp.ge.s32.totalorder %v486_v23, 1  ;;  %v1692_v53 = vsel %vm1596_vm15, %v6774_v0, 0.0  ;;  %vm3628_vm5 = vcmp.le.s32.totalorder %v325_v10, 14 }
 0x234   : > { %v1690_v62 = vsel %vm1594_vm1, %v6777_v37, 0.0 }
 0x235   : > { %v5077_v36 = vpop.f32.mrb[52].mxu1 }
 0x236   : > { %v6874_v35 = vadd.f32 %v5077_v36, %v1688_v49  ;;  %v2784_v50 = vpop.f32.mrb[53].mxu1  ;;  %v6913_v36 = vld [vmem:[#allocation4] ss:$0 sm:$0xff] }
 0x237   : > { %v6877_v5 = vadd.f32 %v2784_v50, %v1686_v4  ;;  %v5078_v31 = vpop.f32.mrb[54].mxu1 }
 0x238   : > { %v6880_v60 = vadd.f32 %v6768_v20, %v5078_v31  ;;  %v2787_v56 = vpop.f32.mrb[55].mxu1  ;;  %v528_v20 = vand.u32 15, %v312_v2 }
 0x239   : > { %v6883_v40 = vadd.f32 %v6771_v22, %v2787_v56  ;;  %v514_v22 = vand.u32 15, %v310_v7 }
 0x23a   : > { %vm1600_vm2 = vcmp.ge.s32.totalorder %v528_v20, 1 }
 0x23b   : > { %vm1598_vm3 = vcmp.ge.s32.totalorder %v514_v22, 1  ;;  %v1696_v0 = vsel %vm1600_vm2, %v6786_v59, 0.0  ;;  %v339_v59 = vand.u32 15, %v285_v33  ;;  %v291_v22 = vadd.s32 72, %v6797_v42 }
 0x23c   : > { %v1694_v37 = vsel %vm1598_vm3, %v6789_v24, 0.0  ;;  %v289_v24 = vadd.s32 56, %v6797_v42 }
 0x23d   : > { %v5081_v18 = vpop.f32.mrb[56].mxu1  ;;  %vm3630_vm4 = vcmp.le.s32.totalorder %v339_v59, 14  ;;  %v381_v10 = vand.u32 15, %v291_v22 }
 0x23e   : > { %v6888_v58 = vadd.f32 %v5081_v18, %v1692_v53  ;;  %v2800_v55 = vpop.f32.mrb[57].mxu1  ;;  %v367_v18 = vand.u32 15, %v289_v24 }
 0x23f   : > { %v6891_v25 = vadd.f32 %v2800_v55, %v1690_v62  ;;  %v5082_v13 = vpop.f32.mrb[58].mxu1  ;;  %v353_v55 = vand.u32 15, %v287_v51  ;;  %vm6976_vm9 = vcmp.le.s32.totalorder %v381_v10, 14 }
 0x240   : > { %v6894_v63 = vadd.f32 %v6780_v41, %v5082_v13  ;;  %v2803_v16 = vpop.f32.mrb[59].mxu1  ;;  %v293_v13 = vadd.s32 88, %v6797_v42  ;;  %vm6938_vm6 = vcmp.le.s32.totalorder %v367_v18, 14 }
 0x241   : > { %v6897_v8 = vadd.f32 %v6783_v34, %v2803_v16  ;;  %vm6945_vm7 = vcmp.le.s32.totalorder %v353_v55, 14 }
 0x242   : > { %v395_v59 = vand.u32 15, %v293_v13  ;;  %v299_v13 = vadd.s32 136, %v6797_v42 }
 0x244   : > { %vm6969_vm8 = vcmp.le.s32.totalorder %v395_v59, 14 }
 0x245   : > { %v5085_v47 = vpop.f32.mrb[60].mxu1 }
 0x246   : > { %v6900_v29 = vadd.f32 %v5085_v47, %v1696_v0  ;;  %v2816_v44 = vpop.f32.mrb[61].mxu1  ;;  %v297_v47 = vadd.s32 120, %v6797_v42 }
 0x247   : > { %v6904_v48 = vadd.f32 %v2816_v44, %v1694_v37  ;;  %v5086_v41 = vpop.f32.mrb[62].mxu1 }
 0x248   : > { %v6908_v34 = vadd.f32 %v6792_v9, %v5086_v41  ;;  %v2819_v61 = vpop.f32.mrb[63].mxu1 }
 0x249   : > { %v6911_v1 = vadd.f32 %v6795_v15, %v2819_v61 }
 0x24d   : > { %v5159_v49 = vpop.f32.mrb[32].mxu0 }
 0x24e   : > { %v3757_v4 = vadd.f32 %v5159_v49, %v6804_v57  ;;  %v3468_v50 = vpop.f32.mrb[33].mxu0 }
 0x24f   : > { %v3755_v9 = vadd.f32 %v3468_v50, %v6807_v27  ;;  %v5160_v31 = vpop.f32.mrb[34].mxu0 }
 0x250   : > { %v6920_v15 = vadd.f32 %v6913_v36, %v3757_v4  ;;  %v3726_v23 = vsel %vm3630_vm4, %v5160_v31, 0.0  ;;  %v3471_v56 = vpop.f32.mrb[35].mxu0 }
 0x251   : > { %v6923_v2 = vadd.f32 %v6913_v36, %v3755_v9  ;;  %v3758_v7 = vadd.f32 %v3726_v23, %v6810_v43  ;;  %v3724_v53 = vsel %vm3628_vm5, %v3471_v56, 0.0  ;;  %v423_v9 = vand.u32 15, %v297_v47 }
 0x252   : > { %v4662_v57 = vmul.f32 -1.442695, %v6920_v15  ;;  %v3756_v62 = vadd.f32 %v3724_v53, %v6813_v46  ;;  %v301_v56 = vadd.s32 152, %v6797_v42 }
 0x253   : > { %v4660_v27 = vmul.f32 -1.442695, %v6923_v2  ;;  %v6930_v20 = vadd.f32 %v6913_v36, %v3758_v7  ;;  %vm6981_vm10 = vcmp.le.s32.totalorder %v423_v9, 14 }
 0x254   : > { %5549 = vpow2.f32 %v4662_v57  ;;  %v6935_v16 = vadd.f32 %v6913_v36, %v3756_v62  ;;  %v451_v47 = vand.u32 15, %v301_v56 }
 0x255   : > { %5551 = vpow2.f32 %v4660_v27  ;;  %v4663_v43 = vmul.f32 -1.442695, %v6930_v20  ;;  %v5163_v0 = vpop.f32.mrb[36].mxu0 }
 0x256   : > { %v4661_v37 = vmul.f32 -1.442695, %v6935_v16  ;;  %v3761_v44 = vadd.f32 %v5163_v0, %v6818_v12  ;;  %v3484_v33 = vpop.f32.mrb[37].mxu0  ;;  %v295_v12 = vadd.s32 104, %v6797_v42  ;;  %vm7021_vm12 = vcmp.le.s32.totalorder %v451_v47, 14 }
 0x257   : > { %5553 = vpow2.f32 %v4663_v43  ;;  %v3759_v3 = vadd.f32 %v3484_v33, %v6821_v32  ;;  %v5164_v61 = vpop.f32.mrb[38].mxu0 }
 0x258   : > { %5555 = vpow2.f32 %v4661_v37  ;;  %v6951_v49 = vadd.f32 %v6913_v36, %v3761_v44  ;;  %v3730_v24 = vsel %vm6938_vm6, %v5164_v61, 0.0  ;;  %v3487_v4 = vpop.f32.mrb[39].mxu0  ;;  %v6989_v37 = vadd.s32 184, %v6797_v42 }
 0x259   : > { %v6957_v50 = vadd.f32 %v6913_v36, %v3759_v3  ;;  %v3762_v51 = vadd.f32 %v3730_v24, %v6824_v45  ;;  %v3728_v32 = vsel %vm6945_vm7, %v3487_v4, 0.0  ;;  %v6993_v61 = vadd.s32 168, %v6797_v42 }
 0x25a   : > { %v4666_v31 = vmul.f32 -1.442695, %v6951_v49  ;;  %v3760_v23 = vadd.f32 %v3728_v32, %v6827_v30  ;;  %v409_v30 = vand.u32 15, %v295_v12 }
 0x25b   : > { %v4664_v7 = vmul.f32 -1.442695, %v6957_v50  ;;  %v6967_v53 = vadd.f32 %v6913_v36, %v3762_v51 }
 0x25c   : > { %5557 = vpow2.f32 %v4666_v31  ;;  %v6974_v45 = vadd.f32 %v6913_v36, %v3760_v23  ;;  %vm7015_vm11 = vcmp.le.s32.totalorder %v409_v30, 14 }
 0x25d   : > { %5559 = vpow2.f32 %v4664_v7  ;;  %v4667_v62 = vmul.f32 -1.442695, %v6967_v53  ;;  %v5167_v55 = vpop.f32.mrb[40].mxu0 }
 0x25e   : > { %v5550_v22 = vpop.eup %5549  ;;  %v4665_v43 = vmul.f32 -1.442695, %v6974_v45  ;;  %v3765_v0 = vadd.f32 %v5167_v55, %v6832_v6  ;;  %v3500_v46 = vpop.f32.mrb[41].mxu0  ;;  %v479_v55 = vand.u32 15, %v6989_v37  ;;  %v7031_v37 = vadd.s32 200, %v6797_v42 }
 0x25f   : > { %v5552_v44 = vpop.eup %5551  ;;  %v3924_v33 = vadd.f32 1.0, %v5550_v22  ;;  %5561 = vpow2.f32 %v4667_v62  ;;  %v3763_v41 = vadd.f32 %v3500_v46, %v6835_v14  ;;  %v5168_v3 = vpop.f32.mrb[42].mxu0  ;;  %v437_v62 = vand.u32 15, %v299_v13 }
 0x260   : > { %v3922_v59 = vadd.f32 1.0, %v5552_v44  ;;  %5563 = vpow2.f32 %v4665_v43  ;;  %v6996_v10 = vadd.f32 %v6913_v36, %v3765_v0  ;;  %v3734_v6 = vsel %vm6969_vm8, %v5168_v3, 0.0  ;;  %v3503_v24 = vpop.f32.mrb[43].mxu0 }
 0x261   : > { %v5554_v4 = vpop.eup %5553  ;;  %5565 = vrcp.f32 %v3924_v33  ;;  %v7001_v12 = vadd.f32 %v6913_v36, %v3763_v41  ;;  %v3766_v14 = vadd.f32 %v3734_v6, %v6838_v21  ;;  %v3732_v51 = vsel %vm6976_vm9, %v3503_v24, 0.0 }
 0x262   : > { %v5556_v32 = vpop.eup %5555  ;;  %5567 = vrcp.f32 %v3922_v59  ;;  %v3925_v9 = vadd.f32 1.0, %v5554_v4  ;;  %v4670_v31 = vmul.f32 -1.442695, %v6996_v10  ;;  %v3764_v23 = vadd.f32 %v3732_v51, %v6841_v52 }
 0x263   : > { %v3923_v56 = vadd.f32 1.0, %v5556_v32  ;;  %v4668_v7 = vmul.f32 -1.442695, %v7001_v12  ;;  %v7010_v18 = vadd.f32 %v6913_v36, %v3766_v14  ;;  %v465_v13 = vand.u32 15, %v6993_v61 }
 0x264   : > { %5569 = vrcp.f32 %v3925_v9  ;;  %v7013_v21 = vadd.f32 %v6913_v36, %v3764_v23  ;;  %v7027_v0 = vadd.s32 216, %v6797_v42  ;;  %v7034_v33 = vadd.s32 248, %v6797_v42 }
 0x265   : > { %5571 = vrcp.f32 %v3923_v56  ;;  %v4671_v52 = vmul.f32 -1.442695, %v7010_v18  ;;  %v5171_v22 = vpop.f32.mrb[44].mxu0  ;;  %vm7038_vm13 = vcmp.le.s32.totalorder %v437_v62, 14  ;;  %vm7065_vm14 = vcmp.le.s32.totalorder %v479_v55, 14 }
 0x266   : > { %v5558_v46 = vpop.eup %5557  ;;  %5573 = vpow2.f32 %v4670_v31  ;;  %v3769_v30 = vadd.f32 %v5171_v22, %v6846_v39  ;;  %v3516_v44 = vpop.f32.mrb[45].mxu0  ;;  %v4669_v3 = vmul.f32 -1.442695, %v7013_v21  ;;  %v507_v57 = vand.u32 15, %v7027_v0 }
 0x267   : > { %v5560_v47 = vpop.eup %5559  ;;  %v3928_v41 = vadd.f32 1.0, %v5558_v46  ;;  %5575 = vpow2.f32 %v4668_v7  ;;  %v3767_v61 = vadd.f32 %v3516_v44, %v6849_v38  ;;  %v5172_v59 = vpop.f32.mrb[46].mxu0  ;;  %vm7079_vm15 = vcmp.le.s32.totalorder %v465_v13, 14 }
 0x268   : > { %v3926_v39 = vadd.f32 1.0, %v5560_v47  ;;  %5577 = vpow2.f32 %v4671_v52  ;;  %v7043_v24 = vadd.f32 %v6913_v36, %v3769_v30  ;;  %v3738_v4 = vsel %vm6981_vm10, %v5172_v59, 0.0  ;;  %v3519_v14 = vpop.f32.mrb[47].mxu0 }
 0x269   : > { %v5562_v51 = vpop.eup %5561  ;;  %5579 = vrcp.f32 %v3928_v41  ;;  %v7048_v32 = vadd.f32 %v6913_v36, %v3767_v61  ;;  %v3770_v38 = vadd.f32 %v3738_v4, %v6852_v26  ;;  %v3736_v9 = vsel %vm7015_vm11, %v3519_v14, 0.0 }
 0x26a   : > { %v5564_v31 = vpop.eup %5563  ;;  %5581 = vrcp.f32 %v3926_v39  ;;  %v3929_v23 = vadd.f32 1.0, %v5562_v51  ;;  %v4674_v56 = vmul.f32 -1.442695, %v7043_v24  ;;  %v3768_v7 = vadd.f32 %v3736_v9, %v6855_v28 }
 0x26b   : > { %v5566_v27 = vpop.eup %5565  ;;  %v3927_v62 = vadd.f32 1.0, %v5564_v31  ;;  %5583 = vpow2.f32 %v4669_v3  ;;  %v4672_v52 = vmul.f32 -1.442695, %v7048_v32  ;;  %v7057_v22 = vadd.f32 %v6913_v36, %v3770_v38 }
 0x26c   : > { %v5568_v46 = vpop.eup %5567  ;;  %5585 = vrcp.f32 %v3929_v23  ;;  %v7060_v26 = vadd.f32 %v6913_v36, %v3768_v7  ;;  %v493_v30 = vand.u32 15, %v7031_v37  ;;  %v535_v41 = vand.u32 15, %v7034_v33 }
 0x26d   : > { %5587 = vrcp.f32 %v3927_v62  ;;  %v4675_v28 = vmul.f32 -1.442695, %v7057_v22  ;;  %v5175_v44 = vpop.f32.mrb[48].mxu0  ;;  %v7071_v3 = vadd.s32 232, %v6797_v42  ;;  %v4020_v59 = vmul.f32 %v5566_v27, %v6920_v15 }
 0x26e   : > { %v5570_v61 = vpop.eup %5569  ;;  %5589 = vpow2.f32 %v4674_v56  ;;  %v4673_v0 = vmul.f32 -1.442695, %v7060_v26  ;;  %v3773_v39 = vadd.f32 %v5175_v44, %v6860_v17  ;;  %v3532_v4 = vpop.f32.mrb[49].mxu0  ;;  %v4018_v55 = vmul.f32 %v5568_v46, %v6923_v2 }
 0x26f   : > { %v5572_v14 = vpop.eup %5571  ;;  %v4021_v51 = vmul.f32 %v5570_v61, %v6930_v20  ;;  %5591 = vpow2.f32 %v4672_v52  ;;  %v3771_v38 = vadd.f32 %v3532_v4, %v6863_v19  ;;  %v5176_v9 = vpop.f32.mrb[50].mxu0  ;;  %vm7112_vm1 = vcmp.le.s32.totalorder %v507_v57, 14 }
 0x270   : > { %v5574_v15 = vpop.eup %5573  ;;  %v4019_v31 = vmul.f32 %v5572_v14, %v6935_v16  ;;  %5593 = vpow2.f32 %v4675_v28  ;;  %v7085_v17 = vadd.f32 %v6913_v36, %v3773_v39  ;;  %v3742_v2 = vsel %vm7021_vm12, %v5176_v9, 0.0  ;;  %v3535_v23 = vpop.f32.mrb[51].mxu0 }
 0x271   : > { %v5576_v20 = vpop.eup %5575  ;;  %v4051_v56 = vpack.c.bf16 %v4021_v51, %v4020_v59  ;;  %v3932_v7 = vadd.f32 1.0, %v5574_v15  ;;  %5595 = vpow2.f32 %v4673_v0  ;;  %v7090_v19 = vadd.f32 %v6913_v36, %v3771_v38 }
 0x272   : > { %v5578_v13 = vpop.eup %5577  ;;  %v3930_v27 = vadd.f32 1.0, %v5576_v20  ;;  %v4678_v62 = vmul.f32 -1.442695, %v7085_v17  ;;  %v3774_v16 = vadd.f32 %v3742_v2, %v6866_v11  ;;  %v3740_v52 = vsel %vm7038_vm13, %v3535_v23, 0.0 }
 0x273   : > { %v5580_v46 = vpop.eup %5579  ;;  %5597 = vrcp.f32 %v3932_v7  ;;  %v3933_v43 = vadd.f32 1.0, %v5578_v13  ;;  %v4676_v28 = vmul.f32 -1.442695, %v7090_v19  ;;  %v3772_v44 = vadd.f32 %v3740_v52, %v6869_v54 }
 0x274   : > { %v5582_v61 = vpop.eup %5581  ;;  %5599 = vrcp.f32 %v3930_v27  ;;  %v7099_v59 = vadd.f32 %v6913_v36, %v3774_v16  ;;  %v4050_v0 = vpack.c.bf16 %v4019_v31, %v4018_v55  ;;  %v521_v39 = vand.u32 15, %v7071_v3 }
 0x275   : > { %v5584_v4 = vpop.eup %5583  ;;  %v7103_v11 = vmul.f32 %v5580_v46, %v6951_v49  ;;  %v4022_v6 = vmul.f32 %v5582_v61, %v6957_v50  ;;  %5601 = vrcp.f32 %v3933_v43  ;;  %v7107_v14 = vadd.f32 %v6913_v36, %v3772_v44  ;;  %v5179_v51 = vpop.f32.mrb[52].mxu0 }
 0x276   : > { %v5586_v54 = vpop.eup %5585  ;;  %v3931_v38 = vadd.f32 1.0, %v5584_v4  ;;  %5603 = vpow2.f32 %v4678_v62  ;;  %v4679_v9 = vmul.f32 -1.442695, %v7099_v59  ;;  %5191 = vmatprep.mubr.msk.bf16.mxu1 %vm823_vm0, %v4050_v0  ;;  %v3777_v55 = vadd.f32 %v5179_v51, %v6874_v35  ;;  %v3548_v15 = vpop.f32.mrb[53].mxu0 }
 0x277   : > { %v5588_v50 = vpop.eup %5587  ;;  %v4025_v31 = vmul.f32 %v5586_v54, %v6967_v53  ;;  %5605 = vpow2.f32 %v4676_v28  ;;  %v4677_v2 = vmul.f32 -1.442695, %v7107_v14  ;;  %5192 = vmatmul.mubr.msk.bf16.vlgmr.msra.gmra.mrb[64].mxu1 %vm823_vm0, %v4051_v56  ;;  %v3775_v23 = vadd.f32 %v3548_v15, %v6877_v5  ;;  %v5180_v20 = vpop.f32.mrb[54].mxu0 }
 0x278   : > { %v5590_v7 = vpop.eup %5589  ;;  %v4023_v13 = vmul.f32 %v5588_v50, %v6974_v45  ;;  %5607 = vrcp.f32 %v3931_v38  ;;  %v7122_v35 = vadd.f32 %v6913_v36, %v3777_v55  ;;  %v3746_v57 = vsel %vm7065_vm14, %v5180_v20, 0.0  ;;  %v3551_v27 = vpop.f32.mrb[55].mxu0 }
 0x279   : > { %v5592_v53 = vpop.eup %5591  ;;  %v3936_v62 = vadd.f32 1.0, %v5590_v7  ;;  %5609 = vpow2.f32 %v4679_v9  ;;  %v7127_v16 = vadd.f32 %v6913_v36, %v3775_v23  ;;  %v3778_v5 = vadd.f32 %v3746_v57, %v6880_v60 }
 0x27a   : > { %v5594_v56 = vpop.eup %5593  ;;  %v3934_v52 = vadd.f32 1.0, %v5592_v53  ;;  %5611 = vpow2.f32 %v4677_v2  ;;  %v4682_v45 = vmul.f32 -1.442695, %v7122_v35  ;;  %v3744_v46 = vsel %vm7079_vm15, %v3551_v27, 0.0 }
 0x27b   : > { %v5596_v43 = vpop.eup %5595  ;;  %5613 = vrcp.f32 %v3936_v62  ;;  %v3937_v47 = vadd.f32 1.0, %v5594_v56  ;;  %v4680_v28 = vmul.f32 -1.442695, %v7127_v16  ;;  %v7135_v44 = vadd.f32 %v6913_v36, %v3778_v5 }
 0x27c   : > { %5615 = vrcp.f32 %v3934_v52  ;;  %v3935_v61 = vadd.f32 1.0, %v5596_v43  ;;  %v3776_v60 = vadd.f32 %v3744_v46, %v6883_v40  ;;  %v4052_v0 = vpack.c.bf16 %v4023_v13, %v4022_v6 }
 0x27d   : > { %v5598_v4 = vpop.eup %5597  ;;  %5617 = vrcp.f32 %v3937_v47  ;;  %v4683_v51 = vmul.f32 -1.442695, %v7135_v44  ;;  %v5183_v54 = vpop.f32.mrb[56].mxu0  ;;  %v4053_v42 = vpack.c.bf16 %v4025_v31, %v7103_v11  ;;  %vm7142_vm2 = vcmp.le.s32.totalorder %v493_v30, 14 }
 0x27e   : > { %v5600_v9 = vpop.eup %5599  ;;  %5619 = vrcp.f32 %v3935_v61  ;;  %v7147_v55 = vadd.f32 %v6913_v36, %v3776_v60  ;;  %5195 = vmatprep.mubr.msk.bf16.mxu1 %vm823_vm0, %v4052_v0  ;;  %v3781_v40 = vadd.f32 %v5183_v54, %v6888_v58  ;;  %v3564_v6 = vpop.f32.mrb[57].mxu0  ;;  %vm7153_vm3 = vcmp.le.s32.totalorder %v535_v41, 14 }
 0x27f   : > { %v5602_v37 = vpop.eup %5601  ;;  %v4028_v30 = vmul.f32 %v5598_v4, %v6996_v10  ;;  %v4026_v15 = vmul.f32 %v5600_v9, %v7001_v12  ;;  %5621 = vpow2.f32 %v4682_v45  ;;  %5196 = vmatmul.mubr.msk.bf16.gmra.mrb[68].mxu1 %vm823_vm0, %v4053_v42  ;;  %v3779_v50 = vadd.f32 %v3564_v6, %v6891_v25  ;;  %v5184_v31 = vpop.f32.mrb[58].mxu0 }
 0x280   : > { %vm7163_vm4 = vcmp.le.s32.totalorder %v521_v39, 14  ;;  %v5604_v33 = vpop.eup %5603  ;;  %v4029_v41 = vmul.f32 %v5602_v37, %v7010_v18  ;;  %5623 = vpow2.f32 %v4680_v28  ;;  %v4681_v10 = vmul.f32 -1.442695, %v7147_v55  ;;  %v3567_v2 = vpop.f32.mrb[59].mxu0 }
 0x281   : > { %v7170_v12 = vadd.f32 %v6913_v36, %v3781_v40  ;;  %v5606_v23 = vpop.eup %5605  ;;  %v3940_v20 = vadd.f32 1.0, %v5604_v33  ;;  %5625 = vpow2.f32 %v4683_v51  ;;  %v7173_v25 = vadd.f32 %v6913_v36, %v3779_v50 }
 0x282   : > { %v3750_v3 = vsel %vm7112_vm1, %v5184_v31, 0.0  ;;  %v5608_v39 = vpop.eup %5607  ;;  %v3938_v7 = vadd.f32 1.0, %v5606_v23  ;;  %5627 = vpow2.f32 %v4681_v10  ;;  %v3748_v62 = vsel %vm7142_vm2, %v3567_v2, 0.0 }
 0x283   : > { %v4686_v18 = vmul.f32 -1.442695, %v7170_v12  ;;  %v3782_v13 = vadd.f32 %v3750_v3, %v6894_v63  ;;  %v5610_v57 = vpop.eup %5609  ;;  %v4027_v27 = vmul.f32 %v5608_v39, %v7013_v21  ;;  %5629 = vrcp.f32 %v3940_v20 }
 0x284   : > { %v4684_v53 = vmul.f32 -1.442695, %v7173_v25  ;;  %v5612_v5 = vpop.eup %5611  ;;  %5631 = vrcp.f32 %v3938_v7  ;;  %v3941_v49 = vadd.f32 1.0, %v5610_v57  ;;  %v3780_v52 = vadd.f32 %v3748_v62, %v6897_v8 }
 0x285   : > { %v7184_v56 = vadd.f32 %v6913_v36, %v3782_v13  ;;  %v5614_v45 = vpop.eup %5613  ;;  %v3939_v46 = vadd.f32 1.0, %v5612_v5  ;;  %5633 = vpow2.f32 %v4686_v18  ;;  %v4054_v63 = vpack.c.bf16 %v4027_v27, %v4026_v15  ;;  %v5187_v43 = vpop.f32.mrb[60].mxu0 }
 0x286   : > { %v4055_v21 = vpack.c.bf16 %v4029_v41, %v4028_v30  ;;  %v5616_v47 = vpop.eup %5615  ;;  %v4032_v28 = vmul.f32 %v5614_v45, %v7043_v24  ;;  %5635 = vrcp.f32 %v3941_v49  ;;  %v7190_v60 = vadd.f32 %v6913_v36, %v3780_v52  ;;  %v3580_v0 = vpop.f32.mrb[61].mxu0 }
 0x287   : > { %v4687_v61 = vmul.f32 -1.442695, %v7184_v56  ;;  %v5618_v4 = vpop.eup %5617  ;;  %v4030_v51 = vmul.f32 %v5616_v47, %v7048_v32  ;;  %5637 = vrcp.f32 %v3939_v46  ;;  %5199 = vmatprep.mubr.msk.bf16.mxu1 %vm823_vm0, %v4054_v63  ;;  %v3785_v8 = vadd.f32 %v5187_v43, %v6900_v29  ;;  %v5188_v42 = vpop.f32.mrb[62].mxu0 }
 0x288   : > { %v3783_v54 = vadd.f32 %v3580_v0, %v6904_v48  ;;  %v5620_v38 = vpop.eup %5619  ;;  %v4033_v24 = vmul.f32 %v5618_v4, %v7057_v22  ;;  %5639 = vpow2.f32 %v4684_v53  ;;  %v4685_v9 = vmul.f32 -1.442695, %v7190_v60  ;;  %5200 = vmatmul.mubr.msk.bf16.gmra.mrb[72].mxu1 %vm823_vm0, %v4055_v21  ;;  %v3583_v32 = vpop.f32.mrb[63].mxu0 }
 0x289   : > { %v3754_v40 = vsel %vm7153_vm3, %v5188_v42, 0.0  ;;  %v5622_v6 = vpop.eup %5621  ;;  %v4031_v37 = vmul.f32 %v5620_v38, %v7060_v26  ;;  %5641 = vpow2.f32 %v4687_v61  ;;  %v7203_v29 = vadd.f32 %v6913_v36, %v3785_v8 }
 0x28a   : > { %v7206_v48 = vadd.f32 %v6913_v36, %v3783_v54  ;;  %v5624_v22 = vpop.eup %5623  ;;  %v3944_v30 = vadd.f32 1.0, %v5622_v6  ;;  %5643 = vpow2.f32 %v4685_v9  ;;  %v3786_v15 = vadd.f32 %v3754_v40, %v6908_v34 }
 0x28b   : > { %v3752_v11 = vsel %vm7163_vm4, %v3583_v32, 0.0  ;;  %v5626_v50 = vpop.eup %5625  ;;  %v3942_v31 = vadd.f32 1.0, %v5624_v22  ;;  %v4690_v33 = vmul.f32 -1.442695, %v7203_v29  ;;  %v4056_v20 = vpack.c.bf16 %v4031_v37, %v4030_v51 }
 0x28c   : > { %v4688_v26 = vmul.f32 -1.442695, %v7206_v48  ;;  %v3784_v41 = vadd.f32 %v3752_v11, %v6911_v1  ;;  %v5628_v10 = vpop.eup %5627  ;;  %5645 = vrcp.f32 %v3944_v30  ;;  %v3945_v2 = vadd.f32 1.0, %v5626_v50 }
 0x28d   : > { %v7215_v23 = vadd.f32 %v6913_v36, %v3786_v15  ;;  %v5630_v3 = vpop.eup %5629  ;;  %5647 = vrcp.f32 %v3942_v31  ;;  %v3943_v34 = vadd.f32 1.0, %v5628_v10  ;;  %v4057_v39 = vpack.c.bf16 %v4033_v24, %v4032_v28  ;;  %5203 = vmatprep.mubr.msk.bf16.mxu1 %vm823_vm0, %v4056_v20 }
 0x28e   : > { %v7218_v58 = vadd.f32 %v6913_v36, %v3784_v41  ;;  %v5632_v7 = vpop.eup %5631  ;;  %5649 = vrcp.f32 %v3945_v2  ;;  %v4036_v36 = vmul.f32 %v5630_v3, %v7085_v17  ;;  %v7249_v3 = vld [vmem:[#allocation7] ss:$0 sm:$0xff] }
 0x28f   : > { %v5634_v18 = vpop.eup %5633  ;;  %5651 = vrcp.f32 %v3943_v34  ;;  %v4691_v1 = vmul.f32 -1.442695, %v7215_v23  ;;  %v4034_v49 = vmul.f32 %v5632_v7, %v7090_v19 }
 0x290   : > { %v5636_v13 = vpop.eup %5635  ;;  %v3948_v57 = vadd.f32 1.0, %v5634_v18  ;;  %5653 = vpow2.f32 %v4690_v33  ;;  %v4689_v27 = vmul.f32 -1.442695, %v7218_v58  ;;  %5204 = vmatmul.mubr.msk.bf16.gmra.mrb[76].mxu1 %vm823_vm0, %v4057_v39 }
 0x291   : > { %v5638_v53 = vpop.eup %5637  ;;  %v4037_v62 = vmul.f32 %v5636_v13, %v7099_v59  ;;  %5655 = vpow2.f32 %v4688_v26 }
 0x292   : > { %v5640_v5 = vpop.eup %5639  ;;  %v4035_v52 = vmul.f32 %v5638_v53, %v7107_v14  ;;  %5657 = vrcp.f32 %v3948_v57 }
 0x293   : > { %v5642_v45 = vpop.eup %5641  ;;  %v3946_v46 = vadd.f32 1.0, %v5640_v5  ;;  %5659 = vpow2.f32 %v4691_v1  ;;  %v4059_v63 = vpack.c.bf16 %v4037_v62, %v4036_v36 }
 0x294   : > { %v5644_v43 = vpop.eup %5643  ;;  %v3949_v21 = vadd.f32 1.0, %v5642_v45  ;;  %5661 = vpow2.f32 %v4689_v27  ;;  %v4058_v47 = vpack.c.bf16 %v4035_v52, %v4034_v49 }
 0x295   : > { %5663 = vrcp.f32 %v3946_v46  ;;  %v3947_v28 = vadd.f32 1.0, %v5644_v43 }
 0x296   : > { %v5646_v17 = vpop.eup %5645  ;;  %5665 = vrcp.f32 %v3949_v21  ;;  %5207 = vmatprep.mubr.msk.bf16.mxu1 %vm823_vm0, %v4058_v47 }
 0x297   : > { %v5648_v59 = vpop.eup %5647  ;;  %5667 = vrcp.f32 %v3947_v28  ;;  %v4040_v61 = vmul.f32 %v5646_v17, %v7122_v35 }
 0x298   : > { %v5650_v19 = vpop.eup %5649  ;;  %5208 = vmatmul.mubr.msk.bf16.gmra.mrb[80].mxu1 %vm823_vm0, %v4059_v63  ;;  %v4038_v51 = vmul.f32 %v5648_v59, %v7127_v16 }
 0x299   : > { %v5652_v14 = vpop.eup %5651  ;;  %v4041_v0 = vmul.f32 %v5650_v19, %v7135_v44 }
 0x29a   : > { %v5654_v4 = vpop.eup %5653  ;;  %v4039_v8 = vmul.f32 %v5652_v14, %v7147_v55 }
 0x29b   : > { %v5656_v54 = vpop.eup %5655  ;;  %v3952_v42 = vadd.f32 1.0, %v5654_v4  ;;  %v4061_v38 = vpack.c.bf16 %v4041_v0, %v4040_v61 }
 0x29c   : > { %v5658_v24 = vpop.eup %5657  ;;  %v3950_v9 = vadd.f32 1.0, %v5656_v54  ;;  %v4060_v40 = vpack.c.bf16 %v4039_v8, %v4038_v51 }
 0x29d   : > { %v5660_v32 = vpop.eup %5659  ;;  %5669 = vrcp.f32 %v3952_v42  ;;  %v4044_v55 = vmul.f32 %v5658_v24, %v7170_v12 }
 0x29e   : > { %v5662_v6 = vpop.eup %5661  ;;  %v3953_v37 = vadd.f32 1.0, %v5660_v32  ;;  %5211 = vmatprep.mubr.msk.bf16.mxu1 %vm823_vm0, %v4060_v40  ;;  %5671 = vrcp.f32 %v3950_v9 }
 0x29f   : > { %v5664_v35 = vpop.eup %5663  ;;  %v3951_v44 = vadd.f32 1.0, %v5662_v6 }
 0x2a0   : > { %v5666_v22 = vpop.eup %5665  ;;  %5673 = vrcp.f32 %v3953_v37  ;;  %5212 = vmatmul.mubr.msk.bf16.gmra.mrb[84].mxu1 %vm823_vm0, %v4061_v38  ;;  %v4042_v15 = vmul.f32 %v5664_v35, %v7173_v25 }
 0x2a1   : > { %v5668_v16 = vpop.eup %5667  ;;  %v4045_v30 = vmul.f32 %v5666_v22, %v7184_v56  ;;  %5675 = vrcp.f32 %v3951_v44 }
 0x2a2   : > { %v4043_v11 = vmul.f32 %v5668_v16, %v7190_v60 }
 0x2a3   : > { %v4063_v50 = vpack.c.bf16 %v4045_v30, %v4044_v55 }
 0x2a4   : > { %v4062_v31 = vpack.c.bf16 %v4043_v11, %v4042_v15 }
 0x2a6   : > { %5215 = vmatprep.mubr.msk.bf16.mxu1 %vm823_vm0, %v4062_v31 }
 0x2a7   : > { %v5670_v33 = vpop.eup %5669 }
 0x2a8   : > { %5216 = vmatmul.mubr.msk.bf16.gmra.mrb[88].mxu1 %vm823_vm0, %v4063_v50  ;;  %v5672_v26 = vpop.eup %5671  ;;  %v4048_v12 = vmul.f32 %v5670_v33, %v7203_v29 }
 0x2a9   : > { %v4046_v2 = vmul.f32 %v5672_v26, %v7206_v48 }
 0x2aa   : > { %v5674_v41 = vpop.eup %5673 }
 0x2ab   : > { %v5676_v10 = vpop.eup %5675  ;;  %v4049_v56 = vmul.f32 %v5674_v41, %v7215_v23 }
 0x2ac   : > { %v4047_v25 = vmul.f32 %v5676_v10, %v7218_v58 }
 0x2ad   : > { %v4065_v60 = vpack.c.bf16 %v4049_v56, %v4048_v12 }
 0x2ae   : > { %v4064_v20 = vpack.c.bf16 %v4047_v25, %v4046_v2 }
 0x2b0   : > { %5219 = vmatprep.mubr.msk.bf16.mxu1 %vm823_vm0, %v4064_v20 }
 0x2b1   : > { %5220 = vmatmul.mubr.msk.bf16.gmra.mrb[92].mxu1 %vm823_vm0, %v4065_v60 }
 0x34a   : > { %v5193_v29 = vpop.f32.mrb[64].mxu1 }
 0x34b   : > { %v4172_v48 = vadd.f32 %v5193_v29, %v7249_v3  ;;  %v4163_v23 = vpop.f32.mrb[65].mxu1 }
 0x34c   : > { %v4164_v34 = vadd.f32 %v7249_v3, %v4163_v23  ;;  %v5194_v58 = vpop.f32.mrb[66].mxu1 }
 0x34d   : > { %4292 = vst [vmem:[%s7254_s17 + $0x10] sm:$0xff] %v4172_v48  ;;  %v4175_v39 = vadd.f32 %v5194_v58, %v7249_v3  ;;  %v4166_v7 = vpop.f32.mrb[67].mxu1 }
 0x34e   : > { %4290 = vst [vmem:[%s7254_s17] sm:$0xff] %v4164_v34  ;;  %v4167_v18 = vadd.f32 %v7249_v3, %v4166_v7 }
 0x34f   : > { %4293 = vst [vmem:[%s7254_s17 + $0x18] sm:$0xff] %v4175_v39 }
 0x350   : > { %4291 = vst [vmem:[%s7254_s17 + $0x8] sm:$0xff] %v4167_v18 }
 0x352   : > { %v5197_v1 = vpop.f32.mrb[68].mxu1 }
 0x353   : > { %v4188_v13 = vadd.f32 %v5197_v1, %v7249_v3  ;;  %v4179_v57 = vpop.f32.mrb[69].mxu1 }
 0x354   : > { %v4180_v27 = vadd.f32 %v7249_v3, %v4179_v57  ;;  %v5198_v53 = vpop.f32.mrb[70].mxu1 }
 0x355   : > { %4296 = vst [vmem:[%s7254_s17 + $0x30] sm:$0xff] %v4188_v13  ;;  %v4191_v36 = vadd.f32 %v5198_v53, %v7249_v3  ;;  %v4182_v62 = vpop.f32.mrb[71].mxu1 }
 0x356   : > { %4294 = vst [vmem:[%s7254_s17 + $0x20] sm:$0xff] %v4180_v27  ;;  %v4183_v5 = vadd.f32 %v7249_v3, %v4182_v62 }
 0x357   : > { %4297 = vst [vmem:[%s7254_s17 + $0x38] sm:$0xff] %v4191_v36 }
 0x358   : > { %4295 = vst [vmem:[%s7254_s17 + $0x28] sm:$0xff] %v4183_v5 }
 0x35b   : > { %v5201_v49 = vpop.f32.mrb[72].mxu1 }
 0x35c   : > { %v4204_v52 = vadd.f32 %v5201_v49, %v7249_v3  ;;  %v4195_v45 = vpop.f32.mrb[73].mxu1 }
 0x35d   : > { %v4196_v46 = vadd.f32 %v7249_v3, %v4195_v45  ;;  %v5202_v63 = vpop.f32.mrb[74].mxu1 }
 0x35e   : > { %4300 = vst [vmem:[%s7254_s17 + $0x50] sm:$0xff] %v4204_v52  ;;  %v4207_v43 = vadd.f32 %v5202_v63, %v7249_v3  ;;  %v4198_v21 = vpop.f32.mrb[75].mxu1 }
 0x35f   : > { %4298 = vst [vmem:[%s7254_s17 + $0x40] sm:$0xff] %v4196_v46  ;;  %v4199_v47 = vadd.f32 %v7249_v3, %v4198_v21 }
 0x360   : > { %4301 = vst [vmem:[%s7254_s17 + $0x58] sm:$0xff] %v4207_v43 }
 0x361   : > { %4299 = vst [vmem:[%s7254_s17 + $0x48] sm:$0xff] %v4199_v47 }
 0x363   : > { %v5205_v28 = vpop.f32.mrb[76].mxu1 }
 0x364   : > { %v4220_v17 = vadd.f32 %v5205_v28, %v7249_v3  ;;  %v4211_v59 = vpop.f32.mrb[77].mxu1 }
 0x365   : > { %v4212_v19 = vadd.f32 %v7249_v3, %v4211_v59  ;;  %v5206_v14 = vpop.f32.mrb[78].mxu1 }
 0x366   : > { %4304 = vst [vmem:[%s7254_s17 + $0x70] sm:$0xff] %v4220_v17  ;;  %v4223_v61 = vadd.f32 %v5206_v14, %v7249_v3  ;;  %v4214_v0 = vpop.f32.mrb[79].mxu1 }
 0x367   : > { %4302 = vst [vmem:[%s7254_s17 + $0x60] sm:$0xff] %v4212_v19  ;;  %v4215_v4 = vadd.f32 %v7249_v3, %v4214_v0 }
 0x368   : > { %4305 = vst [vmem:[%s7254_s17 + $0x78] sm:$0xff] %v4223_v61 }
 0x369   : > { %4303 = vst [vmem:[%s7254_s17 + $0x68] sm:$0xff] %v4215_v4 }
 0x36b   : > { %v5209_v51 = vpop.f32.mrb[80].mxu1 }
 0x36c   : > { %v4236_v8 = vadd.f32 %v5209_v51, %v7249_v3  ;;  %v4227_v54 = vpop.f32.mrb[81].mxu1 }
 0x36d   : > { %v4228_v42 = vadd.f32 %v7249_v3, %v4227_v54  ;;  %v5210_v38 = vpop.f32.mrb[82].mxu1 }
 0x36e   : > { %4308 = vst [vmem:[%s7254_s17 + $0x90] sm:$0xff] %v4236_v8  ;;  %v4239_v24 = vadd.f32 %v5210_v38, %v7249_v3  ;;  %v4230_v9 = vpop.f32.mrb[83].mxu1 }
 0x36f   : > { %4306 = vst [vmem:[%s7254_s17 + $0x80] sm:$0xff] %v4228_v42  ;;  %v4231_v40 = vadd.f32 %v7249_v3, %v4230_v9 }
 0x370   : > { %4309 = vst [vmem:[%s7254_s17 + $0x98] sm:$0xff] %v4239_v24 }
 0x371   : > { %4307 = vst [vmem:[%s7254_s17 + $0x88] sm:$0xff] %v4231_v40 }
 0x373   : > { %v5213_v32 = vpop.f32.mrb[84].mxu1 }
 0x374   : > { %v4252_v6 = vadd.f32 %v5213_v32, %v7249_v3  ;;  %v4243_v37 = vpop.f32.mrb[85].mxu1 }
 0x375   : > { %v4244_v35 = vadd.f32 %v7249_v3, %v4243_v37  ;;  %v5214_v44 = vpop.f32.mrb[86].mxu1 }
 0x376   : > { %4312 = vst [vmem:[%s7254_s17 + $0xb0] sm:$0xff] %v4252_v6  ;;  %v4255_v22 = vadd.f32 %v5214_v44, %v7249_v3  ;;  %v4246_v16 = vpop.f32.mrb[87].mxu1 }
 0x377   : > { %4310 = vst [vmem:[%s7254_s17 + $0xa0] sm:$0xff] %v4244_v35  ;;  %v4247_v55 = vadd.f32 %v7249_v3, %v4246_v16 }
 0x378   : > { %4313 = vst [vmem:[%s7254_s17 + $0xb8] sm:$0xff] %v4255_v22 }
 0x379   : > { %4311 = vst [vmem:[%s7254_s17 + $0xa8] sm:$0xff] %v4247_v55 }
 0x37b   : > { %v5217_v30 = vpop.f32.mrb[88].mxu1 }
 0x37c   : > { %v4268_v15 = vadd.f32 %v5217_v30, %v7249_v3  ;;  %v4259_v11 = vpop.f32.mrb[89].mxu1 }
 0x37d   : > { %v4260_v50 = vadd.f32 %v7249_v3, %v4259_v11  ;;  %v5218_v31 = vpop.f32.mrb[90].mxu1 }
 0x37e   : > { %4316 = vst [vmem:[%s7254_s17 + $0xd0] sm:$0xff] %v4268_v15  ;;  %v4271_v33 = vadd.f32 %v5218_v31, %v7249_v3  ;;  %v4262_v26 = vpop.f32.mrb[91].mxu1 }
 0x37f   : > { %4314 = vst [vmem:[%s7254_s17 + $0xc0] sm:$0xff] %v4260_v50  ;;  %v4263_v41 = vadd.f32 %v7249_v3, %v4262_v26 }
 0x380   : > { %4317 = vst [vmem:[%s7254_s17 + $0xd8] sm:$0xff] %v4271_v33 }
 0x381   : > { %4315 = vst [vmem:[%s7254_s17 + $0xc8] sm:$0xff] %v4263_v41 }
 0x384   : > { %v5221_v10 = vpop.f32.mrb[92].mxu1 }
 0x385   : > { %v4284_v12 = vadd.f32 %v5221_v10, %v7249_v3  ;;  %v4275_v56 = vpop.f32.mrb[93].mxu1 }
 0x386   : > { %v4276_v2 = vadd.f32 %v7249_v3, %v4275_v56  ;;  %v5222_v25 = vpop.f32.mrb[94].mxu1 }
 0x387   : > { %4320 = vst [vmem:[%s7254_s17 + $0xf0] sm:$0xff] %v4284_v12  ;;  %v4287_v60 = vadd.f32 %v5222_v25, %v7249_v3  ;;  %v4278_v20 = vpop.f32.mrb[95].mxu1 }
 0x388   : > { %4318 = vst [vmem:[%s7254_s17 + $0xe0] sm:$0xff] %v4276_v2  ;;  %v4279_v29 = vadd.f32 %v7249_v3, %v4278_v20 }
 0x389   : > { %4321 = vst [vmem:[%s7254_s17 + $0xf8] sm:$0xff] %v4287_v60 }
 0x38a   : > { %4319 = vst [vmem:[%s7254_s17 + $0xe8] sm:$0xff] %v4279_v29 }
 0x38b PF: > { %s18_s18 = sadd.s32 1, %s5807_s18  }
 0x38c   : > { %p15_p6 = scmp.ge.s32.totalorder %s18_s18, 4  }
 0x38e   :  { %17 = sbr.rel (!%p15_p6) target bundleno = 3 (0x3), region = 95 }
 0x395   :  { %4343 = vsyncpa [#allocation3], 1 }
 0x396   :  { %4345 = vsyncpa [#allocation3 + $0x1], 1 }
 0x397   :  { %4346 = vsyncpa [#allocation5], 1 }
 0x398   :  { %4347 = vsyncpa [#allocation8], 1 }

// kernel: c3dcn_forward.6
= control target key start
LH: loop header
LB: loop body
LE: loop exit
PB: predicated region body
PF: predicated region fallthrough
CT: control target
= control target key end

     0   :  { %s1281_s15 = smov 0   ;;  %s1448_s0 = inlined_call_operand.vmem [shape: bf16[512,16], index: 0, kind: input, shape index: {}]   ;;  %s1449_s1 = inlined_call_operand.vmem [shape: bf16[512,128], index: 1, kind: input, shape index: {}, may-alias: {1,4}]   ;;  %s1450_s2 = inlined_call_operand.vmem [shape: bf16[16,128], index: 2, kind: input, shape index: {}]   ;;  %s1451_s3 = inlined_call_operand.vmem [shape: f32[1,128], index: 3, kind: input, shape index: {}]   ;;  %s1452_s4 = inlined_call_operand.vmem [shape: bf16[512,128], index: 4, kind: output, shape index: {}, may-alias: {1,4}]  }
   0x1 LB: > { %s885_s16 = sadd.s32 4294967295, %s1254_s15   ;;  %p889_p0 = scmp.ge.s32.totalorder %s1254_s15, 1  ;;  %s1254_s15 = sphi %s1281_s15, %s14_s15  }
   0x2   : > { %p174_p1 = scmp.lt.s32.totalorder %s1254_s15, 3 }
   0x4   : > { %p175_p2 = pnand %p889_p0, %p174_p1 }
   0x5   : > { %v1231_v0 = vld [vmem:[%s1450_s2] sm:$0xff] (!%p175_p2)   ;;  %s890_s19 = sshll.u32 (!%p175_p2), %s885_s16, 5  ;;  %vm351_vm0 = vcmask (!%p175_p2), 130048  }
   0x6   : > { %178 = sbr.rel (%p175_p2) target bundleno = 265 (0x109), region = 36  ;;  %p206_p3 = scmp.lt.s32.totalorder (!%p175_p2), %s890_s19, 63  ;;  %1187 = vmatprep.subr.bf16.mxu0 (!%p175_p2), %v1231_v0  ;;  %1221 = vmatprep.subr.bf16.mxu1 (!%p175_p2), %v1231_v0  ;;  %v1342_v18 = vld [vmem:[%s1451_s3] ss:$0 sm:$0xff] (!%p175_p2) }
   0x7   : > { %1188 = vmatpush3.bf16.msra.mxu0 (!%p175_p2), %v1231_v0  ;;  %1222 = vmatpush3.bf16.msra.mxu1 (!%p175_p2), %v1231_v0 }
   0xd   : > { %s1454_s19 = smov (!%p206_p3, %s890_s19), 63 }
   0xe   : > { %s1292_s20 = sshll.u32 %s1454_s19, 2 }
   0xf   : > { %s1298_s23 = scalar_lea.vmem %s1448_s0, %s1292_s20  ;;  %s1336_s26 = scalar_lea.vmem %s1449_s1, %s1292_s20 }
  0x10   : > { %v1232_v1 = vld [vmem:[%s1298_s23] sm:$0xff]   ;;  %v1234_v3 = vld [vmem:[%s1298_s23 + $0x8] sm:$0xff]   ;;  %v1236_v5 = vld [vmem:[%s1298_s23 + $0x10] sm:$0xff]   ;;  %s1384_s5 = scalar_lea.vmem %s1452_s4, %s1292_s20 }
  0x11   : > { %v1233_v2 = vld [vmem:[%s1298_s23 + $0x40] sm:$0xff]   ;;  %1189 = vmatprep.mubr.msk.bf16.mxu0 %vm351_vm0, %v1232_v1  ;;  %v1235_v4 = vld [vmem:[%s1298_s23 + $0x48] sm:$0xff]   ;;  %v1237_v6 = vld [vmem:[%s1298_s23 + $0x50] sm:$0xff]  }
  0x12   : > { %1205 = vmatprep.mubr.msk.bf16.mxu1 %vm351_vm0, %v1233_v2  ;;  %1190 = vmatmul.mubr.msk.bf16.vlgmr.msra.gmra.mrb[0].mxu0 %vm351_vm0, %v1234_v3  ;;  %v1238_v7 = vld [vmem:[%s1298_s23 + $0x18] sm:$0xff]   ;;  %v1240_v9 = vld [vmem:[%s1298_s23 + $0x20] sm:$0xff]   ;;  %v1242_v11 = vld [vmem:[%s1298_s23 + $0x28] sm:$0xff]  }
  0x13   : > { %1206 = vmatmul.mubr.msk.bf16.vlgmr.msra.gmra.mrb[0].mxu1 %vm351_vm0, %v1235_v4  ;;  %1193 = vmatprep.mubr.msk.bf16.mxu0 %vm351_vm0, %v1236_v5  ;;  %v1239_v8 = vld [vmem:[%s1298_s23 + $0x58] sm:$0xff]   ;;  %v1241_v10 = vld [vmem:[%s1298_s23 + $0x60] sm:$0xff]   ;;  %v1243_v12 = vld [vmem:[%s1298_s23 + $0x68] sm:$0xff]  }
  0x14   : > { %1209 = vmatprep.mubr.msk.bf16.mxu1 %vm351_vm0, %v1237_v6  ;;  %v1244_v13 = vld [vmem:[%s1298_s23 + $0x30] sm:$0xff]   ;;  %v1246_v15 = vld [vmem:[%s1298_s23 + $0x38] sm:$0xff]   ;;  %v1140_v17 = vld [vmem:[%s1336_s26 + $0x8] sm:$0xff]  }
  0x15   : > { %v1245_v14 = vld [vmem:[%s1298_s23 + $0x70] sm:$0xff]   ;;  %v1247_v16 = vld [vmem:[%s1298_s23 + $0x78] sm:$0xff]   ;;  %v1148_v19 = vld [vmem:[%s1336_s26 + $0x48] sm:$0xff]   ;;  %v1002_v22 = vunpack.c.l.bf16 %v1140_v17  ;;  %v1003_v29 = vunpack.c.h.bf16 %v1140_v17 }
  0x16   : > { %v997_v20 = vld [vmem:[%s1336_s26] sm:$0xff]   ;;  %v1034_v26 = vunpack.c.l.bf16 %v1148_v19  ;;  %v1035_v34 = vunpack.c.h.bf16 %v1148_v19  ;;  %v1142_v42 = vld [vmem:[%s1336_s26 + $0x18] sm:$0xff]   ;;  %v1141_v47 = vld [vmem:[%s1336_s26 + $0x10] sm:$0xff]  }
  0x17   : > { %v1147_v23 = vld [vmem:[%s1336_s26 + $0x40] sm:$0xff]   ;;  %v998_v28 = vunpack.c.l.bf16 %v997_v20  ;;  %v999_v35 = vunpack.c.h.bf16 %v997_v20  ;;  %v1150_v43 = vld [vmem:[%s1336_s26 + $0x58] sm:$0xff]   ;;  %v1149_v48 = vld [vmem:[%s1336_s26 + $0x50] sm:$0xff]   ;;  %v1010_v6 = vunpack.c.l.bf16 %v1142_v42  ;;  %v1007_v20 = vunpack.c.h.bf16 %v1141_v47 }
  0x18   : > { %v1030_v37 = vunpack.c.l.bf16 %v1147_v23  ;;  %v1031_v41 = vunpack.c.h.bf16 %v1147_v23  ;;  %v1359_v49 = vld [vmem:[%s1336_s26 + $0x28] sm:$0xff]   ;;  %v1366_v54 = vld [vmem:[%s1336_s26 + $0x20] sm:$0xff]   ;;  %v1372_v56 = vld [vmem:[%s1336_s26 + $0x38] sm:$0xff]   ;;  %v1043_v19 = vunpack.c.h.bf16 %v1150_v43 }
  0x19   : > { %v1362_v50 = vld [vmem:[%s1336_s26 + $0x68] sm:$0xff]   ;;  %v1369_v55 = vld [vmem:[%s1336_s26 + $0x60] sm:$0xff]   ;;  %v1375_v61 = vld [vmem:[%s1336_s26 + $0x78] sm:$0xff]  }
  0x1a   : > { %1194 = vmatmul.mubr.msk.bf16.gmra.mrb[4].mxu0 %vm351_vm0, %v1238_v7  ;;  %v1378_v62 = vld [vmem:[%s1336_s26 + $0x30] sm:$0xff]   ;;  %v1042_v7 = vunpack.c.l.bf16 %v1150_v43  ;;  %v1018_v43 = vunpack.c.l.bf16 %v1359_v49 }
  0x1b   : > { %1210 = vmatmul.mubr.msk.bf16.gmra.mrb[4].mxu1 %vm351_vm0, %v1239_v8  ;;  %1197 = vmatprep.mubr.msk.bf16.mxu0 %vm351_vm0, %v1240_v9  ;;  %v1387_v63 = vld [vmem:[%s1336_s26 + $0x70] sm:$0xff]  }
  0x1c   : > { %1213 = vmatprep.mubr.msk.bf16.mxu1 %vm351_vm0, %v1241_v10 }
  0x22   : > { %1198 = vmatmul.mubr.msk.bf16.gmra.mrb[8].mxu0 %vm351_vm0, %v1242_v11 }
  0x23   : > { %1214 = vmatmul.mubr.msk.bf16.gmra.mrb[8].mxu1 %vm351_vm0, %v1243_v12  ;;  %1201 = vmatprep.mubr.msk.bf16.mxu0 %vm351_vm0, %v1244_v13  ;;  %v1006_v12 = vunpack.c.l.bf16 %v1141_v47  ;;  %v1011_v13 = vunpack.c.h.bf16 %v1142_v42 }
  0x24   : > { %1217 = vmatprep.mubr.msk.bf16.mxu1 %vm351_vm0, %v1245_v14 }
  0x2a   : > { %1202 = vmatmul.mubr.msk.bf16.gmra.mrb[12].mxu0 %vm351_vm0, %v1246_v15 }
  0x2b   : > { %1218 = vmatmul.mubr.msk.bf16.gmra.mrb[12].mxu1 %vm351_vm0, %v1247_v16 }
  0xe5   : > { %v1191_v21 = vpop.f32.mrb[0].mxu0 }
  0xe6   : > { %v443_v24 = vadd.f32 %v1191_v21, %v1342_v18  ;;  %v1207_v25 = vpop.f32.mrb[0].mxu1  ;;  %v434_v27 = vpop.f32.mrb[1].mxu0 }
  0xe7   : > { %v507_v30 = vadd.f32 %v1207_v25, %v1342_v18  ;;  %v435_v31 = vadd.f32 %v1342_v18, %v434_v27  ;;  %v498_v32 = vpop.f32.mrb[1].mxu1  ;;  %v1192_v33 = vpop.f32.mrb[2].mxu0 }
  0xe8   : > { %v499_v36 = vadd.f32 %v1342_v18, %v498_v32  ;;  %v446_v38 = vadd.f32 %v1192_v33, %v1342_v18  ;;  %v1208_v39 = vpop.f32.mrb[2].mxu1  ;;  %v437_v40 = vpop.f32.mrb[3].mxu0  ;;  %v627_v51 = vadd.f32 %v1002_v22, %v443_v24  ;;  %v1038_v22 = vunpack.c.l.bf16 %v1149_v48 }
  0xe9   : > { %v510_v44 = vadd.f32 %v1208_v39, %v1342_v18  ;;  %v438_v45 = vadd.f32 %v1342_v18, %v437_v40  ;;  %v501_v46 = vpop.f32.mrb[3].mxu1  ;;  %v643_v57 = vadd.f32 %v1034_v26, %v507_v30  ;;  %v625_v58 = vadd.f32 %v998_v28, %v435_v31 }
  0xea   : > { %v628_v52 = vadd.f32 %v1003_v29, %v446_v38  ;;  %v502_v53 = vadd.f32 %v1342_v18, %v501_v46  ;;  %v641_v0 = vadd.f32 %v1030_v37, %v499_v36  ;;  %v1039_v26 = vunpack.c.h.bf16 %v1149_v48 }
  0xeb   : > { %v644_v59 = vadd.f32 %v1035_v34, %v510_v44  ;;  %v626_v60 = vadd.f32 %v999_v35, %v438_v45  ;;  %v1050_v44 = vunpack.c.l.bf16 %v1362_v50 }
  0xec   : > { %v1068_v1 = vpack.c.bf16 %v628_v52, %v627_v51  ;;  %v642_v2 = vadd.f32 %v1031_v41, %v502_v53  ;;  %v1014_v51 = vunpack.c.l.bf16 %v1366_v54  ;;  %v1019_v52 = vunpack.c.h.bf16 %v1359_v49 }
  0xed   : > { %v1108_v3 = vpack.c.bf16 %v644_v59, %v643_v57  ;;  %v1063_v4 = vpack.c.bf16 %v626_v60, %v625_v58  ;;  %v1195_v5 = vpop.f32.mrb[4].mxu0  ;;  %v1051_v60 = vunpack.c.h.bf16 %v1362_v50 }
  0xee   : > { %v1103_v8 = vpack.c.bf16 %v642_v2, %v641_v0  ;;  %v459_v9 = vadd.f32 %v1195_v5, %v1342_v18  ;;  %v1211_v10 = vpop.f32.mrb[4].mxu1  ;;  %v450_v11 = vpop.f32.mrb[5].mxu0  ;;  %1155 = vst [vmem:[%s1384_s5 + $0x8] sm:$0xff] %v1068_v1   ;;  %v1015_v0 = vunpack.c.h.bf16 %v1366_v54  ;;  %v1046_v2 = vunpack.c.l.bf16 %v1369_v55 }
  0xef   : > { %v523_v14 = vadd.f32 %v1211_v10, %v1342_v18  ;;  %v451_v15 = vadd.f32 %v1342_v18, %v450_v11  ;;  %v514_v16 = vpop.f32.mrb[5].mxu1  ;;  %v1196_v17 = vpop.f32.mrb[6].mxu0  ;;  %1064 = vst [vmem:[%s1384_s5] sm:$0xff] %v1063_v4   ;;  %1163 = vst [vmem:[%s1384_s5 + $0x48] sm:$0xff] %v1108_v3   ;;  %v1047_v5 = vunpack.c.h.bf16 %v1369_v55 }
  0xf0   : > { %v515_v21 = vadd.f32 %v1342_v18, %v514_v16  ;;  %v462_v23 = vadd.f32 %v1196_v17, %v1342_v18  ;;  %v1212_v24 = vpop.f32.mrb[6].mxu1  ;;  %v453_v25 = vpop.f32.mrb[7].mxu0  ;;  %1162 = vst [vmem:[%s1384_s5 + $0x40] sm:$0xff] %v1103_v8   ;;  %v631_v30 = vadd.f32 %v1010_v6, %v459_v9 }
  0xf1   : > { %v526_v27 = vadd.f32 %v1212_v24, %v1342_v18  ;;  %v454_v28 = vadd.f32 %v1342_v18, %v453_v25  ;;  %v517_v29 = vpop.f32.mrb[7].mxu1  ;;  %v647_v33 = vadd.f32 %v1042_v7, %v523_v14  ;;  %v629_v34 = vadd.f32 %v1006_v12, %v451_v15 }
  0xf2   : > { %v632_v31 = vadd.f32 %v1011_v13, %v462_v23  ;;  %v518_v32 = vadd.f32 %v1342_v18, %v517_v29  ;;  %v645_v37 = vadd.f32 %v1038_v22, %v515_v21  ;;  %v1058_v21 = vunpack.c.l.bf16 %v1375_v61 }
  0xf3   : > { %v648_v35 = vadd.f32 %v1043_v19, %v526_v27  ;;  %v630_v36 = vadd.f32 %v1007_v20, %v454_v28  ;;  %v1026_v20 = vunpack.c.l.bf16 %v1372_v56  ;;  %v1027_v27 = vunpack.c.h.bf16 %v1372_v56 }
  0xf4   : > { %v1078_v38 = vpack.c.bf16 %v632_v31, %v631_v30  ;;  %v646_v39 = vadd.f32 %v1039_v26, %v518_v32  ;;  %v1022_v26 = vunpack.c.l.bf16 %v1378_v62  ;;  %v1059_v32 = vunpack.c.h.bf16 %v1375_v61 }
  0xf5   : > { %v1118_v40 = vpack.c.bf16 %v648_v35, %v647_v33  ;;  %v1073_v41 = vpack.c.bf16 %v630_v36, %v629_v34  ;;  %v1199_v42 = vpop.f32.mrb[8].mxu0  ;;  %v1023_v33 = vunpack.c.h.bf16 %v1378_v62  ;;  %v1054_v35 = vunpack.c.l.bf16 %v1387_v63 }
  0xf6   : > { %v1113_v45 = vpack.c.bf16 %v646_v39, %v645_v37  ;;  %v475_v46 = vadd.f32 %v1199_v42, %v1342_v18  ;;  %v1215_v47 = vpop.f32.mrb[8].mxu1  ;;  %v466_v48 = vpop.f32.mrb[9].mxu0  ;;  %1157 = vst [vmem:[%s1384_s5 + $0x18] sm:$0xff] %v1078_v38   ;;  %v1055_v38 = vunpack.c.h.bf16 %v1387_v63 }
  0xf7   : > { %v539_v53 = vadd.f32 %v1215_v47, %v1342_v18  ;;  %v467_v57 = vadd.f32 %v1342_v18, %v466_v48  ;;  %v530_v58 = vpop.f32.mrb[9].mxu1  ;;  %v1200_v59 = vpop.f32.mrb[10].mxu0  ;;  %1156 = vst [vmem:[%s1384_s5 + $0x10] sm:$0xff] %v1073_v41   ;;  %1165 = vst [vmem:[%s1384_s5 + $0x58] sm:$0xff] %v1118_v40  }
  0xf8   : > { %v531_v1 = vadd.f32 %v1342_v18, %v530_v58  ;;  %v478_v49 = vadd.f32 %v1200_v59, %v1342_v18  ;;  %v1216_v3 = vpop.f32.mrb[10].mxu1  ;;  %v469_v4 = vpop.f32.mrb[11].mxu0  ;;  %1164 = vst [vmem:[%s1384_s5 + $0x50] sm:$0xff] %v1113_v45   ;;  %v635_v8 = vadd.f32 %v1018_v43, %v475_v46 }
  0xf9   : > { %v542_v6 = vadd.f32 %v1216_v3, %v1342_v18  ;;  %v470_v7 = vadd.f32 %v1342_v18, %v469_v4  ;;  %v533_v50 = vpop.f32.mrb[11].mxu1  ;;  %v651_v10 = vadd.f32 %v1050_v44, %v539_v53  ;;  %v633_v11 = vadd.f32 %v1014_v51, %v467_v57 }
  0xfa   : > { %v636_v54 = vadd.f32 %v1019_v52, %v478_v49  ;;  %v534_v9 = vadd.f32 %v1342_v18, %v533_v50  ;;  %v649_v14 = vadd.f32 %v1046_v2, %v531_v1 }
  0xfb   : > { %v652_v12 = vadd.f32 %v1051_v60, %v542_v6  ;;  %v634_v13 = vadd.f32 %v1015_v0, %v470_v7 }
  0xfc   : > { %v1088_v15 = vpack.c.bf16 %v636_v54, %v635_v8  ;;  %v650_v16 = vadd.f32 %v1047_v5, %v534_v9 }
  0xfd   : > { %v1128_v55 = vpack.c.bf16 %v652_v12, %v651_v10  ;;  %v1083_v17 = vpack.c.bf16 %v634_v13, %v633_v11  ;;  %v1203_v19 = vpop.f32.mrb[12].mxu0 }
  0xfe   : > { %v1123_v22 = vpack.c.bf16 %v650_v16, %v649_v14  ;;  %v491_v23 = vadd.f32 %v1203_v19, %v1342_v18  ;;  %v1219_v24 = vpop.f32.mrb[12].mxu1  ;;  %v482_v25 = vpop.f32.mrb[13].mxu0  ;;  %1159 = vst [vmem:[%s1384_s5 + $0x28] sm:$0xff] %v1088_v15  }
  0xff   : > { %v555_v28 = vadd.f32 %v1219_v24, %v1342_v18  ;;  %v483_v29 = vadd.f32 %v1342_v18, %v482_v25  ;;  %v546_v30 = vpop.f32.mrb[13].mxu1  ;;  %1158 = vst [vmem:[%s1384_s5 + $0x20] sm:$0xff] %v1083_v17   ;;  %1167 = vst [vmem:[%s1384_s5 + $0x68] sm:$0xff] %v1128_v55   ;;  %v1204_v31 = vpop.f32.mrb[14].mxu0 }
 0x100   : > { %v547_v34 = vadd.f32 %v1342_v18, %v546_v30  ;;  %1166 = vst [vmem:[%s1384_s5 + $0x60] sm:$0xff] %v1123_v22   ;;  %v494_v36 = vadd.f32 %v1204_v31, %v1342_v18  ;;  %v1220_v56 = vpop.f32.mrb[14].mxu1  ;;  %v485_v37 = vpop.f32.mrb[15].mxu0  ;;  %v639_v62 = vadd.f32 %v1026_v20, %v491_v23 }
 0x101   : > { %v558_v39 = vadd.f32 %v1220_v56, %v1342_v18  ;;  %v486_v40 = vadd.f32 %v1342_v18, %v485_v37  ;;  %v549_v61 = vpop.f32.mrb[15].mxu1  ;;  %v655_v43 = vadd.f32 %v1058_v21, %v555_v28  ;;  %v637_v44 = vadd.f32 %v1022_v26, %v483_v29 }
 0x102   : > { %v640_v41 = vadd.f32 %v1027_v27, %v494_v36  ;;  %v550_v42 = vadd.f32 %v1342_v18, %v549_v61  ;;  %v653_v47 = vadd.f32 %v1054_v35, %v547_v34 }
 0x103   : > { %v656_v45 = vadd.f32 %v1059_v32, %v558_v39  ;;  %v638_v46 = vadd.f32 %v1023_v33, %v486_v40 }
 0x104   : > { %v1098_v48 = vpack.c.bf16 %v640_v41, %v639_v62  ;;  %v654_v63 = vadd.f32 %v1055_v38, %v550_v42 }
 0x105   : > { %v1138_v51 = vpack.c.bf16 %v656_v45, %v655_v43  ;;  %v1093_v52 = vpack.c.bf16 %v638_v46, %v637_v44 }
 0x106   : > { %1161 = vst [vmem:[%s1384_s5 + $0x38] sm:$0xff] %v1098_v48   ;;  %v1133_v53 = vpack.c.bf16 %v654_v63, %v653_v47 }
 0x107   : > { %1169 = vst [vmem:[%s1384_s5 + $0x78] sm:$0xff] %v1138_v51   ;;  %1160 = vst [vmem:[%s1384_s5 + $0x30] sm:$0xff] %v1093_v52  }
 0x108   : > { %1168 = vst [vmem:[%s1384_s5 + $0x70] sm:$0xff] %v1133_v53  }
 0x109 PF: > { %s14_s15 = sadd.s32 1, %s1254_s15  }
 0x10a   : > { %p11_p4 = scmp.ge.s32.totalorder %s14_s15, 4  }
 0x10c   :  { %13 = sbr.rel (!%p11_p4) target bundleno = 1 (0x1), region = 69 }

// kernel: c3dcn_forward.7
= control target key start
LH: loop header
LB: loop body
LE: loop exit
PB: predicated region body
PF: predicated region fallthrough
CT: control target
= control target key end

     0   :  { %8 = vsyncpa [#allocation3], 0  ;;  %s1681_s0 = inlined_call_operand.vmem [shape: bf16[512,128], index: 0, kind: input, shape index: {}]   ;;  %s1682_s1 = inlined_call_operand.vmem [shape: bf16[128,128], index: 1, kind: input, shape index: {}]   ;;  %s1683_s2 = inlined_call_operand.vmem [shape: f32[1,128], index: 2, kind: input, shape index: {}]   ;;  %s1684_s3 = inlined_call_operand.hbm [shape: f32[512,128], index: 3, kind: output, shape index: {}]  }
   0x1   :  { %10 = vsyncpa [#allocation3 + $0x1], 0  ;;  %s1303_s12 = smov 0   ;;  %s1305_s13 = smov 0  }
   0x2   :  { %s1307_s14 = smov 0   ;;  %s1309_s15 = smov 0  }
   0x3 LB: > { %s1324_s16 = sadd.s32 4294967295, %s1278_s15   ;;  %s865_s17 = sadd.s32 4294967294, %s1278_s15   ;;  %s1278_s15 = sphi %s1309_s15, %s1690_s15   ;;  %s1274_s14 = sphi %s1307_s14, %s1689_s14   ;;  %s1270_s13 = sphi %s1305_s13, %s1688_s13   ;;  %s1266_s12 = sphi %s1303_s12, %s1687_s12  }
   0x4   : > { %s1328_s18 = sadd.s32 1, %s1278_s15   ;;  %s91_s19 = sadd.s32 1, %s1274_s14 }
   0x5   : > { %s88_s20 = ssub.s32 %s1278_s15, %s1328_s18  ;;  %p101_p0 = scmp.ne.s32.totalorder %s1274_s14, %s1270_s13 }
   0x6   : > { %p89_p1 = scmp.eq.s32.totalorder %s88_s20, 0  ;;  %p102_p2 = scmp.eq.s32.totalorder %s1324_s16, 1 }
   0x7   : > { %p107_p3 = scmp.ne.s32.totalorder %s1270_s13, %s1266_s12  ;;  %p108_p4 = scmp.eq.s32.totalorder %s865_s17, 1 }
   0x8   : > { %s1339_s21 = scalar_select %p89_p1, %s1274_s14, %s91_s19  }
   0x9   : > { %p1341_p5 = por %p102_p2, %p101_p0  ;;  %p1345_p6 = por %p108_p4, %p107_p3 }
   0xa   : > { %p868_p7 = scmp.ge.s32.totalorder %s1278_s15, 1  ;;  %p141_p8 = scmp.lt.s32.totalorder %s1278_s15, 3 }
   0xc   : > { %p142_p9 = pnand %p868_p7, %p141_p8 }
   0xd   : > { %v1064_v0 = vld [vmem:[%s1682_s1] sm:$0xff] (!%p142_p9)   ;;  %s870_s26 = sshll.u32 (!%p142_p9), %s1324_s16, 5  ;;  %v1065_v1 = vld [vmem:[%s1682_s1 + $0x8] sm:$0xff] (!%p142_p9)   ;;  %v1066_v2 = vld [vmem:[%s1682_s1 + $0x10] sm:$0xff] (!%p142_p9)   ;;  %s162_s29 = sand.u32 (!%p142_p9), 1, %s1270_s13  }
   0xe   : > { %145 = sbr.rel (%p142_p9) target bundleno = 362 (0x16a), region = 32  ;;  %p166_p10 = scmp.lt.s32.totalorder (!%p142_p9), %s870_s26, 63  ;;  %959 = vmatprep.subr.bf16.mxu0 (!%p142_p9), %v1064_v0  ;;  %1007 = vmatprep.subr.bf16.mxu1 (!%p142_p9), %v1064_v0  ;;  %v1067_v3 = vld [vmem:[%s1682_s1 + $0x18] sm:$0xff] (!%p142_p9)   ;;  %v1068_v6 = vld [vmem:[%s1682_s1 + $0x20] sm:$0xff] (!%p142_p9)   ;;  %v1069_v7 = vld [vmem:[%s1682_s1 + $0x28] sm:$0xff] (!%p142_p9)  }
   0xf   : > { %960 = vmatpush3.bf16.msra.mxu0 (!%p142_p9), %v1064_v0  ;;  %1015 = vmatpush3.bf16.msra.mxu1 (!%p142_p9), %v1064_v0  ;;  %v1070_v8 = vld [vmem:[%s1682_s1 + $0x30] sm:$0xff] (!%p142_p9)   ;;  %v1071_v9 = vld [vmem:[%s1682_s1 + $0x38] sm:$0xff] (!%p142_p9)   ;;  %v1400_v24 = vld [vmem:[%s1683_s2] ss:$0 sm:$0xff] (!%p142_p9)  ;;  %s1469_s30 = sshll.u32 (!%p142_p9), %s162_s29, 8  ;;  %s934_s5 = sshll.u32 (!%p142_p9), %s1324_s16, 12 }
  0x10   : > { %961 = vmatprep.subr.bf16.mxu0 (!%p142_p9), %v1065_v1  ;;  %1008 = vmatprep.subr.bf16.mxu1 (!%p142_p9), %v1065_v1  ;;  %s1630_s16 = scalar_lea.hbm (!%p142_p9), %s1684_s3, %s934_s5  ;;  %s1640_s9 = scalar_lea.sflag (!%p142_p9), [#allocation3], %s162_s29 }
  0x11   : > { %s1280_s11 = smov (!%p142_p9), [#allocation2]  }
  0x12   : > { %s1220_s17 = sshll.u32 (!%p142_p9), %s1280_s11, 4  ;;  %s1221_s17 = int_to_ptr.vmem [resolvable:$false] %s1220_s17 }
  0x13   : > { %962 = vmatpush3.bf16.msra.mxu0 (!%p142_p9), %v1065_v1  ;;  %1016 = vmatpush3.bf16.msra.mxu1 (!%p142_p9), %v1065_v1  ;;  %s1222_s19 = scalar_lea.vmem (!%p142_p9), %s1221_s17, 8192 }
  0x14   : > { %963 = vmatprep.subr.bf16.mxu0 (!%p142_p9), %v1066_v2  ;;  %1009 = vmatprep.subr.bf16.mxu1 (!%p142_p9), %v1066_v2 }
  0x15   : > { %s1692_s26 = smov (!%p166_p10, %s870_s26), 63 }
  0x16   : > { %s871_s4 = sshll.u32 %s1692_s26, 2 }
  0x17   : > { %s1364_s7 = scalar_lea.vmem %s1681_s0, %s871_s4  ;;  %964 = vmatpush3.bf16.msra.mxu0 %v1066_v2  ;;  %1017 = vmatpush3.bf16.msra.mxu1 %v1066_v2  ;;  %s1508_s4 = scalar_lea.vmem [#allocation2], %s1469_s30 }
  0x18   : > { %v1072_v4 = vld [vmem:[%s1364_s7] sm:$0xff]   ;;  %965 = vmatprep.subr.bf16.mxu0 %v1067_v3  ;;  %1010 = vmatprep.subr.bf16.mxu1 %v1067_v3  ;;  %v1074_v10 = vld [vmem:[%s1364_s7 + $0x8] sm:$0xff]   ;;  %v1076_v12 = vld [vmem:[%s1364_s7 + $0x10] sm:$0xff]   ;;  %s803_s6 = sshll.u32 %s1508_s4, 4  ;;  %s1632_s6 = int_to_ptr.vmem [resolvable:$true] %s803_s6 }
  0x19   : > { %v1073_v5 = vld [vmem:[%s1364_s7 + $0x40] sm:$0xff]   ;;  %975 = vmatprep.mubr.bf16.mxu0 %v1072_v4  ;;  %v1075_v11 = vld [vmem:[%s1364_s7 + $0x48] sm:$0xff]   ;;  %v1077_v13 = vld [vmem:[%s1364_s7 + $0x50] sm:$0xff]   ;;  %s1216_s10 = scalar_lea.vmem %s1632_s6, 4096  ;;  %p1223_p0 = scmp.lt.s32.totalorder %s1632_s6, %s1221_s17 }
  0x1a   : > { %991 = vmatprep.mubr.bf16.mxu1 %v1073_v5  ;;  %v1078_v14 = vld [vmem:[%s1364_s7 + $0x18] sm:$0xff]   ;;  %v1080_v16 = vld [vmem:[%s1364_s7 + $0x20] sm:$0xff]   ;;  %v1082_v18 = vld [vmem:[%s1364_s7 + $0x28] sm:$0xff]   ;;  %p1217_p11 = scmp.ne.s32.totalorder %s1632_s6, %s1216_s10  ;;  %p1224_p1 = scmp.lt.s32.totalorder %s1222_s19, %s1216_s10 }
  0x1b   : > { %966 = vmatpush3.bf16.msra.mxu0 %v1067_v3  ;;  %1018 = vmatpush3.bf16.msra.mxu1 %v1067_v3  ;;  %v1079_v15 = vld [vmem:[%s1364_s7 + $0x58] sm:$0xff]   ;;  %v1081_v17 = vld [vmem:[%s1364_s7 + $0x60] sm:$0xff]   ;;  %v1083_v19 = vld [vmem:[%s1364_s7 + $0x68] sm:$0xff]  }
  0x1c   : > { %967 = vmatprep.subr.bf16.mxu0 %v1068_v6  ;;  %1011 = vmatprep.subr.bf16.mxu1 %v1068_v6  ;;  %v1084_v20 = vld [vmem:[%s1364_s7 + $0x30] sm:$0xff]   ;;  %v1086_v22 = vld [vmem:[%s1364_s7 + $0x38] sm:$0xff]   ;;  %p1218_p12 = pnand %p1217_p11, %p1341_p5  ;;  %p1225_p2 = por %p1224_p1, %p1223_p0 }
  0x1d   : > { %v1085_v21 = vld [vmem:[%s1364_s7 + $0x70] sm:$0xff]   ;;  %v1087_v23 = vld [vmem:[%s1364_s7 + $0x78] sm:$0xff]  }
  0x1e   : > { %p1219_p13 = pneg %p1218_p12 }
  0x1f   : > { %968 = vmatpush3.bf16.msra.mxu0 %v1068_v6  ;;  %1019 = vmatpush3.bf16.msra.mxu1 %v1068_v6 }
  0x20   : > { %969 = vmatprep.subr.bf16.mxu0 %v1069_v7  ;;  %1012 = vmatprep.subr.bf16.mxu1 %v1069_v7  ;;  %p1226_p3 = pnand %p1225_p2, %p1219_p13 }
  0x23   : > { %970 = vmatpush3.bf16.msra.mxu0 %v1069_v7  ;;  %1020 = vmatpush3.bf16.msra.mxu1 %v1069_v7 }
  0x24   : > { %971 = vmatprep.subr.bf16.mxu0 %v1070_v8  ;;  %1013 = vmatprep.subr.bf16.mxu1 %v1070_v8 }
  0x27   : > { %972 = vmatpush3.bf16.msra.mxu0 %v1070_v8  ;;  %1021 = vmatpush3.bf16.msra.mxu1 %v1070_v8 }
  0x28   : > { %973 = vmatprep.subr.bf16.mxu0 %v1071_v9  ;;  %1014 = vmatprep.subr.bf16.mxu1 %v1071_v9 }
  0x2b   : > { %974 = vmatpush3.bf16.msra.mxu0 %v1071_v9  ;;  %1022 = vmatpush3.bf16.msra.mxu1 %v1071_v9 }
  0x2e   : > { %976 = vmatmul.mubr.bf16.vlgmr.msra.gmra.mrb[0].mxu0 %v1074_v10  ;;  %992 = vmatmul.mubr.bf16.vlgmr.msra.gmra.mrb[0].mxu1 %v1075_v11 }
  0x2f   : > { %979 = vmatprep.mubr.bf16.mxu0 %v1076_v12  ;;  %995 = vmatprep.mubr.bf16.mxu1 %v1077_v13 }
  0x36   : > { %980 = vmatmul.mubr.bf16.gmra.mrb[4].mxu0 %v1078_v14  ;;  %996 = vmatmul.mubr.bf16.gmra.mrb[4].mxu1 %v1079_v15 }
  0x37   : > { %983 = vmatprep.mubr.bf16.mxu0 %v1080_v16  ;;  %999 = vmatprep.mubr.bf16.mxu1 %v1081_v17 }
  0x3e   : > { %984 = vmatmul.mubr.bf16.gmra.mrb[8].mxu0 %v1082_v18  ;;  %1000 = vmatmul.mubr.bf16.gmra.mrb[8].mxu1 %v1083_v19 }
  0x3f   : > { %987 = vmatprep.mubr.bf16.mxu0 %v1084_v20  ;;  %1003 = vmatprep.mubr.bf16.mxu1 %v1085_v21 }
  0x46   : > { %988 = vmatmul.mubr.bf16.gmra.mrb[12].mxu0 %v1086_v22  ;;  %1004 = vmatmul.mubr.bf16.gmra.mrb[12].mxu1 %v1087_v23 }
 0x101   : > { %v977_v25 = vpop.f32.mrb[0].mxu0  ;;  %v993_v26 = vpop.f32.mrb[0].mxu1 }
 0x102   : > { %v1403_v27 = vadd.f32 %v977_v25, %v1400_v24  ;;  %v1406_v28 = vadd.f32 %v993_v26, %v1400_v24  ;;  %v406_v29 = vpop.f32.mrb[1].mxu0  ;;  %v470_v30 = vpop.f32.mrb[1].mxu1 }
 0x103   : > { %v1409_v31 = vadd.f32 %v1400_v24, %v406_v29  ;;  %v1412_v32 = vadd.f32 %v1400_v24, %v470_v30  ;;  %v978_v33 = vpop.f32.mrb[2].mxu0  ;;  %v994_v34 = vpop.f32.mrb[2].mxu1 }
 0x104   : > { %v899_v35 = vmul.f32 -1.442695, %v1403_v27  ;;  %v915_v36 = vmul.f32 -1.442695, %v1406_v28  ;;  %v1417_v37 = vadd.f32 %v978_v33, %v1400_v24  ;;  %v1420_v38 = vadd.f32 %v994_v34, %v1400_v24  ;;  %v409_v39 = vpop.f32.mrb[3].mxu0  ;;  %v473_v40 = vpop.f32.mrb[3].mxu1 }
 0x105   : > { %v897_v41 = vmul.f32 -1.442695, %v1409_v31  ;;  %v913_v42 = vmul.f32 -1.442695, %v1412_v32  ;;  %v1425_v43 = vadd.f32 %v1400_v24, %v409_v39  ;;  %v1428_v44 = vadd.f32 %v1400_v24, %v473_v40 }
 0x106   : > { %1088 = vpow2.f32 %v899_v35  ;;  %v900_v45 = vmul.f32 -1.442695, %v1417_v37  ;;  %v916_v46 = vmul.f32 -1.442695, %v1420_v38 }
 0x107   : > { %1090 = vpow2.f32 %v915_v36  ;;  %v898_v47 = vmul.f32 -1.442695, %v1425_v43  ;;  %v914_v48 = vmul.f32 -1.442695, %v1428_v44 }
 0x108   : > { %1092 = vpow2.f32 %v897_v41 }
 0x109   : > { %1094 = vpow2.f32 %v913_v42  ;;  %v981_v49 = vpop.f32.mrb[4].mxu0  ;;  %v997_v50 = vpop.f32.mrb[4].mxu1 }
 0x10a   : > { %1096 = vpow2.f32 %v900_v45  ;;  %v1435_v51 = vadd.f32 %v981_v49, %v1400_v24  ;;  %v1438_v52 = vadd.f32 %v997_v50, %v1400_v24  ;;  %v422_v53 = vpop.f32.mrb[5].mxu0  ;;  %v486_v54 = vpop.f32.mrb[5].mxu1 }
 0x10b   : > { %1098 = vpow2.f32 %v916_v46  ;;  %v1441_v55 = vadd.f32 %v1400_v24, %v422_v53  ;;  %v1444_v56 = vadd.f32 %v1400_v24, %v486_v54  ;;  %v982_v57 = vpop.f32.mrb[6].mxu0  ;;  %v998_v58 = vpop.f32.mrb[6].mxu1 }
 0x10c   : > { %1100 = vpow2.f32 %v898_v47  ;;  %v903_v59 = vmul.f32 -1.442695, %v1435_v51  ;;  %v919_v60 = vmul.f32 -1.442695, %v1438_v52  ;;  %v1449_v61 = vadd.f32 %v982_v57, %v1400_v24  ;;  %v425_v62 = vpop.f32.mrb[7].mxu0  ;;  %v489_v63 = vpop.f32.mrb[7].mxu1 }
 0x10d   : > { %1102 = vpow2.f32 %v914_v48  ;;  %v901_v0 = vmul.f32 -1.442695, %v1441_v55  ;;  %v917_v1 = vmul.f32 -1.442695, %v1444_v56  ;;  %v1462_v33 = vadd.f32 %v998_v58, %v1400_v24 }
 0x10e   : > { %1104 = vpow2.f32 %v903_v59  ;;  %v904_v2 = vmul.f32 -1.442695, %v1449_v61  ;;  %v1465_v36 = vadd.f32 %v1400_v24, %v425_v62  ;;  %v1472_v42 = vadd.f32 %v1400_v24, %v489_v63 }
 0x10f   : > { %1106 = vpow2.f32 %v919_v60  ;;  %v920_v58 = vmul.f32 -1.442695, %v1462_v33 }
 0x110   : > { %v1089_v3 = vpop.eup %1088  ;;  %1108 = vpow2.f32 %v901_v0 }
 0x111   : > { %v1091_v4 = vpop.eup %1090  ;;  %v631_v5 = vadd.f32 1.0, %v1089_v3  ;;  %1110 = vpow2.f32 %v917_v1  ;;  %v985_v6 = vpop.f32.mrb[8].mxu0  ;;  %v902_v1 = vmul.f32 -1.442695, %v1465_v36 }
 0x112   : > { %v1001_v7 = vpop.f32.mrb[8].mxu1  ;;  %v1093_v8 = vpop.eup %1092  ;;  %v647_v9 = vadd.f32 1.0, %v1091_v4  ;;  %1112 = vpow2.f32 %v904_v2  ;;  %v1477_v49 = vadd.f32 %v985_v6, %v1400_v24  ;;  %v918_v6 = vmul.f32 -1.442695, %v1472_v42 }
 0x113   : > { %v438_v10 = vpop.f32.mrb[9].mxu0  ;;  %v502_v11 = vpop.f32.mrb[9].mxu1  ;;  %1114 = vrcp.f32 %v631_v5  ;;  %v629_v13 = vadd.f32 1.0, %v1093_v8  ;;  %v1485_v59 = vadd.f32 %v1001_v7, %v1400_v24 }
 0x114   : > { %v1095_v12 = vpop.eup %1094  ;;  %v986_v14 = vpop.f32.mrb[10].mxu0  ;;  %1116 = vrcp.f32 %v647_v9  ;;  %v1493_v2 = vadd.f32 %v1400_v24, %v438_v10  ;;  %v1500_v7 = vadd.f32 %v1400_v24, %v502_v11 }
 0x115   : > { %v1454_v15 = vpop.f32.mrb[10].mxu1  ;;  %v1097_v16 = vpop.eup %1096  ;;  %v645_v17 = vadd.f32 1.0, %v1095_v12  ;;  %1118 = vrcp.f32 %v629_v13  ;;  %v907_v12 = vmul.f32 -1.442695, %v1477_v49  ;;  %v1505_v10 = vadd.f32 %v986_v14, %v1400_v24 }
 0x116   : > { %v1456_v18 = vpop.f32.mrb[11].mxu0  ;;  %v1099_v19 = vpop.eup %1098  ;;  %v632_v20 = vadd.f32 1.0, %v1097_v16  ;;  %v923_v11 = vmul.f32 -1.442695, %v1485_v59 }
 0x117   : > { %v1458_v21 = vpop.f32.mrb[11].mxu1  ;;  %v1101_v22 = vpop.eup %1100  ;;  %1120 = vrcp.f32 %v645_v17  ;;  %v648_v23 = vadd.f32 1.0, %v1099_v19  ;;  %v905_v17 = vmul.f32 -1.442695, %v1493_v2  ;;  %v1522_v19 = vadd.f32 %v1400_v24, %v1456_v18 }
 0x118   : > { %v1103_v25 = vpop.eup %1102  ;;  %1122 = vrcp.f32 %v632_v20  ;;  %v630_v26 = vadd.f32 1.0, %v1101_v22  ;;  %v1529_v22 = vadd.f32 %v1400_v24, %v1458_v21  ;;  %v908_v18 = vmul.f32 -1.442695, %v1505_v10 }
 0x119   : > { %v1105_v29 = vpop.eup %1104  ;;  %1124 = vrcp.f32 %v648_v23  ;;  %v646_v30 = vadd.f32 1.0, %v1103_v25  ;;  %v989_v39 = vpop.f32.mrb[12].mxu0 }
 0x11a   : > { %v1107_v34 = vpop.eup %1106  ;;  %1126 = vrcp.f32 %v630_v26  ;;  %v635_v35 = vadd.f32 1.0, %v1105_v29  ;;  %v1005_v45 = vpop.f32.mrb[12].mxu1  ;;  %v1535_v25 = vadd.f32 %v989_v39, %v1400_v24 }
 0x11b   : > { %v1109_v40 = vpop.eup %1108  ;;  %1128 = vrcp.f32 %v646_v30  ;;  %v651_v41 = vadd.f32 1.0, %v1107_v34  ;;  %v1474_v46 = vpop.f32.mrb[13].mxu0  ;;  %v1541_v29 = vadd.f32 %v1005_v45, %v1400_v24  ;;  %v906_v34 = vmul.f32 -1.442695, %v1522_v19 }
 0x11c   : > { %v1111_v47 = vpop.eup %1110  ;;  %1130 = vrcp.f32 %v635_v35  ;;  %v633_v48 = vadd.f32 1.0, %v1109_v40  ;;  %v1479_v50 = vpop.f32.mrb[13].mxu1 }
 0x11d   : > { %v1481_v53 = vpop.f32.mrb[14].mxu0  ;;  %v1113_v54 = vpop.eup %1112  ;;  %1132 = vrcp.f32 %v651_v41  ;;  %v649_v57 = vadd.f32 1.0, %v1111_v47 }
 0x11e   : > { %v1487_v60 = vpop.f32.mrb[14].mxu1  ;;  %v1489_v62 = vpop.f32.mrb[15].mxu0  ;;  %1134 = vrcp.f32 %v633_v48  ;;  %v636_v0 = vadd.f32 1.0, %v1113_v54 }
 0x11f   : > { %v1115_v63 = vpop.eup %1114  ;;  %v1495_v3 = vpop.f32.mrb[15].mxu1  ;;  %1136 = vrcp.f32 %v649_v57 }
 0x120   : > { %v1117_v4 = vpop.eup %1116  ;;  %v727_v5 = vmul.f32 %v1115_v63, %v1403_v27  ;;  %1138 = vrcp.f32 %v636_v0 }
 0x121   : > { %v1119_v8 = vpop.eup %1118  ;;  %v743_v9 = vmul.f32 %v1117_v4, %v1406_v28  ;;  %1140 = vpow2.f32 %v920_v58  ;;  %v1515_v28 = vadd.f32 %v1454_v15, %v1400_v24  ;;  %v921_v15 = vmul.f32 -1.442695, %v1500_v7 }
 0x122   : > { %v1121_v13 = vpop.eup %1120  ;;  %759 = vst [vmem:[%s1508_s4 + $0x10] sm:$0xff] %v727_v5  ;;  %v725_v27 = vmul.f32 %v1119_v8, %v1409_v31  ;;  %1142 = vpow2.f32 %v902_v1 }
 0x123   : > { %v1123_v16 = vpop.eup %1122  ;;  %775 = vst [vmem:[%s1508_s4 + $0x90] sm:$0xff] %v743_v9  ;;  %v741_v14 = vmul.f32 %v1121_v13, %v1412_v32  ;;  %1144 = vpow2.f32 %v918_v6  ;;  %v924_v21 = vmul.f32 -1.442695, %v1515_v28 }
 0x124   : > { %v1125_v31 = vpop.eup %1124  ;;  %757 = vst [vmem:[%s1508_s4] sm:$0xff] %v725_v27  ;;  %v728_v20 = vmul.f32 %v1123_v16, %v1417_v37  ;;  %1146 = vpow2.f32 %v907_v12  ;;  %v1563_v16 = vadd.f32 %v1400_v24, %v1474_v46  ;;  %v1575_v46 = vadd.f32 %v1487_v60, %v1400_v24 }
 0x125   : > { %v1127_v32 = vpop.eup %1126  ;;  %773 = vst [vmem:[%s1508_s4 + $0x80] sm:$0xff] %v741_v14  ;;  %v744_v23 = vmul.f32 %v1125_v31, %v1420_v38  ;;  %1148 = vpow2.f32 %v923_v11  ;;  %v1567_v31 = vadd.f32 %v1400_v24, %v1479_v50  ;;  %v1585_v60 = vadd.f32 %v1400_v24, %v1495_v3 }
 0x126   : > { %v1129_v37 = vpop.eup %1128  ;;  %760 = vst [vmem:[%s1508_s4 + $0x18] sm:$0xff] %v728_v20  ;;  %v726_v26 = vmul.f32 %v1127_v32, %v1425_v43  ;;  %1150 = vpow2.f32 %v905_v17  ;;  %v922_v43 = vmul.f32 -1.442695, %v1529_v22  ;;  %v1571_v32 = vadd.f32 %v1481_v53, %v1400_v24 }
 0x127   : > { %v1131_v30 = vpop.eup %1130  ;;  %776 = vst [vmem:[%s1508_s4 + $0x98] sm:$0xff] %v744_v23  ;;  %v742_v38 = vmul.f32 %v1129_v37, %v1428_v44  ;;  %1152 = vpow2.f32 %v921_v15  ;;  %v911_v44 = vmul.f32 -1.442695, %v1535_v25  ;;  %v909_v50 = vmul.f32 -1.442695, %v1563_v16 }
 0x128   : > { %v1133_v35 = vpop.eup %1132  ;;  %758 = vst [vmem:[%s1508_s4 + $0x8] sm:$0xff] %v726_v26  ;;  %v731_v39 = vmul.f32 %v1131_v30, %v1435_v51  ;;  %1154 = vpow2.f32 %v908_v18  ;;  %v927_v51 = vmul.f32 -1.442695, %v1541_v29 }
 0x129   : > { %v1135_v40 = vpop.eup %1134  ;;  %774 = vst [vmem:[%s1508_s4 + $0x88] sm:$0xff] %v742_v38  ;;  %v747_v41 = vmul.f32 %v1133_v35, %v1438_v52  ;;  %1156 = vpow2.f32 %v924_v21  ;;  %v1580_v21 = vadd.f32 %v1400_v24, %v1489_v62  ;;  %v925_v38 = vmul.f32 -1.442695, %v1567_v31 }
 0x12a   : > { %v1137_v45 = vpop.eup %1136  ;;  %763 = vst [vmem:[%s1508_s4 + $0x30] sm:$0xff] %v731_v39  ;;  %v729_v47 = vmul.f32 %v1135_v40, %v1441_v55  ;;  %1158 = vpow2.f32 %v906_v34  ;;  %v912_v39 = vmul.f32 -1.442695, %v1571_v32  ;;  %v928_v40 = vmul.f32 -1.442695, %v1575_v46 }
 0x12b   : > { %v1139_v48 = vpop.eup %1138  ;;  %779 = vst [vmem:[%s1508_s4 + $0xb0] sm:$0xff] %v747_v41  ;;  %v745_v54 = vmul.f32 %v1137_v45, %v1444_v56  ;;  %1160 = vpow2.f32 %v922_v43  ;;  %v910_v24 = vmul.f32 -1.442695, %v1580_v21 }
 0x12c   : > { %v1141_v57 = vpop.eup %1140  ;;  %761 = vst [vmem:[%s1508_s4 + $0x20] sm:$0xff] %v729_v47  ;;  %v732_v52 = vmul.f32 %v1139_v48, %v1449_v61  ;;  %1162 = vpow2.f32 %v911_v44 }
 0x12d   : > { %v1143_v58 = vpop.eup %1142  ;;  %777 = vst [vmem:[%s1508_s4 + $0xa0] sm:$0xff] %v745_v54  ;;  %v652_v63 = vadd.f32 1.0, %v1141_v57  ;;  %1164 = vpow2.f32 %v927_v51 }
 0x12e   : > { %v1145_v0 = vpop.eup %1144  ;;  %764 = vst [vmem:[%s1508_s4 + $0x38] sm:$0xff] %v732_v52  ;;  %v634_v55 = vadd.f32 1.0, %v1143_v58 }
 0x12f   : > { %v1147_v1 = vpop.eup %1146  ;;  %1166 = vrcp.f32 %v652_v63  ;;  %v650_v4 = vadd.f32 1.0, %v1145_v0 }
 0x130   : > { %v1149_v5 = vpop.eup %1148  ;;  %1168 = vrcp.f32 %v634_v55  ;;  %v639_v56 = vadd.f32 1.0, %v1147_v1 }
 0x131   : > { %v1151_v6 = vpop.eup %1150  ;;  %1170 = vrcp.f32 %v650_v4  ;;  %v655_v8 = vadd.f32 1.0, %v1149_v5 }
 0x132   : > { %v1153_v9 = vpop.eup %1152  ;;  %1172 = vrcp.f32 %v639_v56  ;;  %v637_v61 = vadd.f32 1.0, %v1151_v6 }
 0x133   : > { %v1155_v12 = vpop.eup %1154  ;;  %1174 = vrcp.f32 %v655_v8  ;;  %v653_v13 = vadd.f32 1.0, %v1153_v9 }
 0x134   : > { %v1157_v27 = vpop.eup %1156  ;;  %1176 = vrcp.f32 %v637_v61  ;;  %v640_v11 = vadd.f32 1.0, %v1155_v12 }
 0x135   : > { %v1159_v14 = vpop.eup %1158  ;;  %1178 = vrcp.f32 %v653_v13  ;;  %v656_v17 = vadd.f32 1.0, %v1157_v27 }
 0x136   : > { %v1161_v20 = vpop.eup %1160  ;;  %1180 = vrcp.f32 %v640_v11  ;;  %v638_v15 = vadd.f32 1.0, %v1159_v14 }
 0x137   : > { %v1163_v23 = vpop.eup %1162  ;;  %1182 = vrcp.f32 %v656_v17  ;;  %v654_v18 = vadd.f32 1.0, %v1161_v20 }
 0x138   : > { %v1165_v37 = vpop.eup %1164  ;;  %1184 = vrcp.f32 %v638_v15  ;;  %v643_v26 = vadd.f32 1.0, %v1163_v23 }
 0x139   : > { %v1167_v30 = vpop.eup %1166  ;;  %1186 = vrcp.f32 %v654_v18  ;;  %v659_v53 = vadd.f32 1.0, %v1165_v37 }
 0x13a   : > { %v1169_v34 = vpop.eup %1168  ;;  %v748_v35 = vmul.f32 %v1167_v30, %v1462_v33  ;;  %1188 = vrcp.f32 %v643_v26 }
 0x13b   : > { %v1171_v43 = vpop.eup %1170  ;;  %v730_v62 = vmul.f32 %v1169_v34, %v1465_v36  ;;  %1190 = vrcp.f32 %v659_v53  ;;  %v926_v36 = vmul.f32 -1.442695, %v1585_v60 }
 0x13c   : > { %v1173_v41 = vpop.eup %1172  ;;  %780 = vst [vmem:[%s1508_s4 + $0xb8] sm:$0xff] %v748_v35  ;;  %v746_v44 = vmul.f32 %v1171_v43, %v1472_v42  ;;  %1192 = vpow2.f32 %v909_v50 }
 0x13d   : > { %v1175_v33 = vpop.eup %1174  ;;  %762 = vst [vmem:[%s1508_s4 + $0x28] sm:$0xff] %v730_v62  ;;  %v735_v3 = vmul.f32 %v1173_v41, %v1477_v49  ;;  %1194 = vpow2.f32 %v925_v38 }
 0x13e   : > { %v1177_v45 = vpop.eup %1176  ;;  %778 = vst [vmem:[%s1508_s4 + $0xa8] sm:$0xff] %v746_v44  ;;  %v751_v47 = vmul.f32 %v1175_v33, %v1485_v59  ;;  %1196 = vpow2.f32 %v912_v39 }
 0x13f   : > { %v1179_v51 = vpop.eup %1178  ;;  %767 = vst [vmem:[%s1508_s4 + $0x50] sm:$0xff] %v735_v3  ;;  %v733_v42 = vmul.f32 %v1177_v45, %v1493_v2  ;;  %1198 = vpow2.f32 %v928_v40 }
 0x140   : > { %v1181_v48 = vpop.eup %1180  ;;  %783 = vst [vmem:[%s1508_s4 + $0xd0] sm:$0xff] %v751_v47  ;;  %v749_v49 = vmul.f32 %v1179_v51, %v1500_v7  ;;  %1200 = vpow2.f32 %v910_v24 }
 0x141   : > { %v1183_v54 = vpop.eup %1182  ;;  %765 = vst [vmem:[%s1508_s4 + $0x40] sm:$0xff] %v733_v42  ;;  %v736_v57 = vmul.f32 %v1181_v48, %v1505_v10  ;;  %1202 = vpow2.f32 %v926_v36 }
 0x142   : > { %v1185_v59 = vpop.eup %1184  ;;  %781 = vst [vmem:[%s1508_s4 + $0xc0] sm:$0xff] %v749_v49  ;;  %v752_v52 = vmul.f32 %v1183_v54, %v1515_v28 }
 0x143   : > { %v1187_v2 = vpop.eup %1186  ;;  %768 = vst [vmem:[%s1508_s4 + $0x58] sm:$0xff] %v736_v57  ;;  %v734_v58 = vmul.f32 %v1185_v59, %v1522_v19 }
 0x144   : > { %v1189_v63 = vpop.eup %1188  ;;  %784 = vst [vmem:[%s1508_s4 + $0xd8] sm:$0xff] %v752_v52  ;;  %v750_v7 = vmul.f32 %v1187_v2, %v1529_v22 }
 0x145   : > { %v1191_v0 = vpop.eup %1190  ;;  %766 = vst [vmem:[%s1508_s4 + $0x48] sm:$0xff] %v734_v58  ;;  %v739_v55 = vmul.f32 %v1189_v63, %v1535_v25 }
 0x146   : > { %v1193_v10 = vpop.eup %1192  ;;  %782 = vst [vmem:[%s1508_s4 + $0xc8] sm:$0xff] %v750_v7  ;;  %v755_v1 = vmul.f32 %v1191_v0, %v1541_v29 }
 0x147   : > { %v1195_v4 = vpop.eup %1194  ;;  %771 = vst [vmem:[%s1508_s4 + $0x70] sm:$0xff] %v739_v55  ;;  %v641_v28 = vadd.f32 1.0, %v1193_v10 }
 0x148   : > { %v1197_v5 = vpop.eup %1196  ;;  %787 = vst [vmem:[%s1508_s4 + $0xf0] sm:$0xff] %v755_v1  ;;  %v657_v56 = vadd.f32 1.0, %v1195_v4 }
 0x149   : > { %v1199_v6 = vpop.eup %1198  ;;  %1204 = vrcp.f32 %v641_v28  ;;  %v644_v19 = vadd.f32 1.0, %v1197_v5 }
 0x14a   : > { %v1201_v8 = vpop.eup %1200  ;;  %1206 = vrcp.f32 %v657_v56  ;;  %v660_v22 = vadd.f32 1.0, %v1199_v6 }
 0x14b   : > { %v1203_v25 = vpop.eup %1202  ;;  %1208 = vrcp.f32 %v644_v19  ;;  %v642_v9 = vadd.f32 1.0, %v1201_v8 }
 0x14c   : > { %1210 = vrcp.f32 %v660_v22  ;;  %v658_v29 = vadd.f32 1.0, %v1203_v25 }
 0x14d   : > { %1212 = vrcp.f32 %v642_v9 }
 0x14e   : > { %1214 = vrcp.f32 %v658_v29 }
 0x153   : > { %v1205_v61 = vpop.eup %1204 }
 0x154   : > { %v1207_v12 = vpop.eup %1206  ;;  %v737_v13 = vmul.f32 %v1205_v61, %v1563_v16 }
 0x155   : > { %v1209_v27 = vpop.eup %1208  ;;  %v753_v11 = vmul.f32 %v1207_v12, %v1567_v31 }
 0x156   : > { %v1211_v14 = vpop.eup %1210  ;;  %769 = vst [vmem:[%s1508_s4 + $0x60] sm:$0xff] %v737_v13  ;;  %v740_v17 = vmul.f32 %v1209_v27, %v1571_v32 }
 0x157   : > { %v1213_v20 = vpop.eup %1212  ;;  %785 = vst [vmem:[%s1508_s4 + $0xe0] sm:$0xff] %v753_v11  ;;  %v756_v15 = vmul.f32 %v1211_v14, %v1575_v46 }
 0x158   : > { %v1215_v23 = vpop.eup %1214  ;;  %772 = vst [vmem:[%s1508_s4 + $0x78] sm:$0xff] %v740_v17  ;;  %v738_v16 = vmul.f32 %v1213_v20, %v1580_v21 }
 0x159   : > { %788 = vst [vmem:[%s1508_s4 + $0xf8] sm:$0xff] %v756_v15  ;;  %v754_v31 = vmul.f32 %v1215_v23, %v1585_v60 }
 0x15a   : > { %770 = vst [vmem:[%s1508_s4 + $0x68] sm:$0xff] %v738_v16 }
 0x15b   : > { %786 = vst [vmem:[%s1508_s4 + $0xe8] sm:$0xff] %v754_v31 }
 0x15c   : > { %1229 = shalt.err (!%p1226_p3)
}
 0x15d   : > { %s1230_s20 = scalar_lea.hbm %s1630_s16, 4096  ;;  %s1234_s26 = scalar_lea.hbm %s1684_s3, 8192 }
 0x15e   : > { %p1231_p4 = scmp.ne.s32.totalorder %s1630_s16, %s1230_s20  ;;  %p1235_p9 = scmp.lt.u32.totalorder %s1630_s16, %s1684_s3 }
 0x15f   : > { %p1236_p10 = scmp.lt.u32.totalorder %s1234_s26, %s1230_s20  ;;  %p1238_p12 = scmp.lt.u32.totalorder %s1230_s20, %s1630_s16 }
 0x160   : > { %p1232_p7 = pnand %p1231_p4, %p1341_p5 }
 0x161   : > { %p1237_p11 = por %p1236_p10, %p1235_p9 }
 0x162   : > { %p1233_p8 = pneg %p1232_p7 }
 0x163   : > { %p1239_p13 = por %p1238_p12, %p1237_p11 }
 0x165   : > { %p1240_p0 = pnand %p1239_p13, %p1233_p8 }
 0x167   : > { %1243 = shalt.err (!%p1240_p0)
}
 0x168   : > { %s1281_s29 = smov 128   ;;  %s1282_s30 = smov 8  }
 0x169   : > { %1023 = dma.vmem_to_hbm [thread:$0]  (%p1341_p5), %s1632_s6, 4096, %s1630_s16, %s1640_s9, %s1281_s29, %s1281_s29, %s1282_s30  }
 0x16a PF: > { %p1029_p1 = scmp.ge.s32.totalorder %s1278_s15, 2  ;;  %s818_s4 = sand.u32 1, %s1266_s12  }
 0x16b   : > { %s819_s5 = scalar_lea.sflag [#allocation3], %s818_s4 }
 0x16c   : > { %p1026_p2 = pnand %p1029_p1, %p1345_p6 }
 0x16e   : > { %1261 = dma.done.wait (!%p1026_p2), %s819_s5, 4096  }
 0x16f   : > { %1263 = vsyncadd (!%p1026_p2), %s819_s5, 4294963200  ;;  %p13_p3 = scmp.ge.s32.totalorder %s1328_s18, 4   ;;  %s1687_s12 = smov %s1270_s13 }
 0x170   : > { %s1688_s13 = smov %s1274_s14  ;;  %s1689_s14 = smov %s1339_s21 }
 0x171   : > { %s1690_s15 = smov %s1328_s18  ;;  %15 = sbr.rel (!%p13_p3) target bundleno = 3 (0x3), region = 67 }
 0x178   :  { %824 = vsyncpa [#allocation3], 1 }
 0x179   :  { %826 = vsyncpa [#allocation3 + $0x1], 1 }

</bundles_post_ra>
